<compile_context>
chip_gen: v7x
topology: tpu7x:2x2x1
jax: 0.10.0
libtpu: 0.0.40
codegen_flags: <defaults>
</compile_context>

<pallas_src>
import functools

import jax
import jax.numpy as jnp
from jax.experimental import pallas as pl
from jax.experimental.pallas import tpu as pltpu


def _round_up(x, m):
    return (x + m - 1) // m * m


def _chip_info():
    """Best-effort chip introspection (pure Python, trace time only)."""
    try:
        kind = jax.devices()[0].device_kind.lower()
    except Exception:
        kind = ""
    # bf16 EUP path exists on v6e / v7x; keep f32 transcendentals elsewhere (v5e etc.).
    bf16_eup = ("v6" in kind) or ("v7" in kind) or ("7x" in kind)
    # Chips where one jax device == one TensorCore (no benefit from splitting batch).
    single_tc = any(tag in kind for tag in ("v2", "v3", "v5", "v6"))
    vmem_cap = None
    try:
        vmem_cap = int(pltpu.get_tpu_info().vmem_capacity_bytes)
    except Exception:
        vmem_cap = None
    if not vmem_cap:
        vmem_cap = (64 << 20) if (("v7" in kind) or ("7x" in kind)) else (128 << 20)
    return bf16_eup, single_tc, vmem_cap


# --------------------------- fused kernel -----------------------------------
def _fused_encode_pool_kernel(lastpos_ref, emb_ref, mask_ref, w_ref, b_ref,
                              o_ref, den_ref, *, bf16_tanh):
    """Grid point (bi, si):
         hid      = tanh(emb_tile @ w + b)          bf16 MXU matmul, f32 accumulate
         o_ref   += sum(hid * mask_tile, axis=S)    output doubles as accumulator
         den_ref += sum(mask_tile, axis=S)
       last si:   o_ref /= clamp(den_ref, 1e-9)
       S tiles entirely past the last valid token of this batch tile are skipped.
    """
    bi = pl.program_id(0)
    si = pl.program_id(1)
    tb, ts, h = emb_ref.shape

    @pl.when(si == 0)
    def _init():
        o_ref[...] = jnp.zeros_like(o_ref)
        den_ref[...] = jnp.zeros_like(den_ref)

    @pl.when(si * ts < lastpos_ref[bi])          # skip fully-masked S tiles
    def _compute():
        # Layout-preserving merge of the leading dims -> (tb*ts, H) for the MXU.
        x = emb_ref[...].reshape(tb * ts, h)                         # bf16
        y = jnp.dot(x, w_ref[...], preferred_element_type=jnp.float32)
        y = y + b_ref[...]                                           # f32 bias
        if bf16_tanh:
            # v6e/v7x: bf16 EUP roughly halves transcendental time.
            hid = jnp.tanh(y.astype(jnp.bfloat16)).astype(jnp.float32)
        else:
            hid = jnp.tanh(y)                                        # v5e: f32 EUP
        hid = hid.reshape(tb, ts, h)

        mask = mask_ref[...]                                         # (tb, ts) f32
        o_ref[...] += jnp.sum(hid * mask[:, :, None], axis=1)        # (tb, H)
        den_ref[...] += jnp.sum(mask, axis=1, keepdims=True)         # (tb, 1)

    @pl.when(si == pl.num_programs(1) - 1)
    def _finalize():
        # torch.clamp(mask_sum, min=1e-9); exact division (B scalars, free).
        o_ref[...] = o_ref[...] / jnp.maximum(den_ref[...], 1e-9)


def fused_encode_pool(emb, attention_mask, w, b, *, ts_cap=512):
    """emb: [B,S,H] bf16, mask: [B,S] f32, w: [H,H] bf16, b: [1,H] f32 -> [B,H] f32."""
    B, S, H = emb.shape
    bf16_eup, single_tc, vmem_cap = _chip_info()

    Hp = _round_up(H, 128)                 # lane-dense last dim
    Sp = _round_up(S, 16)                  # bf16 sublane packing for (tb*ts, H) reshape
    if Sp <= ts_cap:
        ts = Sp                            # full (padded) sequence per grid step
    else:
        ts = ts_cap
        Sp = _round_up(Sp, ts)

    # Batch tile: biggest that keeps the double-buffered emb blocks within budget;
    # on 2-TC chips keep >= 2 batch tiles so the "parallel" axis can shard.
    budget = min(16 << 20, vmem_cap // 8)
    tb = max(1, budget // (2 * ts * Hp * 2))
    if (not single_tc) and B >= 2:
        tb = min(tb, B // 2)
    if tb >= B:
        tb, Bp = B, B
    else:
        tb = max(8, (tb // 8) * 8)         # sublane-aligned 2nd-minor dim (mask/out blocks)
        tb = min(tb, B)
        Bp = _round_up(B, tb)

    # Zero padding is exact: padded tokens / batch rows carry mask==0 (no numerator
    # or denominator contribution); padded H columns stay zero end-to-end.
    if (Bp, Sp, Hp) != (B, S, H):
        emb = jnp.pad(emb, ((0, Bp - B), (0, Sp - S), (0, Hp - H)))
    if (Bp, Sp) != (B, S):
        attention_mask = jnp.pad(attention_mask, ((0, Bp - B), (0, Sp - S)))
    if Hp != H:
        w = jnp.pad(w, ((0, Hp - H), (0, Hp - H)))
        b = jnp.pad(b, ((0, 0), (0, Hp - H)))

    nb = Bp // tb
    grid = (nb, Sp // ts)

    # Per-batch-tile last valid token position (robust to non-prefix masks); lets
    # the kernel skip fully-masked S tiles.  Scalar-prefetched into SMEM.
    pos = jnp.arange(1, Sp + 1, dtype=jnp.float32)[None, :]
    last_pos = jnp.max(attention_mask * pos, axis=1)                           # (Bp,)
    last_pos = jnp.max(last_pos.reshape(nb, tb), axis=1).astype(jnp.int32)     # (nb,)

    # VMEM budget from the actual (double-buffered) blocks + f32 intermediates,
    # capped at 75% of this chip's VMEM (re-derived for v7x's 64 MiB).
    block_bytes = (2 * tb * ts * Hp * 2      # emb tiles (bf16)
                   + 2 * tb * ts * 4         # mask tiles
                   + 2 * Hp * Hp * 2         # weights (grid-invariant)
                   + 2 * Hp * 4              # bias
                   + 2 * tb * Hp * 4         # pooled output (VMEM-resident accumulator)
                   + tb * 128 * 4)           # denominator scratch (padded)
    intermediates = 3 * tb * ts * Hp * 4     # y / hid / masked product f32 working set
    vmem_limit = min(int(0.75 * vmem_cap),
                     max(32 << 20, block_bytes + intermediates + (8 << 20)))

    cost = pl.CostEstimate(
        flops=int(2 * Bp * Sp * Hp * Hp + 3 * Bp * Sp * Hp),
        transcendentals=int(Bp * Sp * Hp),
        bytes_accessed=int(emb.size * 2 + attention_mask.size * 4
                           + w.size * 2 + b.size * 4 + Bp * Hp * 4))

    kernel = functools.partial(_fused_encode_pool_kernel, bf16_tanh=bf16_eup)

    out = pl.pallas_call(
        kernel,
        out_shape=jax.ShapeDtypeStruct((Bp, Hp), jnp.float32),
        grid_spec=pltpu.PrefetchScalarGridSpec(
            num_scalar_prefetch=1,                                   # last_pos -> SMEM
            grid=grid,
            in_specs=[
                pl.BlockSpec((tb, ts, Hp), lambda bi, si, lp: (bi, si, 0)),   # emb tile
                pl.BlockSpec((tb, ts), lambda bi, si, lp: (bi, si)),          # mask tile
                # Grid-invariant weight/bias: constant index_map -> DMA'd once.
                # (For H ~ 1024+ on v7x add pipeline_mode=pl.Buffered(1) to halve
                #  their VMEM footprint; irrelevant at H=128.)
                pl.BlockSpec((Hp, Hp), lambda bi, si, lp: (0, 0)),            # weights
                pl.BlockSpec((1, Hp), lambda bi, si, lp: (0, 0)),             # bias
            ],
            out_specs=pl.BlockSpec((tb, Hp), lambda bi, si, lp: (bi, 0)),     # pooled
            scratch_shapes=[
                pltpu.VMEM((tb, 1), jnp.float32),    # denominator accumulator
            ],
        ),
        compiler_params=pltpu.CompilerParams(
            dimension_semantics=("parallel", "arbitrary"),
            vmem_limit_bytes=int(vmem_limit),
        ),
        cost_estimate=cost,
    )(last_pos, emb, attention_mask, w, b)

    return out[:B, :H]


# --------------------------- SBERT forward -----------------------------------
@jax.jit
def sbert_forward(params, input_ids, attention_mask):
    """Synthetic encoder (token+pos embedding -> dense -> tanh) + masked mean pooling.

    The embedding gather stays in XLA but runs fully in bf16 (tables stored in
    bf16), halving the HBM traffic of the [B,S,H] intermediate; the dense layer,
    tanh and the masked mean pooling run in one fused Pallas kernel so the hidden
    tensor never makes an extra HBM round trip.
    """
    B, S = input_ids.shape
    # TODO(synk): for production vocab sizes, fold this gather into the kernel via a
    # per-tile DMA row-gather (memory_space=pl.ANY + scalar-prefetched ids); at this
    # vocab/hidden size an in-kernel gather costs more VPU/VMEM work than the HBM saved.
    emb = params["tok_emb"][input_ids] + params["pos_emb"][None, :S, :]   # bf16
    w = params["w"].astype(jnp.bfloat16)     # bf16 weights for the MXU
    b = params["b"].astype(jnp.float32)
    return fused_encode_pool(emb, attention_mask.astype(jnp.float32), w, b)


if __name__ == "__main__":
    B, S, H, V = 16, 256, 128, 1000

    key = jax.random.PRNGKey(0)
    k1, k2, k3, k4, k5 = jax.random.split(key, 5)

    params = {
        # Embedding tables stored in bf16 (halves gather-side HBM reads/writes);
        # the dense weight keeps an f32 master copy, cast to bf16 for the MXU.
        "tok_emb": (jax.random.normal(k1, (V, H), dtype=jnp.float32) * 0.02).astype(jnp.bfloat16),
        "pos_emb": (jax.random.normal(k2, (S, H), dtype=jnp.float32) * 0.02).astype(jnp.bfloat16),
        "w": jax.random.normal(k3, (H, H), dtype=jnp.float32) * 0.1,
        "b": jax.random.normal(k4, (1, H), dtype=jnp.float32) * 0.1,
    }

    input_ids = jax.random.randint(k5, (B, S), 0, V, dtype=jnp.int32)
    # deterministic per-row valid lengths with padding zeros in the mask
    lengths = (jnp.arange(B, dtype=jnp.int32) * 13) % S + 5
    attention_mask = (jnp.arange(S)[None, :] < lengths[:, None]).astype(jnp.float32)

    out = sbert_forward(params, input_ids, attention_mask)
    out = jax.block_until_ready(out)
    assert out.shape == (B, H)

    # Plain-JAX reference mirroring the kernel's bf16 operands (f32 math otherwise).
    emb = (params["tok_emb"][input_ids] + params["pos_emb"][None, :S, :]).astype(jnp.float32)
    w_bf = params["w"].astype(jnp.bfloat16).astype(jnp.float32)
    hidden = jnp.tanh(emb @ w_bf + params["b"])
    m = attention_mask[:, :, None]
    ref = jnp.sum(hidden * m, axis=1) / jnp.maximum(jnp.sum(m, axis=1), 1e-9)

    err = float(jnp.max(jnp.abs(out - ref)))
    assert jnp.allclose(out, ref, atol=5e-3, rtol=5e-3), err

    print("KERNEL_OK")
</pallas_src>

<mosaic_0001>
module attributes {stable_mosaic.version = 11 : i64} {
  func.func @_fused_encode_pool_kernel(%arg0: i32, %arg1: i32, %arg2: memref<2xi32, #tpu.memory_space<smem>>, %arg3: memref<8x256x128xbf16, #tpu.memory_space<vmem>>, %arg4: memref<8x256xf32, #tpu.memory_space<vmem>>, %arg5: memref<128x128xbf16, #tpu.memory_space<vmem>>, %arg6: memref<1x128xf32, #tpu.memory_space<vmem>>, %arg7: memref<8x128xf32, #tpu.memory_space<vmem>>, %arg8: memref<8x1xf32, #tpu.memory_space<vmem>>) attributes {dimension_semantics = [#tpu.dimension_semantics<parallel>, #tpu.dimension_semantics<arbitrary>], iteration_bounds = array<i64: 2, 1>, scalar_prefetch = 1 : i64, scratch_operands = 1 : i64, tpu.core_type = #tpu.core_type<tc>, window_params = [{transform_indices = @transform_0, window_bounds = array<i64: 8, 256, 128>}, {transform_indices = @transform_1, window_bounds = array<i64: 8, 256>}, {pipeline_mode = #tpu.pipeline_mode<synchronous>, transform_indices = @transform_2, window_bounds = array<i64: 128, 128>}, {pipeline_mode = #tpu.pipeline_mode<synchronous>, transform_indices = @transform_3, window_bounds = array<i64: 1, 128>}, {transform_indices = @transform_4, window_bounds = array<i64: 8, 128>}]} {
    %c0_i32 = arith.constant 0 : i32
    %0 = arith.cmpi eq, %arg1, %c0_i32 : i32
    %1 = arith.extui %0 : i1 to i32
    %c0_i32_0 = arith.constant 0 : i32
    %2 = arith.cmpi ne, %1, %c0_i32_0 : i32
    scf.if %2 {
      %cst = arith.constant 0.000000e+00 : f32
      %12 = vector.broadcast %cst : f32 to vector<8x128xf32>
      %c0 = arith.constant 0 : index
      %c0_4 = arith.constant 0 : index
      %13 = vector.load %arg7[%c0, %c0_4] : memref<8x128xf32, #tpu.memory_space<vmem>>, vector<8x128xf32>
      tpu.vector_store %arg7[%c0, %c0_4], %12 {strides = array<i32>} : memref<8x128xf32, #tpu.memory_space<vmem>>, vector<8x128xf32>,
      %cst_5 = arith.constant 0.000000e+00 : f32
      %14 = vector.broadcast %cst_5 : f32 to vector<8x1xf32>
      %c0_6 = arith.constant 0 : index
      %c0_7 = arith.constant 0 : index
      %15 = vector.load %arg8[%c0_6, %c0_7] : memref<8x1xf32, #tpu.memory_space<vmem>>, vector<8x1xf32>
      tpu.vector_store %arg8[%c0_6, %c0_7], %14 {strides = array<i32>} : memref<8x1xf32, #tpu.memory_space<vmem>>, vector<8x1xf32>,
    } else {
    }
    %c256_i32 = arith.constant 256 : i32
    %3 = arith.muli %arg1, %c256_i32 : i32
    %4 = arith.index_cast %arg0 : i32 to index
    %5 = memref.load %arg2[%4] : memref<2xi32, #tpu.memory_space<smem>>
    %6 = arith.cmpi slt, %3, %5 : i32
    %7 = arith.extui %6 : i1 to i32
    %c0_i32_1 = arith.constant 0 : i32
    %8 = arith.cmpi ne, %7, %c0_i32_1 : i32
    scf.if %8 {
      %c0 = arith.constant 0 : index
      %c0_4 = arith.constant 0 : index
      %c0_5 = arith.constant 0 : index
      %12 = vector.load %arg3[%c0, %c0_4, %c0_5] : memref<8x256x128xbf16, #tpu.memory_space<vmem>>, vector<8x256x128xbf16>
      %13 = vector.shape_cast %12 : vector<8x256x128xbf16> to vector<2048x128xbf16>
      %c0_6 = arith.constant 0 : index
      %c0_7 = arith.constant 0 : index
      %14 = vector.load %arg5[%c0_6, %c0_7] : memref<128x128xbf16, #tpu.memory_space<vmem>>, vector<128x128xbf16>
      %cst = arith.constant dense<0.000000e+00> : vector<2048x128xf32>
      %15 = tpu.matmul %13, %14, %cst {dimension_numbers = #tpu.dot_dimension_numbers<[1], [0], [0], [1], [0, 0, 1, 1], [], []>} : vector<2048x128xbf16>, vector<128x128xbf16>, vector<2048x128xf32> -> vector<2048x128xf32>
      %c0_8 = arith.constant 0 : index
      %c0_9 = arith.constant 0 : index
      %16 = vector.load %arg6[%c0_8, %c0_9] : memref<1x128xf32, #tpu.memory_space<vmem>>, vector<1x128xf32>
      %17 = vector.broadcast %16 : vector<1x128xf32> to vector<2048x128xf32>
      %18 = arith.addf %15, %17 : vector<2048x128xf32>
      %19 = math.tanh %18 : vector<2048x128xf32>
      %20 = vector.shape_cast %19 : vector<2048x128xf32> to vector<8x256x128xf32>
      %c0_10 = arith.constant 0 : index
      %c0_11 = arith.constant 0 : index
      %21 = vector.load %arg4[%c0_10, %c0_11] : memref<8x256xf32, #tpu.memory_space<vmem>>, vector<8x256xf32>
      %c0_12 = arith.constant 0 : index
      %c0_13 = arith.constant 0 : index
      %22 = vector.load %arg7[%c0_12, %c0_13] : memref<8x128xf32, #tpu.memory_space<vmem>>, vector<8x128xf32>
      %23 = vector.shape_cast %21 : vector<8x256xf32> to vector<8x256x1xf32>
      %24 = vector.broadcast %23 : vector<8x256x1xf32> to vector<8x256x128xf32>
      %25 = arith.mulf %20, %24 : vector<8x256x128xf32>
      %cst_14 = arith.constant dense<0.000000e+00> : vector<8x128xf32>
      %26 = vector.multi_reduction <add>, %25, %cst_14 [1] : vector<8x256x128xf32> to vector<8x128xf32>
      %27 = arith.addf %22, %26 : vector<8x128xf32>
      %c0_15 = arith.constant 0 : index
      %c0_16 = arith.constant 0 : index
      %28 = vector.load %arg7[%c0_15, %c0_16] : memref<8x128xf32, #tpu.memory_space<vmem>>, vector<8x128xf32>
      tpu.vector_store %arg7[%c0_15, %c0_16], %27 {strides = array<i32>} : memref<8x128xf32, #tpu.memory_space<vmem>>, vector<8x128xf32>,
      %c0_17 = arith.constant 0 : index
      %c0_18 = arith.constant 0 : index
      %29 = vector.load %arg8[%c0_17, %c0_18] : memref<8x1xf32, #tpu.memory_space<vmem>>, vector<8x1xf32>
      %cst_19 = arith.constant dense<0.000000e+00> : vector<8xf32>
      %30 = vector.multi_reduction <add>, %21, %cst_19 [1] : vector<8x256xf32> to vector<8xf32>
      %31 = vector.shape_cast %30 : vector<8xf32> to vector<8x1xf32>
      %32 = arith.addf %29, %31 : vector<8x1xf32>
      %c0_20 = arith.constant 0 : index
      %c0_21 = arith.constant 0 : index
      %33 = vector.load %arg8[%c0_20, %c0_21] : memref<8x1xf32, #tpu.memory_space<vmem>>, vector<8x1xf32>
      tpu.vector_store %arg8[%c0_20, %c0_21], %32 {strides = array<i32>} : memref<8x1xf32, #tpu.memory_space<vmem>>, vector<8x1xf32>,
    } else {
    }
    %c0_i32_2 = arith.constant 0 : i32
    %9 = arith.cmpi eq, %arg1, %c0_i32_2 : i32
    %10 = arith.extui %9 : i1 to i32
    %c0_i32_3 = arith.constant 0 : i32
    %11 = arith.cmpi ne, %10, %c0_i32_3 : i32
    scf.if %11 {
      %c0 = arith.constant 0 : index
      %c0_4 = arith.constant 0 : index
      %12 = vector.load %arg7[%c0, %c0_4] : memref<8x128xf32, #tpu.memory_space<vmem>>, vector<8x128xf32>
      %c0_5 = arith.constant 0 : index
      %c0_6 = arith.constant 0 : index
      %13 = vector.load %arg8[%c0_5, %c0_6] : memref<8x1xf32, #tpu.memory_space<vmem>>, vector<8x1xf32>
      %cst = arith.constant 9.99999971E-10 : f32
      %14 = vector.broadcast %cst : f32 to vector<8x1xf32>
      %15 = arith.maximumf %13, %14 : vector<8x1xf32>
      %16 = vector.broadcast %15 : vector<8x1xf32> to vector<8x128xf32>
      %17 = arith.divf %12, %16 : vector<8x128xf32>
      %c0_7 = arith.constant 0 : index
      %c0_8 = arith.constant 0 : index
      %18 = vector.load %arg7[%c0_7, %c0_8] : memref<8x128xf32, #tpu.memory_space<vmem>>, vector<8x128xf32>
      tpu.vector_store %arg7[%c0_7, %c0_8], %17 {strides = array<i32>} : memref<8x128xf32, #tpu.memory_space<vmem>>, vector<8x128xf32>,
    } else {
    }
    return
  }
  func.func @transform_0(%arg0: i32, %arg1: i32, %arg2: memref<2xi32, #tpu.memory_space<smem>>) -> (i32, i32, i32) {
    %c0_i32 = arith.constant 0 : i32
    %c0_i32_0 = arith.constant 0 : i32
    return %arg0, %arg1, %c0_i32 : i32, i32, i32
  }
  func.func @transform_1(%arg0: i32, %arg1: i32, %arg2: memref<2xi32, #tpu.memory_space<smem>>) -> (i32, i32) {
    %c0_i32 = arith.constant 0 : i32
    return %arg0, %arg1 : i32, i32
  }
  func.func @transform_2(%arg0: i32, %arg1: i32, %arg2: memref<2xi32, #tpu.memory_space<smem>>) -> (i32, i32) {
    %c0_i32 = arith.constant 0 : i32
    %c0_i32_0 = arith.constant 0 : i32
    %c0_i32_1 = arith.constant 0 : i32
    return %c0_i32, %c0_i32_0 : i32, i32
  }
  func.func @transform_3(%arg0: i32, %arg1: i32, %arg2: memref<2xi32, #tpu.memory_space<smem>>) -> (i32, i32) {
    %c0_i32 = arith.constant 0 : i32
    %c0_i32_0 = arith.constant 0 : i32
    %c0_i32_1 = arith.constant 0 : i32
    return %c0_i32, %c0_i32_0 : i32, i32
  }
  func.func @transform_4(%arg0: i32, %arg1: i32, %arg2: memref<2xi32, #tpu.memory_space<smem>>) -> (i32, i32) {
    %c0_i32 = arith.constant 0 : i32
    %c0_i32_0 = arith.constant 0 : i32
    return %arg0, %c0_i32 : i32, i32
  }
}

</mosaic_0001>

<bundles_post_ra>
// kernel: sbert_forward.1
= control target key start
LH: loop header
LB: loop body
LE: loop exit
PB: predicated region body
PF: predicated region fallthrough
CT: control target
= control target key end

     0   :  { %s7745_s0 = inlined_call_operand.vmem [shape: s32[2], index: 0, kind: input, shape index: {}]   ;;  %s7746_s1 = inlined_call_operand.vmem [shape: bf16[16,256,128], index: 1, kind: input, shape index: {}]   ;;  %s7747_s2 = inlined_call_operand.vmem [shape: f32[16,256], index: 2, kind: input, shape index: {}]   ;;  %s7748_s3 = inlined_call_operand.vmem [shape: bf16[128,128], index: 3, kind: input, shape index: {}]   ;;  %s7749_s4 = inlined_call_operand.vmem [shape: f32[1,128], index: 4, kind: input, shape index: {}]   ;;  %s7750_s5 = inlined_call_operand.hbm [shape: f32[16,128], index: 5, kind: output, shape index: {}]  }
   0x1   :  { %s10_s20 = sshll.u32 %s7745_s0, 4  ;;  %s11_s20 = int_to_ptr.vmem [resolvable:$true] %s10_s20 }
   0x2   :  { %s5770_s21 = scalar_lea.vmem %s11_s20, 16  ;;  %p5775_p1 = scmp.lt.s32.totalorder %s11_s20, %s11_s20 }
   0x3   :  { %p5771_p0 = scmp.ne.s32.totalorder %s11_s20, %s5770_s21  ;;  %p5776_p2 = scmp.lt.s32.totalorder %s5770_s21, %s5770_s21 }
   0x5   :  { %p5777_p3 = por %p5776_p2, %p5775_p1 }
   0x7   :  { %p5778_p4 = pnand %p5777_p3, %p5771_p0 }
   0x9   :  { %5781 = shalt.err (!%p5778_p4)  }
   0xa   :  { %s5864_s22 = smov [#allocation4]  }
   0xb   :  { %13 = dma.vmem_to_smem %s11_s20, 16, %s5864_s22, [#allocation3] }
   0xc   :  { %5834 = dma.done.wait [#allocation3], 16 }
   0xd   :  { %5835 = vsyncadd [#allocation3], 4294967280 }
   0xe   :  { %15 = sfence }
   0xf   :  { %16 = vsyncpa [#allocation6], 0 }
  0x10   :  { %18 = vsyncpa [#allocation6 + $0x1], 0  ;;  %s5901_s23 = smov 0   ;;  %s5903_s24 = smov 0  }
  0x11   :  { %s5905_s0 = smov 0   ;;  %s5907_s25 = smov 0  }
  0x12   :  { %s5909_s26 = smov 0   ;;  %s5911_s27 = smov 0  }
  0x13 LB: > { %s4472_s28 = sadd.s32 4294967295, %s5862_s27   ;;  %s4473_s29 = sadd.s32 4294967294, %s5862_s27   ;;  %s5862_s27 = sphi %s5911_s27, %s24_s27   ;;  %s5858_s26 = sphi %s5909_s26, %s8074_s26   ;;  %s5854_s25 = sphi %s5907_s25, %s8073_s25   ;;  %s5850_s0 = sphi %s5905_s0, %s8072_s0   ;;  %s5846_s24 = sphi %s5903_s24, %s8071_s24   ;;  %s5842_s23 = sphi %s5901_s23, %s8070_s23  }
  0x14   : > { %s36_s30 = sadd.s32 1, %s5858_s26  ;;  %s141_s6 = sadd.s32 1, %s5850_s0 }
  0x15   : > { %p38_p5 = scmp.ge.s32.totalorder %s36_s30, 2  ;;  %p151_p6 = scmp.ne.s32.totalorder %s5850_s0, %s5846_s24 }
  0x16   : > { %p152_p7 = scmp.eq.s32.totalorder %s4472_s28, 1  ;;  %p157_p8 = scmp.ne.s32.totalorder %s5846_s24, %s5842_s23 }
  0x17   : > { %s8076_s30 = smov (%p38_p5, %s36_s30), 0  ;;  %p158_p10 = scmp.eq.s32.totalorder %s4473_s29, 1 }
  0x18   : > { %p5941_p9 = por %p152_p7, %p151_p6  ;;  %s138_s8 = ssub.s32 %s5858_s26, %s8076_s30 }
  0x19   : > { %p4476_p11 = scmp.ge.s32.totalorder %s5862_s27, 1  ;;  %p139_p12 = scmp.eq.s32.totalorder %s138_s8, 0 }
  0x1a   : > { %p5948_p13 = por %p158_p10, %p157_p8  ;;  %p210_p0 = scmp.lt.s32.totalorder %s5862_s27, 3 }
  0x1b   : > { %s5954_s10 = scalar_select %p139_p12, %s5850_s0, %s141_s6  }
  0x1c   : > { %p211_p1 = pnand %p4476_p11, %p210_p0 }
  0x1d   : > { %s247_s11 = sand.u32 (!%p211_p1), 1, %s5846_s24   ;;  %s4478_s12 = sshll.u32 (!%p211_p1), %s5854_s25, 3  ;;  %vm278_vm0 = vcmask (!%p211_p1), 7168   ;;  %v5865_v0 = vmov (!%p211_p1), 0.0  }
  0x1e   : > { %214 = sbr.rel (%p211_p1) target bundleno = 921 (0x399), region = 36  ;;  %s4477_s13 = sshll.u32 (!%p211_p1), %s247_s11, 3  ;;  %279 = vst.msk [vmem:[#allocation2] sm:$0xff] (!%p211_p1), %vm278_vm0, %v5865_v0 }
  0x1f   : > { %p252_p2 = scmp.lt.s32.totalorder (!%p211_p1), %s4478_s12, 15  ;;  %p263_p3 = scmp.lt.s32.totalorder (!%p211_p1), %s5854_s25, 1 }
  0x20   : > { %s5962_s14 = scalar_lea.vmem (!%p211_p1), [#allocation5], %s4477_s13  ;;  %s281_s17 = sld [smem:[#allocation4 + %s5854_s25]] (!%p211_p1) }
  0x21   : > { %277 = vst [vmem:[%s5962_s14] sm:$0xff] (!%p211_p1), %v5865_v0 }
  0x25   : > { %s8078_s12 = smov (!%p252_p2, %s4478_s12), 15 }
  0x26   : > { %s264_s15 = scalar_select %p263_p3, %s5854_s25, 1 }
  0x27   : > { %s4626_s16 = sshll.u32 %s8078_s12, 7  ;;  %p4484_p4 = scmp.le.s32.totalorder %s281_s17, 0 }
  0x28   : > { %s5970_s20 = scalar_lea.vmem %s7746_s1, %s4626_s16  ;;  %s4627_s21 = sshll.u32 %s264_s15, 4 }
  0x29   : > { %s5975_s29 = scalar_lea.vmem %s7747_s2, %s4627_s21  ;;  %285 = sbr.rel (%p4484_p4) target bundleno = 757 (0x2f5), region = 44 }
  0x30   : > { %v5110_v1 = vld [vmem:[%s7748_s3] sm:$0xff]   ;;  %v2697_v2 = vlaneseq  ;;  %v5111_v3 = vld [vmem:[%s7748_s3 + $0x8] sm:$0xff]   ;;  %v5112_v7 = vld [vmem:[%s7748_s3 + $0x10] sm:$0xff]   ;;  %vm4329_vm1 = vcmask 1041409   ;;  %vm4331_vm2 = vcmask 1042434   ;;  %vm4333_vm3 = vcmask 1043459  }
  0x31   : > { %4764 = vmatprep.subr.bf16.mxu0 %v5110_v1  ;;  %5036 = vmatprep.subr.bf16.mxu1 %v5110_v1  ;;  %v5986_v5 = vld [vmem:[%s5975_s29] sm:$0xff]  ;;  %v5113_v9 = vld [vmem:[%s7748_s3 + $0x18] sm:$0xff]   ;;  %v5115_v12 = vld [vmem:[%s7748_s3 + $0x28] sm:$0xff]   ;;  %vm4335_vm4 = vcmask 1044484   ;;  %vm4337_vm5 = vcmask 1045509   ;;  %vm4339_vm6 = vcmask 1046534  }
  0x32   : > { %v5983_v4 = vshrl.u32 %v2697_v2, 7  ;;  %4765 = vmatpush3.bf16.msra.mxu0 %v5110_v1  ;;  %5044 = vmatpush3.bf16.msra.mxu1 %v5110_v1  ;;  %v5118_v10 = vld [vmem:[%s5970_s20] sm:$0xff]   ;;  %v5116_v13 = vld [vmem:[%s7748_s3 + $0x30] sm:$0xff]   ;;  %v5117_v14 = vld [vmem:[%s7748_s3 + $0x38] sm:$0xff]   ;;  %vm4341_vm7 = vcmask 1047559  }
  0x33   : > { %4766 = vmatprep.subr.bf16.mxu0 %v5111_v3  ;;  %5037 = vmatprep.subr.bf16.mxu1 %v5111_v3  ;;  %v5114_v11 = vld [vmem:[%s7748_s3 + $0x20] sm:$0xff]   ;;  %v5119_v16 = vld [vmem:[%s5970_s20 + $0x8] sm:$0xff]   ;;  %v5120_v17 = vld [vmem:[%s5970_s20 + $0x10] sm:$0xff]  }
  0x34   : > { %v2699_v6 = vsub.s32 0, %v5983_v4  ;;  %4780 = vmatprep.mubr.bf16.mxu0 %v5118_v10  ;;  %v5134_v15 = vld [vmem:[%s5970_s20 + $0x200] sm:$0xff]   ;;  %v5135_v18 = vld [vmem:[%s5970_s20 + $0x208] sm:$0xff]   ;;  %v5138_v19 = vld [vmem:[%s5970_s20 + $0x210] sm:$0xff]   ;;  %v2833_v38 = vsub.s32 1, %v5983_v4 }
  0x35   : > { %4908 = vmatprep.mubr.bf16.mxu1 %v5134_v15  ;;  %v6017_v20 = vld [vmem:[%s5975_s29 + $0x8] sm:$0xff]  ;;  %v5121_v22 = vld [vmem:[%s5970_s20 + $0x18] sm:$0xff]   ;;  %v5122_v23 = vld [vmem:[%s5970_s20 + $0x20] sm:$0xff]   ;;  %v2967_v15 = vsub.s32 2, %v5983_v4 }
  0x36   : > { %v2700_v8 = vrot.slane %v5986_v5, %v2699_v6  ;;  %4767 = vmatpush3.bf16.msra.mxu0 %v5111_v3  ;;  %5045 = vmatpush3.bf16.msra.mxu1 %v5111_v3  ;;  %v2767_v21 = vrot.slane %v6017_v20, %v2699_v6  ;;  %v5139_v24 = vld [vmem:[%s5970_s20 + $0x218] sm:$0xff]   ;;  %v5142_v25 = vld [vmem:[%s5970_s20 + $0x220] sm:$0xff]   ;;  %v5123_v26 = vld [vmem:[%s5970_s20 + $0x28] sm:$0xff]   ;;  %v2834_v39 = vrot.slane %v5986_v5, %v2833_v38 }
  0x37   : > { %4768 = vmatprep.subr.bf16.mxu0 %v5112_v7  ;;  %5038 = vmatprep.subr.bf16.mxu1 %v5112_v7  ;;  %v5124_v27 = vld [vmem:[%s5970_s20 + $0x30] sm:$0xff]   ;;  %v5143_v28 = vld [vmem:[%s5970_s20 + $0x228] sm:$0xff]   ;;  %v5125_v30 = vld [vmem:[%s5970_s20 + $0x38] sm:$0xff]   ;;  %v2901_v56 = vrot.slane %v6017_v20, %v2833_v38 }
  0x38   : > { %2710 = vbcast.lane.b32.xlu1 %v2700_v8, 272  ;;  %2702 = vbcast.lane.b32.xlu0 %v2700_v8, 256  ;;  %v5146_v29 = vld [vmem:[%s5970_s20 + $0x230] sm:$0xff]   ;;  %v5126_v31 = vld [vmem:[%s5970_s20 + $0x40] sm:$0xff]   ;;  %v5147_v32 = vld [vmem:[%s5970_s20 + $0x238] sm:$0xff]  }
  0x39   : > { %v5150_v33 = vld [vmem:[%s5970_s20 + $0x240] sm:$0xff]   ;;  %v5127_v34 = vld [vmem:[%s5970_s20 + $0x48] sm:$0xff]   ;;  %v5128_v35 = vld [vmem:[%s5970_s20 + $0x50] sm:$0xff]  }
  0x3a   : > { %4769 = vmatpush3.bf16.msra.mxu0 %v5112_v7  ;;  %5046 = vmatpush3.bf16.msra.mxu1 %v5112_v7  ;;  %v5151_v36 = vld [vmem:[%s5970_s20 + $0x248] sm:$0xff]   ;;  %v5154_v37 = vld [vmem:[%s5970_s20 + $0x250] sm:$0xff]   ;;  %v5129_v40 = vld [vmem:[%s5970_s20 + $0x58] sm:$0xff]  }
  0x3b   : > { %4770 = vmatprep.subr.bf16.mxu0 %v5113_v9  ;;  %5039 = vmatprep.subr.bf16.mxu1 %v5113_v9  ;;  %v5130_v41 = vld [vmem:[%s5970_s20 + $0x60] sm:$0xff]   ;;  %v5155_v42 = vld [vmem:[%s5970_s20 + $0x258] sm:$0xff]   ;;  %v5131_v44 = vld [vmem:[%s5970_s20 + $0x68] sm:$0xff]  }
  0x3c   : > { %2714 = vbcast.lane.b32.xlu1 %v2700_v8, 280  ;;  %2706 = vbcast.lane.b32.xlu0 %v2700_v8, 264  ;;  %v5158_v43 = vld [vmem:[%s5970_s20 + $0x260] sm:$0xff]   ;;  %v5132_v45 = vld [vmem:[%s5970_s20 + $0x70] sm:$0xff]   ;;  %v5159_v46 = vld [vmem:[%s5970_s20 + $0x268] sm:$0xff]  }
  0x3d   : > { %v5162_v47 = vld [vmem:[%s5970_s20 + $0x270] sm:$0xff]   ;;  %v5133_v48 = vld [vmem:[%s5970_s20 + $0x78] sm:$0xff]   ;;  %v5136_v49 = vld [vmem:[%s5970_s20 + $0x80] sm:$0xff]  }
  0x3e   : > { %4771 = vmatpush3.bf16.msra.mxu0 %v5113_v9  ;;  %5047 = vmatpush3.bf16.msra.mxu1 %v5113_v9  ;;  %v5163_v50 = vld [vmem:[%s5970_s20 + $0x278] sm:$0xff]   ;;  %v5166_v51 = vld [vmem:[%s5970_s20 + $0x280] sm:$0xff]   ;;  %v5137_v52 = vld [vmem:[%s5970_s20 + $0x88] sm:$0xff]  }
  0x3f   : > { %4772 = vmatprep.subr.bf16.mxu0 %v5114_v11  ;;  %5040 = vmatprep.subr.bf16.mxu1 %v5114_v11  ;;  %v5140_v53 = vld [vmem:[%s5970_s20 + $0x90] sm:$0xff]   ;;  %v5167_v54 = vld [vmem:[%s5970_s20 + $0x288] sm:$0xff]   ;;  %v5141_v57 = vld [vmem:[%s5970_s20 + $0x98] sm:$0xff]  }
  0x40   : > { %2722 = vbcast.lane.b32.xlu1 %v2700_v8, 296  ;;  %2718 = vbcast.lane.b32.xlu0 %v2700_v8, 288  ;;  %v5170_v55 = vld [vmem:[%s5970_s20 + $0x290] sm:$0xff]   ;;  %v5144_v58 = vld [vmem:[%s5970_s20 + $0xa0] sm:$0xff]   ;;  %v5171_v59 = vld [vmem:[%s5970_s20 + $0x298] sm:$0xff]  }
  0x41   : > { %v5174_v60 = vld [vmem:[%s5970_s20 + $0x2a0] sm:$0xff]   ;;  %v5145_v61 = vld [vmem:[%s5970_s20 + $0xa8] sm:$0xff]   ;;  %v5148_v62 = vld [vmem:[%s5970_s20 + $0xb0] sm:$0xff]  }
  0x42   : > { %4773 = vmatpush3.bf16.msra.mxu0 %v5114_v11  ;;  %5048 = vmatpush3.bf16.msra.mxu1 %v5114_v11  ;;  %v5175_v63 = vld [vmem:[%s5970_s20 + $0x2a8] sm:$0xff]   ;;  %v5178_v0 = vld [vmem:[%s5970_s20 + $0x2b0] sm:$0xff]   ;;  %v5149_v1 = vld [vmem:[%s5970_s20 + $0xb8] sm:$0xff]  }
  0x43   : > { %4774 = vmatprep.subr.bf16.mxu0 %v5115_v12  ;;  %5041 = vmatprep.subr.bf16.mxu1 %v5115_v12  ;;  %v5152_v2 = vld [vmem:[%s5970_s20 + $0xc0] sm:$0xff]   ;;  %v5179_v3 = vld [vmem:[%s5970_s20 + $0x2b8] sm:$0xff]   ;;  %v5153_v9 = vld [vmem:[%s5970_s20 + $0xc8] sm:$0xff]  }
  0x44   : > { %2730 = vbcast.lane.b32.xlu1 %v2700_v8, 312  ;;  %2726 = vbcast.lane.b32.xlu0 %v2700_v8, 304  ;;  %v5182_v6 = vld [vmem:[%s5970_s20 + $0x2c0] sm:$0xff]   ;;  %v5156_v10 = vld [vmem:[%s5970_s20 + $0xd0] sm:$0xff]   ;;  %v5183_v11 = vld [vmem:[%s5970_s20 + $0x2c8] sm:$0xff]  }
  0x45   : > { %v5195_v38 = vld [vmem:[%s5970_s20 + $0x2f8] sm:$0xff]  }
  0x46   : > { %4775 = vmatpush3.bf16.msra.mxu0 %v5115_v12  ;;  %5049 = vmatpush3.bf16.msra.mxu1 %v5115_v12 }
  0x47   : > { %4776 = vmatprep.subr.bf16.mxu0 %v5116_v13  ;;  %5042 = vmatprep.subr.bf16.mxu1 %v5116_v13 }
  0x48   : > { %2738 = vbcast.lane.b32.xlu1 %v2700_v8, 328  ;;  %2734 = vbcast.lane.b32.xlu0 %v2700_v8, 320 }
  0x4a   : > { %4777 = vmatpush3.bf16.msra.mxu0 %v5116_v13  ;;  %5050 = vmatpush3.bf16.msra.mxu1 %v5116_v13 }
  0x4b   : > { %4778 = vmatprep.subr.bf16.mxu0 %v5117_v14  ;;  %5043 = vmatprep.subr.bf16.mxu1 %v5117_v14 }
  0x4c   : > { %2746 = vbcast.lane.b32.xlu1 %v2700_v8, 344  ;;  %2742 = vbcast.lane.b32.xlu0 %v2700_v8, 336 }
  0x4e   : > { %4779 = vmatpush3.bf16.msra.mxu0 %v5117_v14  ;;  %5051 = vmatpush3.bf16.msra.mxu1 %v5117_v14  ;;  %v5186_v14 = vld [vmem:[%s5970_s20 + $0x2d0] sm:$0xff]  }
  0x50   : > { %2754 = vbcast.lane.b32.xlu1 %v2700_v8, 360  ;;  %2750 = vbcast.lane.b32.xlu0 %v2700_v8, 352 }
  0x51   : > { %4781 = vmatmul.mubr.bf16.vlgmr.msra.gmra.mrb[0].mxu0 %v5119_v16  ;;  %4909 = vmatmul.mubr.bf16.vlgmr.msra.gmra.mrb[0].mxu1 %v5135_v18  ;;  %v6089_v18 = vrot.slane %v5986_v5, %v2967_v15 }
  0x52   : > { %4784 = vmatprep.mubr.bf16.mxu0 %v5120_v17  ;;  %4912 = vmatprep.mubr.bf16.mxu1 %v5138_v19 }
  0x54   : > { %2762 = vbcast.lane.b32.xlu1 %v2700_v8, 376  ;;  %2758 = vbcast.lane.b32.xlu0 %v2700_v8, 368 }
  0x58   : > { %2773 = vbcast.lane.b32.xlu1 %v2767_v21, 264  ;;  %2769 = vbcast.lane.b32.xlu0 %v2767_v21, 256 }
  0x59   : > { %4785 = vmatmul.mubr.bf16.gmra.mrb[4].mxu0 %v5121_v22  ;;  %4913 = vmatmul.mubr.bf16.gmra.mrb[4].mxu1 %v5139_v24  ;;  %v5157_v22 = vld [vmem:[%s5970_s20 + $0xd8] sm:$0xff]   ;;  %v5160_v24 = vld [vmem:[%s5970_s20 + $0xe0] sm:$0xff]  }
  0x5a   : > { %4788 = vmatprep.mubr.bf16.mxu0 %v5122_v23  ;;  %4916 = vmatprep.mubr.bf16.mxu1 %v5142_v25  ;;  %v5187_v23 = vld [vmem:[%s5970_s20 + $0x2d8] sm:$0xff]   ;;  %v5190_v25 = vld [vmem:[%s5970_s20 + $0x2e0] sm:$0xff]  }
  0x5c   : > { %2781 = vbcast.lane.b32.xlu1 %v2767_v21, 280  ;;  %2777 = vbcast.lane.b32.xlu0 %v2767_v21, 272 }
  0x60   : > { %2789 = vbcast.lane.b32.xlu1 %v2767_v21, 296  ;;  %2785 = vbcast.lane.b32.xlu0 %v2767_v21, 288 }
  0x61   : > { %4789 = vmatmul.mubr.bf16.gmra.mrb[8].mxu0 %v5123_v26  ;;  %4917 = vmatmul.mubr.bf16.gmra.mrb[8].mxu1 %v5143_v28 }
  0x62   : > { %4792 = vmatprep.mubr.bf16.mxu0 %v5124_v27  ;;  %4920 = vmatprep.mubr.bf16.mxu1 %v5146_v29  ;;  %v5161_v29 = vld [vmem:[%s5970_s20 + $0xe8] sm:$0xff]  }
  0x64   : > { %2797 = vbcast.lane.b32.xlu1 %v2767_v21, 312  ;;  %2793 = vbcast.lane.b32.xlu0 %v2767_v21, 304 }
  0x68   : > { %2805 = vbcast.lane.b32.xlu1 %v2767_v21, 328  ;;  %2801 = vbcast.lane.b32.xlu0 %v2767_v21, 320 }
  0x69   : > { %4793 = vmatmul.mubr.bf16.gmra.mrb[12].mxu0 %v5125_v30  ;;  %4921 = vmatmul.mubr.bf16.gmra.mrb[12].mxu1 %v5147_v32  ;;  %v5191_v30 = vld [vmem:[%s5970_s20 + $0x2e8] sm:$0xff]   ;;  %v5194_v32 = vld [vmem:[%s5970_s20 + $0x2f0] sm:$0xff]  }
  0x6a   : > { %4796 = vmatprep.mubr.bf16.mxu0 %v5126_v31  ;;  %4924 = vmatprep.mubr.bf16.mxu1 %v5150_v33  ;;  %v5164_v31 = vld [vmem:[%s5970_s20 + $0xf0] sm:$0xff]  }
  0x6c   : > { %2813 = vbcast.lane.b32.xlu1 %v2767_v21, 344  ;;  %2809 = vbcast.lane.b32.xlu0 %v2767_v21, 336 }
  0x70   : > { %2821 = vbcast.lane.b32.xlu1 %v2767_v21, 360  ;;  %2817 = vbcast.lane.b32.xlu0 %v2767_v21, 352 }
  0x71   : > { %4797 = vmatmul.mubr.bf16.gmra.mrb[16].mxu0 %v5127_v34  ;;  %4925 = vmatmul.mubr.bf16.gmra.mrb[16].mxu1 %v5151_v36 }
  0x72   : > { %4800 = vmatprep.mubr.bf16.mxu0 %v5128_v35  ;;  %4928 = vmatprep.mubr.bf16.mxu1 %v5154_v37  ;;  %v5165_v37 = vld [vmem:[%s5970_s20 + $0xf8] sm:$0xff]  }
  0x74   : > { %2829 = vbcast.lane.b32.xlu1 %v2767_v21, 376  ;;  %2825 = vbcast.lane.b32.xlu0 %v2767_v21, 368 }
  0x78   : > { %2840 = vbcast.lane.b32.xlu1 %v2834_v39, 264  ;;  %2836 = vbcast.lane.b32.xlu0 %v2834_v39, 256 }
  0x79   : > { %4801 = vmatmul.mubr.bf16.gmra.mrb[20].mxu0 %v5129_v40  ;;  %4929 = vmatmul.mubr.bf16.gmra.mrb[20].mxu1 %v5155_v42  ;;  %v5198_v40 = vld [vmem:[%s5970_s20 + $0x300] sm:$0xff]  }
  0x7a   : > { %4804 = vmatprep.mubr.bf16.mxu0 %v5130_v41  ;;  %4932 = vmatprep.mubr.bf16.mxu1 %v5158_v43 }
  0x7c   : > { %2848 = vbcast.lane.b32.xlu1 %v2834_v39, 280  ;;  %2844 = vbcast.lane.b32.xlu0 %v2834_v39, 272 }
  0x80   : > { %2856 = vbcast.lane.b32.xlu1 %v2834_v39, 296  ;;  %2852 = vbcast.lane.b32.xlu0 %v2834_v39, 288 }
  0x81   : > { %4805 = vmatmul.mubr.bf16.gmra.mrb[24].mxu0 %v5131_v44  ;;  %4933 = vmatmul.mubr.bf16.gmra.mrb[24].mxu1 %v5159_v46  ;;  %v5199_v46 = vld [vmem:[%s5970_s20 + $0x308] sm:$0xff]  }
  0x82   : > { %4808 = vmatprep.mubr.bf16.mxu0 %v5132_v45  ;;  %4936 = vmatprep.mubr.bf16.mxu1 %v5162_v47  ;;  %v5169_v45 = vld [vmem:[%s5970_s20 + $0x108] sm:$0xff]   ;;  %v5172_v47 = vld [vmem:[%s5970_s20 + $0x110] sm:$0xff]  }
  0x84   : > { %2864 = vbcast.lane.b32.xlu1 %v2834_v39, 312  ;;  %2860 = vbcast.lane.b32.xlu0 %v2834_v39, 304 }
  0x88   : > { %2872 = vbcast.lane.b32.xlu1 %v2834_v39, 328  ;;  %2868 = vbcast.lane.b32.xlu0 %v2834_v39, 320 }
  0x89   : > { %4809 = vmatmul.mubr.bf16.gmra.mrb[28].mxu0 %v5133_v48  ;;  %4937 = vmatmul.mubr.bf16.gmra.mrb[28].mxu1 %v5163_v50  ;;  %v5202_v48 = vld [vmem:[%s5970_s20 + $0x310] sm:$0xff]  }
  0x8a   : > { %4812 = vmatprep.mubr.bf16.mxu0 %v5136_v49  ;;  %4940 = vmatprep.mubr.bf16.mxu1 %v5166_v51  ;;  %v6158_v51 = vrot.slane %v6017_v20, %v2967_v15 }
  0x8c   : > { %2880 = vbcast.lane.b32.xlu1 %v2834_v39, 344  ;;  %2876 = vbcast.lane.b32.xlu0 %v2834_v39, 336 }
  0x90   : > { %2888 = vbcast.lane.b32.xlu1 %v2834_v39, 360  ;;  %2884 = vbcast.lane.b32.xlu0 %v2834_v39, 352 }
  0x91   : > { %4813 = vmatmul.mubr.bf16.gmra.mrb[32].mxu0 %v5137_v52  ;;  %4941 = vmatmul.mubr.bf16.gmra.mrb[32].mxu1 %v5167_v54  ;;  %v5173_v54 = vld [vmem:[%s5970_s20 + $0x118] sm:$0xff]  }
  0x92   : > { %4816 = vmatprep.mubr.bf16.mxu0 %v5140_v53  ;;  %4944 = vmatprep.mubr.bf16.mxu1 %v5170_v55  ;;  %v5203_v55 = vld [vmem:[%s5970_s20 + $0x318] sm:$0xff]  }
  0x94   : > { %2896 = vbcast.lane.b32.xlu1 %v2834_v39, 376  ;;  %2892 = vbcast.lane.b32.xlu0 %v2834_v39, 368  ;;  %v5168_v39 = vld [vmem:[%s5970_s20 + $0x100] sm:$0xff]  }
  0x98   : > { %2907 = vbcast.lane.b32.xlu1 %v2901_v56, 264  ;;  %2903 = vbcast.lane.b32.xlu0 %v2901_v56, 256 }
  0x99   : > { %4817 = vmatmul.mubr.bf16.gmra.mrb[36].mxu0 %v5141_v57  ;;  %4945 = vmatmul.mubr.bf16.gmra.mrb[36].mxu1 %v5171_v59  ;;  %v5206_v57 = vld [vmem:[%s5970_s20 + $0x320] sm:$0xff]  }
  0x9a   : > { %4820 = vmatprep.mubr.bf16.mxu0 %v5144_v58  ;;  %4948 = vmatprep.mubr.bf16.mxu1 %v5174_v60 }
  0x9c   : > { %2915 = vbcast.lane.b32.xlu1 %v2901_v56, 280  ;;  %2911 = vbcast.lane.b32.xlu0 %v2901_v56, 272 }
  0xa0   : > { %2923 = vbcast.lane.b32.xlu1 %v2901_v56, 296  ;;  %2919 = vbcast.lane.b32.xlu0 %v2901_v56, 288 }
  0xa1   : > { %4821 = vmatmul.mubr.bf16.gmra.mrb[40].mxu0 %v5145_v61  ;;  %4949 = vmatmul.mubr.bf16.gmra.mrb[40].mxu1 %v5175_v63  ;;  %v5177_v61 = vld [vmem:[%s5970_s20 + $0x128] sm:$0xff]   ;;  %v5180_v63 = vld [vmem:[%s5970_s20 + $0x130] sm:$0xff]  }
  0xa2   : > { %4824 = vmatprep.mubr.bf16.mxu0 %v5148_v62  ;;  %4952 = vmatprep.mubr.bf16.mxu1 %v5178_v0  ;;  %v5207_v62 = vld [vmem:[%s5970_s20 + $0x328] sm:$0xff]   ;;  %v5210_v0 = vld [vmem:[%s5970_s20 + $0x330] sm:$0xff]  }
  0xa4   : > { %2931 = vbcast.lane.b32.xlu1 %v2901_v56, 312  ;;  %2927 = vbcast.lane.b32.xlu0 %v2901_v56, 304 }
  0xa8   : > { %2939 = vbcast.lane.b32.xlu1 %v2901_v56, 328  ;;  %2935 = vbcast.lane.b32.xlu0 %v2901_v56, 320 }
  0xa9   : > { %4825 = vmatmul.mubr.bf16.gmra.mrb[44].mxu0 %v5149_v1  ;;  %4953 = vmatmul.mubr.bf16.gmra.mrb[44].mxu1 %v5179_v3 }
  0xaa   : > { %v6069_v7 = vpop.permute.xlu1 %2710  ;;  %v6071_v8 = vpop.permute.xlu0 %2702  ;;  %4828 = vmatprep.mubr.bf16.mxu0 %v5152_v2  ;;  %4956 = vmatprep.mubr.bf16.mxu1 %v5182_v6 }
  0xac   : > { %2947 = vbcast.lane.b32.xlu1 %v2901_v56, 344  ;;  %2943 = vbcast.lane.b32.xlu0 %v2901_v56, 336 }
  0xae   : > { %v6076_v12 = vpop.permute.xlu1 %2714  ;;  %v6078_v13 = vpop.permute.xlu0 %2706 }
  0xb0   : > { %2955 = vbcast.lane.b32.xlu1 %v2901_v56, 360  ;;  %2951 = vbcast.lane.b32.xlu0 %v2901_v56, 352 }
  0xb1   : > { %4829 = vmatmul.mubr.bf16.gmra.mrb[48].mxu0 %v5153_v9  ;;  %4957 = vmatmul.mubr.bf16.gmra.mrb[48].mxu1 %v5183_v11  ;;  %v5181_v9 = vld [vmem:[%s5970_s20 + $0x138] sm:$0xff]   ;;  %v5184_v11 = vld [vmem:[%s5970_s20 + $0x140] sm:$0xff]  }
  0xb2   : > { %v6082_v16 = vpop.permute.xlu1 %2722  ;;  %v6084_v17 = vpop.permute.xlu0 %2718  ;;  %4832 = vmatprep.mubr.bf16.mxu0 %v5156_v10  ;;  %4960 = vmatprep.mubr.bf16.mxu1 %v5186_v14  ;;  %v5211_v10 = vld [vmem:[%s5970_s20 + $0x338] sm:$0xff]   ;;  %v5214_v14 = vld [vmem:[%s5970_s20 + $0x340] sm:$0xff]  }
  0xb4   : > { %2963 = vbcast.lane.b32.xlu1 %v2901_v56, 376  ;;  %2959 = vbcast.lane.b32.xlu0 %v2901_v56, 368  ;;  %v5176_v56 = vld [vmem:[%s5970_s20 + $0x120] sm:$0xff]  }
  0xb6   : > { %v6091_v19 = vpop.permute.xlu1 %2730  ;;  %v6093_v21 = vpop.permute.xlu0 %2726 }
  0xb8   : > { %2974 = vbcast.lane.b32.xlu1 %v6089_v18, 264  ;;  %2970 = vbcast.lane.b32.xlu0 %v6089_v18, 256 }
  0xb9   : > { %4833 = vmatmul.mubr.bf16.gmra.mrb[52].mxu0 %v5157_v22  ;;  %4961 = vmatmul.mubr.bf16.gmra.mrb[52].mxu1 %v5187_v23 }
  0xba   : > { %v6101_v26 = vpop.permute.xlu1 %2738  ;;  %v6103_v5 = vpop.permute.xlu0 %2734  ;;  %4836 = vmatprep.mubr.bf16.mxu0 %v5160_v24  ;;  %4964 = vmatprep.mubr.bf16.mxu1 %v5190_v25  ;;  %v5185_v24 = vld [vmem:[%s5970_s20 + $0x148] sm:$0xff]  }
  0xbb   : > { %v5215_v25 = vld [vmem:[%s5970_s20 + $0x348] sm:$0xff]  }
  0xbc   : > { %2982 = vbcast.lane.b32.xlu1 %v6089_v18, 280  ;;  %2978 = vbcast.lane.b32.xlu0 %v6089_v18, 272 }
  0xbe   : > { %v6107_v27 = vpop.permute.xlu1 %2746  ;;  %v6109_v28 = vpop.permute.xlu0 %2742 }
  0xc0   : > { %2990 = vbcast.lane.b32.xlu1 %v6089_v18, 296  ;;  %2986 = vbcast.lane.b32.xlu0 %v6089_v18, 288 }
  0xc1   : > { %4837 = vmatmul.mubr.bf16.gmra.mrb[56].mxu0 %v5161_v29  ;;  %4965 = vmatmul.mubr.bf16.gmra.mrb[56].mxu1 %v5191_v30  ;;  %v5188_v29 = vld [vmem:[%s5970_s20 + $0x150] sm:$0xff]  }
  0xc2   : > { %v6117_v33 = vpop.permute.xlu1 %2754  ;;  %v6119_v34 = vpop.permute.xlu0 %2750  ;;  %4840 = vmatprep.mubr.bf16.mxu0 %v5164_v31  ;;  %4968 = vmatprep.mubr.bf16.mxu1 %v5194_v32  ;;  %v5218_v30 = vld [vmem:[%s5970_s20 + $0x350] sm:$0xff]   ;;  %v3101_v31 = vsub.s32 3, %v5983_v4 }
  0xc4   : > { %2998 = vbcast.lane.b32.xlu1 %v6089_v18, 312  ;;  %2994 = vbcast.lane.b32.xlu0 %v6089_v18, 304 }
  0xc6   : > { %v6123_v35 = vpop.permute.xlu1 %2762  ;;  %v6125_v36 = vpop.permute.xlu0 %2758 }
  0xc8   : > { %3006 = vbcast.lane.b32.xlu1 %v6089_v18, 328  ;;  %3002 = vbcast.lane.b32.xlu0 %v6089_v18, 320 }
  0xc9   : > { %4841 = vmatmul.mubr.bf16.gmra.mrb[60].mxu0 %v5165_v37  ;;  %4969 = vmatmul.mubr.bf16.gmra.mrb[60].mxu1 %v5195_v38  ;;  %v6226_v38 = vld [vmem:[%s5975_s29] sm:$0xff] }
  0xca   : > { %v6133_v41 = vpop.permute.xlu1 %2773  ;;  %v6135_v42 = vpop.permute.xlu0 %2769  ;;  %4844 = vmatprep.mubr.bf16.mxu0 %v5168_v39  ;;  %4972 = vmatprep.mubr.bf16.mxu1 %v5198_v40  ;;  %v6231_v39 = vrot.slane %v6226_v38, %v3101_v31 }
  0xcc   : > { %3014 = vbcast.lane.b32.xlu1 %v6089_v18, 344  ;;  %3010 = vbcast.lane.b32.xlu0 %v6089_v18, 336 }
  0xce   : > { %v6139_v43 = vpop.permute.xlu1 %2781  ;;  %v6141_v44 = vpop.permute.xlu0 %2777 }
  0xd0   : > { %3022 = vbcast.lane.b32.xlu1 %v6089_v18, 360  ;;  %3018 = vbcast.lane.b32.xlu0 %v6089_v18, 352 }
  0xd1   : > { %4845 = vmatmul.mubr.bf16.gmra.mrb[64].mxu0 %v5169_v45  ;;  %4973 = vmatmul.mubr.bf16.gmra.mrb[64].mxu1 %v5199_v46  ;;  %v5189_v46 = vld [vmem:[%s5970_s20 + $0x158] sm:$0xff]  }
  0xd2   : > { %v6149_v49 = vpop.permute.xlu1 %2789  ;;  %v6151_v50 = vpop.permute.xlu0 %2785  ;;  %4848 = vmatprep.mubr.bf16.mxu0 %v5172_v47  ;;  %4976 = vmatprep.mubr.bf16.mxu1 %v5202_v48  ;;  %v5219_v47 = vld [vmem:[%s5970_s20 + $0x358] sm:$0xff]   ;;  %v5192_v48 = vld [vmem:[%s5970_s20 + $0x160] sm:$0xff]  }
  0xd4   : > { %3030 = vbcast.lane.b32.xlu1 %v6089_v18, 376  ;;  %3026 = vbcast.lane.b32.xlu0 %v6089_v18, 368 }
  0xd6   : > { %v6160_v52 = vpop.permute.xlu1 %2797  ;;  %v6162_v53 = vpop.permute.xlu0 %2793 }
  0xd8   : > { %3041 = vbcast.lane.b32.xlu1 %v6158_v51, 264  ;;  %3037 = vbcast.lane.b32.xlu0 %v6158_v51, 256 }
  0xd9   : > { %4849 = vmatmul.mubr.bf16.gmra.mrb[68].mxu0 %v5173_v54  ;;  %4977 = vmatmul.mubr.bf16.gmra.mrb[68].mxu1 %v5203_v55  ;;  %v5222_v54 = vld [vmem:[%s5970_s20 + $0x360] sm:$0xff]  }
  0xda   : > { %v6170_v58 = vpop.permute.xlu1 %2805  ;;  %v6172_v20 = vpop.permute.xlu0 %2801  ;;  %4852 = vmatprep.mubr.bf16.mxu0 %v5176_v56  ;;  %4980 = vmatprep.mubr.bf16.mxu1 %v5206_v57 }
  0xdc   : > { %3049 = vbcast.lane.b32.xlu1 %v6158_v51, 280  ;;  %3045 = vbcast.lane.b32.xlu0 %v6158_v51, 272 }
  0xde   : > { %v6176_v59 = vpop.permute.xlu1 %2813  ;;  %v6178_v60 = vpop.permute.xlu0 %2809 }
  0xe0   : > { %3057 = vbcast.lane.b32.xlu1 %v6158_v51, 296  ;;  %3053 = vbcast.lane.b32.xlu0 %v6158_v51, 288 }
  0xe1   : > { %4853 = vmatmul.mubr.bf16.gmra.mrb[72].mxu0 %v5177_v61  ;;  %4981 = vmatmul.mubr.bf16.gmra.mrb[72].mxu1 %v5207_v62  ;;  %v5193_v61 = vld [vmem:[%s5970_s20 + $0x168] sm:$0xff]  }
  0xe2   : > { %v6186_v1 = vpop.permute.xlu1 %2821  ;;  %v6188_v2 = vpop.permute.xlu0 %2817  ;;  %4856 = vmatprep.mubr.bf16.mxu0 %v5180_v63  ;;  %4984 = vmatprep.mubr.bf16.mxu1 %v5210_v0  ;;  %v5223_v62 = vld [vmem:[%s5970_s20 + $0x368] sm:$0xff]   ;;  %v5196_v63 = vld [vmem:[%s5970_s20 + $0x170] sm:$0xff]  }
  0xe3   : > { %v5226_v0 = vld [vmem:[%s5970_s20 + $0x370] sm:$0xff]  }
  0xe4   : > { %3065 = vbcast.lane.b32.xlu1 %v6158_v51, 312  ;;  %3061 = vbcast.lane.b32.xlu0 %v6158_v51, 304 }
  0xe6   : > { %v6192_v3 = vpop.permute.xlu1 %2829  ;;  %v6194_v6 = vpop.permute.xlu0 %2825 }
  0xe8   : > { %3073 = vbcast.lane.b32.xlu1 %v6158_v51, 328  ;;  %3069 = vbcast.lane.b32.xlu0 %v6158_v51, 320 }
  0xe9   : > { %4857 = vmatmul.mubr.bf16.gmra.mrb[76].mxu0 %v5181_v9  ;;  %4985 = vmatmul.mubr.bf16.gmra.mrb[76].mxu1 %v5211_v10 }
  0xea   : > { %v6202_v15 = vpop.permute.xlu1 %2840  ;;  %v6204_v18 = vpop.permute.xlu0 %2836  ;;  %4860 = vmatprep.mubr.bf16.mxu0 %v5184_v11  ;;  %4988 = vmatprep.mubr.bf16.mxu1 %v5214_v14 }
  0xec   : > { %3081 = vbcast.lane.b32.xlu1 %v6158_v51, 344  ;;  %3077 = vbcast.lane.b32.xlu0 %v6158_v51, 336 }
  0xee   : > { %v6208_v22 = vpop.permute.xlu1 %2848  ;;  %v6210_v23 = vpop.permute.xlu0 %2844 }
  0xef   : > { %7756 = vst [vmem:[#allocation9_spill] sm:$0xff] %v6208_v22 }
  0xf0   : > { %3089 = vbcast.lane.b32.xlu1 %v6158_v51, 360  ;;  %3085 = vbcast.lane.b32.xlu0 %v6158_v51, 352 }
  0xf1   : > { %4861 = vmatmul.mubr.bf16.gmra.mrb[80].mxu0 %v5185_v24  ;;  %4989 = vmatmul.mubr.bf16.gmra.mrb[80].mxu1 %v5215_v25  ;;  %v5197_v24 = vld [vmem:[%s5970_s20 + $0x178] sm:$0xff]  }
  0xf2   : > { %v6219_v32 = vpop.permute.xlu1 %2856  ;;  %v6221_v37 = vpop.permute.xlu0 %2852  ;;  %4864 = vmatprep.mubr.bf16.mxu0 %v5188_v29  ;;  %4992 = vmatprep.mubr.bf16.mxu1 %v5218_v30  ;;  %v5227_v25 = vld [vmem:[%s5970_s20 + $0x378] sm:$0xff]   ;;  %v5200_v29 = vld [vmem:[%s5970_s20 + $0x180] sm:$0xff]  }
  0xf3   : > { %7757 = vst [vmem:[#allocation10_spill] sm:$0xff] %v6219_v32  ;;  %7758 = vst [vmem:[#allocation11_spill] sm:$0xff] %v6221_v37  ;;  %v5230_v30 = vld [vmem:[%s5970_s20 + $0x380] sm:$0xff]  }
  0xf4   : > { %3097 = vbcast.lane.b32.xlu1 %v6158_v51, 376  ;;  %3093 = vbcast.lane.b32.xlu0 %v6158_v51, 368  ;;  %v5242_v37 = vld [vmem:[%s5970_s20 + $0x3e0] sm:$0xff]  }
  0xf6   : > { %v6233_v40 = vpop.permute.xlu1 %2864  ;;  %v6235_v45 = vpop.permute.xlu0 %2860 }
  0xf7   : > { %7759 = vst [vmem:[#allocation12_spill] sm:$0xff] %v6233_v40  ;;  %7760 = vst [vmem:[#allocation13_spill] sm:$0xff] %v6235_v45 }
  0xf8   : > { %3108 = vbcast.lane.b32.xlu1 %v6231_v39, 264  ;;  %3104 = vbcast.lane.b32.xlu0 %v6231_v39, 256 }
  0xf9   : > { %4865 = vmatmul.mubr.bf16.gmra.mrb[84].mxu0 %v5189_v46  ;;  %4993 = vmatmul.mubr.bf16.gmra.mrb[84].mxu1 %v5219_v47 }
  0xfa   : > { %v6243_v51 = vpop.permute.xlu1 %2872  ;;  %v6245_v55 = vpop.permute.xlu0 %2868  ;;  %4868 = vmatprep.mubr.bf16.mxu0 %v5192_v48  ;;  %4996 = vmatprep.mubr.bf16.mxu1 %v5222_v54 }
  0xfb   : > { %7761 = vst [vmem:[#allocation14_spill] sm:$0xff] %v6243_v51  ;;  %7762 = vst [vmem:[#allocation15_spill] sm:$0xff] %v6245_v55 }
  0xfc   : > { %3116 = vbcast.lane.b32.xlu1 %v6231_v39, 280  ;;  %3112 = vbcast.lane.b32.xlu0 %v6231_v39, 272 }
  0xfe   : > { %v6249_v56 = vpop.permute.xlu1 %2880  ;;  %v6251_v57 = vpop.permute.xlu0 %2876 }
  0xff   : > { %7763 = vst [vmem:[#allocation16_spill] sm:$0xff] %v6249_v56  ;;  %7764 = vst [vmem:[#allocation17_spill] sm:$0xff] %v6251_v57 }
 0x100   : > { %3124 = vbcast.lane.b32.xlu1 %v6231_v39, 296  ;;  %3120 = vbcast.lane.b32.xlu0 %v6231_v39, 288 }
 0x101   : > { %4869 = vmatmul.mubr.bf16.gmra.mrb[88].mxu0 %v5193_v61  ;;  %4997 = vmatmul.mubr.bf16.gmra.mrb[88].mxu1 %v5223_v62  ;;  %v5201_v61 = vld [vmem:[%s5970_s20 + $0x188] sm:$0xff]  }
 0x102   : > { %v6259_v9 = vpop.permute.xlu1 %2888  ;;  %v6261_v10 = vpop.permute.xlu0 %2884  ;;  %4872 = vmatprep.mubr.bf16.mxu0 %v5196_v63  ;;  %5000 = vmatprep.mubr.bf16.mxu1 %v5226_v0  ;;  %v5231_v62 = vld [vmem:[%s5970_s20 + $0x388] sm:$0xff]   ;;  %v5204_v63 = vld [vmem:[%s5970_s20 + $0x190] sm:$0xff]  }
 0x103   : > { %7765 = vst [vmem:[#allocation18_spill] sm:$0xff] %v6259_v9  ;;  %7766 = vst [vmem:[#allocation19_spill] sm:$0xff] %v6261_v10  ;;  %v5232_v0 = vld [vmem:[%s5970_s20 + $0x390] sm:$0xff]  }
 0x104   : > { %3132 = vbcast.lane.b32.xlu1 %v6231_v39, 312  ;;  %3128 = vbcast.lane.b32.xlu0 %v6231_v39, 304 }
 0x106   : > { %v6265_v11 = vpop.permute.xlu1 %2896  ;;  %v6267_v14 = vpop.permute.xlu0 %2892 }
 0x107   : > { %7767 = vst [vmem:[#allocation20_spill] sm:$0xff] %v6265_v11  ;;  %7768 = vst [vmem:[#allocation21_spill] sm:$0xff] %v6267_v14 }
 0x108   : > { %3140 = vbcast.lane.b32.xlu1 %v6231_v39, 328  ;;  %3136 = vbcast.lane.b32.xlu0 %v6231_v39, 320 }
 0x109   : > { %4873 = vmatmul.mubr.bf16.gmra.mrb[92].mxu0 %v5197_v24  ;;  %5001 = vmatmul.mubr.bf16.gmra.mrb[92].mxu1 %v5227_v25 }
 0x10a   : > { %v6275_v46 = vpop.permute.xlu1 %2907  ;;  %v6277_v47 = vpop.permute.xlu0 %2903  ;;  %4876 = vmatprep.mubr.bf16.mxu0 %v5200_v29  ;;  %5004 = vmatprep.mubr.bf16.mxu1 %v5230_v30  ;;  %v6298_v29 = vld [vmem:[%s5975_s29 + $0x8] sm:$0xff] }
 0x10b   : > { %7769 = vst [vmem:[#allocation22_spill] sm:$0xff] %v6275_v46  ;;  %7770 = vst [vmem:[#allocation23_spill] sm:$0xff] %v6277_v47  ;;  %v6303_v30 = vrot.slane %v6298_v29, %v3101_v31  ;;  %v5212_v46 = vld [vmem:[%s5970_s20 + $0x1b0] sm:$0xff]  }
 0x10c   : > { %3148 = vbcast.lane.b32.xlu1 %v6231_v39, 344  ;;  %3144 = vbcast.lane.b32.xlu0 %v6231_v39, 336  ;;  %v5236_v47 = vld [vmem:[%s5970_s20 + $0x3b0] sm:$0xff]  }
 0x10e   : > { %v6281_v48 = vpop.permute.xlu1 %2915  ;;  %v6283_v54 = vpop.permute.xlu0 %2911 }
 0x10f   : > { %7771 = vst [vmem:[#allocation24_spill] sm:$0xff] %v6281_v48  ;;  %7772 = vst [vmem:[#allocation25_spill] sm:$0xff] %v6283_v54  ;;  %v5235_v54 = vld [vmem:[%s5970_s20 + $0x3a8] sm:$0xff]  }
 0x110   : > { %3156 = vbcast.lane.b32.xlu1 %v6231_v39, 360  ;;  %3152 = vbcast.lane.b32.xlu0 %v6231_v39, 352 }
 0x111   : > { %4877 = vmatmul.mubr.bf16.gmra.mrb[96].mxu0 %v5201_v61  ;;  %5005 = vmatmul.mubr.bf16.gmra.mrb[96].mxu1 %v5231_v62  ;;  %v5233_v61 = vld [vmem:[%s5970_s20 + $0x398] sm:$0xff]   ;;  %v5208_v62 = vld [vmem:[%s5970_s20 + $0x1a0] sm:$0xff]  }
 0x112   : > { %v6291_v24 = vpop.permute.xlu1 %2923  ;;  %v6293_v25 = vpop.permute.xlu0 %2919  ;;  %4880 = vmatprep.mubr.bf16.mxu0 %v5204_v63  ;;  %5008 = vmatprep.mubr.bf16.mxu1 %v5232_v0  ;;  %v5234_v63 = vld [vmem:[%s5970_s20 + $0x3a0] sm:$0xff]  }
 0x113   : > { %7773 = vst [vmem:[#allocation26_spill] sm:$0xff] %v6291_v24  ;;  %7774 = vst [vmem:[#allocation27_spill] sm:$0xff] %v6293_v25  ;;  %v5205_v25 = vld [vmem:[%s5970_s20 + $0x198] sm:$0xff]  }
 0x114   : > { %3164 = vbcast.lane.b32.xlu1 %v6231_v39, 376  ;;  %3160 = vbcast.lane.b32.xlu0 %v6231_v39, 368 }
 0x116   : > { %v6305_v48 = vpop.permute.xlu1 %2931  ;;  %v6307_v24 = vpop.permute.xlu0 %2927 }
 0x117   : > { %7775 = vst [vmem:[#allocation28_spill] sm:$0xff] %v6305_v48  ;;  %7776 = vst [vmem:[#allocation29_spill] sm:$0xff] %v6307_v24  ;;  %v5209_v24 = vld [vmem:[%s5970_s20 + $0x1a8] sm:$0xff]  }
 0x118   : > { %3175 = vbcast.lane.b32.xlu1 %v6303_v30, 264  ;;  %3171 = vbcast.lane.b32.xlu0 %v6303_v30, 256 }
 0x119   : > { %4881 = vmatmul.mubr.bf16.gmra.mrb[100].mxu0 %v5205_v25  ;;  %5009 = vmatmul.mubr.bf16.gmra.mrb[100].mxu1 %v5233_v61 }
 0x11a   : > { %v6315_v39 = vpop.permute.xlu1 %2939  ;;  %v6317_v31 = vpop.permute.xlu0 %2935  ;;  %4884 = vmatprep.mubr.bf16.mxu0 %v5208_v62  ;;  %5012 = vmatprep.mubr.bf16.mxu1 %v5234_v63  ;;  %v6340_v62 = vld [vmem:[%s7749_s4] ss:$0 sm:$0xff] }
 0x11b   : > { %7777 = vst [vmem:[#allocation30_spill] sm:$0xff] %v6315_v39  ;;  %7778 = vst [vmem:[#allocation31_spill] sm:$0xff] %v6317_v31  ;;  %v5238_v39 = vld [vmem:[%s5970_s20 + $0x3c0] sm:$0xff]  }
 0x11c   : > { %3183 = vbcast.lane.b32.xlu1 %v6303_v30, 280  ;;  %3179 = vbcast.lane.b32.xlu0 %v6303_v30, 272 }
 0x11e   : > { %v6321_v0 = vpop.permute.xlu1 %2947  ;;  %v6323_v48 = vpop.permute.xlu0 %2943 }
 0x11f   : > { %7779 = vst [vmem:[#allocation32_spill] sm:$0xff] %v6321_v0  ;;  %7780 = vst [vmem:[#allocation33_spill] sm:$0xff] %v6323_v48  ;;  %v5216_v48 = vld [vmem:[%s5970_s20 + $0x1c0] sm:$0xff]  }
 0x120   : > { %3191 = vbcast.lane.b32.xlu1 %v6303_v30, 296  ;;  %3187 = vbcast.lane.b32.xlu0 %v6303_v30, 288 }
 0x121   : > { %4885 = vmatmul.mubr.bf16.gmra.mrb[104].mxu0 %v5209_v24  ;;  %5013 = vmatmul.mubr.bf16.gmra.mrb[104].mxu1 %v5235_v54  ;;  %v5213_v24 = vld [vmem:[%s5970_s20 + $0x1b8] sm:$0xff]  }
 0x122   : > { %v6331_v25 = vpop.permute.xlu1 %2955  ;;  %v6333_v61 = vpop.permute.xlu0 %2951  ;;  %4888 = vmatprep.mubr.bf16.mxu0 %v5212_v46  ;;  %5016 = vmatprep.mubr.bf16.mxu1 %v5236_v47  ;;  %v5237_v54 = vld [vmem:[%s5970_s20 + $0x3b8] sm:$0xff]  }
 0x123   : > { %7781 = vst [vmem:[#allocation34_spill] sm:$0xff] %v6331_v25  ;;  %7782 = vst [vmem:[#allocation35_spill] sm:$0xff] %v6333_v61 }
 0x124   : > { %3199 = vbcast.lane.b32.xlu1 %v6303_v30, 312  ;;  %3195 = vbcast.lane.b32.xlu0 %v6303_v30, 304  ;;  %v4782_v63 = vpop.f32.mrb[0].mxu0  ;;  %v6342_v0 = vpop.f32.mrb[0].mxu1 }
 0x125   : > { %v1424_v46 = vadd.f32 %v4782_v63, %v6340_v62  ;;  %v1415_v47 = vpop.f32.mrb[1].mxu0  ;;  %v6353_v31 = vpop.f32.mrb[1].mxu1 }
 0x126   : > { %v6344_v25 = vpop.permute.xlu1 %2963  ;;  %v6346_v61 = vpop.permute.xlu0 %2959  ;;  %v1416_v11 = vadd.f32 %v6340_v62, %v1415_v47 }
 0x127   : > { %7783 = vst [vmem:[#allocation36_spill] sm:$0xff] %v6344_v25  ;;  %7784 = vst [vmem:[#allocation37_spill] sm:$0xff] %v6346_v61  ;;  %v4783_v14 = vpop.f32.mrb[2].mxu0  ;;  %v6358_v9 = vpop.f32.mrb[2].mxu1 }
 0x128   : > { %3207 = vbcast.lane.b32.xlu1 %v6303_v30, 328  ;;  %3203 = vbcast.lane.b32.xlu0 %v6303_v30, 320  ;;  %v1418_v25 = vpop.f32.mrb[3].mxu0  ;;  %v6360_v61 = vpop.f32.mrb[3].mxu1  ;;  %5246 = vtanh.f32 %v1416_v11  ;;  %v1427_v63 = vadd.f32 %v4783_v14, %v6340_v62 }
 0x129   : > { %v1419_v10 = vadd.f32 %v6340_v62, %v1418_v25  ;;  %4889 = vmatmul.mubr.bf16.gmra.mrb[108].mxu0 %v5213_v24  ;;  %5017 = vmatmul.mubr.bf16.gmra.mrb[108].mxu1 %v5237_v54  ;;  %5248 = vtanh.f32 %v1424_v46  ;;  %v5217_v24 = vld [vmem:[%s5970_s20 + $0x1c8] sm:$0xff]  }
 0x12a   : > { %v6364_v56 = vpop.permute.xlu1 %2974  ;;  %v6366_v47 = vpop.permute.xlu0 %2970  ;;  %4892 = vmatprep.mubr.bf16.mxu0 %v5216_v48  ;;  %5020 = vmatprep.mubr.bf16.mxu1 %v5238_v39  ;;  %v5239_v54 = vld [vmem:[%s5970_s20 + $0x3c8] sm:$0xff]   ;;  %v5220_v48 = vld [vmem:[%s5970_s20 + $0x1d0] sm:$0xff]  }
 0x12b   : > { %7785 = vst [vmem:[#allocation38_spill] sm:$0xff] %v6364_v56  ;;  %7786 = vst [vmem:[#allocation39_spill] sm:$0xff] %v6366_v47  ;;  %5250 = vtanh.f32 %v1419_v10  ;;  %v5240_v39 = vld [vmem:[%s5970_s20 + $0x3d0] sm:$0xff]  }
 0x12c   : > { %3215 = vbcast.lane.b32.xlu1 %v6303_v30, 344  ;;  %3211 = vbcast.lane.b32.xlu0 %v6303_v30, 336  ;;  %v4786_v11 = vpop.f32.mrb[4].mxu0  ;;  %v6370_v14 = vpop.f32.mrb[4].mxu1  ;;  %5252 = vtanh.f32 %v1427_v63 }
 0x12d   : > { %v1440_v46 = vadd.f32 %v4786_v11, %v6340_v62  ;;  %v1431_v47 = vpop.f32.mrb[5].mxu0  ;;  %v6381_v10 = vpop.f32.mrb[5].mxu1 }
 0x12e   : > { %v6372_v25 = vpop.permute.xlu1 %2982  ;;  %v6374_v56 = vpop.permute.xlu0 %2978  ;;  %7789 = vst [vmem:[#allocation42_spill] sm:$0xff] %v6381_v10  ;;  %v1432_v57 = vadd.f32 %v6340_v62, %v1431_v47 }
 0x12f   : > { %7787 = vst [vmem:[#allocation40_spill] sm:$0xff] %v6372_v25  ;;  %7788 = vst [vmem:[#allocation41_spill] sm:$0xff] %v6374_v56  ;;  %v4787_v63 = vpop.f32.mrb[6].mxu0  ;;  %v6387_v51 = vpop.f32.mrb[6].mxu1 }
 0x130   : > { %3223 = vbcast.lane.b32.xlu1 %v6303_v30, 360  ;;  %3219 = vbcast.lane.b32.xlu0 %v6303_v30, 352  ;;  %7790 = vst [vmem:[#allocation43_spill] sm:$0xff] %v6387_v51  ;;  %v1434_v56 = vpop.f32.mrb[7].mxu0  ;;  %v6389_v55 = vpop.f32.mrb[7].mxu1  ;;  %5254 = vtanh.f32 %v1432_v57  ;;  %v1443_v11 = vadd.f32 %v4787_v63, %v6340_v62 }
 0x131   : > { %7791 = vst [vmem:[#allocation44_spill] sm:$0xff] %v6389_v55  ;;  %v1435_v40 = vadd.f32 %v6340_v62, %v1434_v56  ;;  %4893 = vmatmul.mubr.bf16.gmra.mrb[112].mxu0 %v5217_v24  ;;  %5021 = vmatmul.mubr.bf16.gmra.mrb[112].mxu1 %v5239_v54  ;;  %5256 = vtanh.f32 %v1440_v46  ;;  %v7794_v56 = vsub.s32 4, %v5983_v4  ;;  %v5224_v55 = vld [vmem:[%s5970_s20 + $0x1e0] sm:$0xff]  }
 0x132   : > { %v6393_v45 = vpop.permute.xlu1 %2990  ;;  %v6395_v47 = vpop.permute.xlu0 %2986  ;;  %4896 = vmatprep.mubr.bf16.mxu0 %v5220_v48  ;;  %5024 = vmatprep.mubr.bf16.mxu1 %v5240_v39  ;;  %v5221_v39 = vld [vmem:[%s5970_s20 + $0x1d8] sm:$0xff]  }
 0x133   : > { %7792 = vst [vmem:[#allocation45_spill] sm:$0xff] %v6393_v45  ;;  %7793 = vst [vmem:[#allocation46_spill] sm:$0xff] %v6395_v47  ;;  %v5247_v25 = vpop.eup %5246  ;;  %5258 = vtanh.f32 %v1435_v40  ;;  %v6402_v57 = vrot.slane %v6226_v38, %v7794_v56  ;;  %v5241_v45 = vld [vmem:[%s5970_s20 + $0x3d8] sm:$0xff]  }
 0x134   : > { %3231 = vbcast.lane.b32.xlu1 %v6303_v30, 376  ;;  %3227 = vbcast.lane.b32.xlu0 %v6303_v30, 368  ;;  %v5249_v24 = vpop.eup %5248  ;;  %v4790_v54 = vpop.f32.mrb[8].mxu0  ;;  %5260 = vtanh.f32 %v1443_v11  ;;  %v3769_v30 = vmul.f32 %v5247_v25, %v6071_v8 }
 0x135   : > { %v6404_v63 = vpop.f32.mrb[8].mxu1  ;;  %v5251_v46 = vpop.eup %5250  ;;  %v1456_v32 = vadd.f32 %v4790_v54, %v6340_v62  ;;  %v3771_v8 = vmul.f32 %v5249_v24, %v6069_v7 }
 0x136   : > { %7795 = vst [vmem:[#allocation47_spill] sm:$0xff] %v6404_v63  ;;  %v6406_v48 = vpop.permute.xlu1 %2998  ;;  %v6408_v40 = vpop.permute.xlu0 %2994  ;;  %v3770_v47 = vmul.f32 %v5251_v46, %v6078_v13 }
 0x137   : > { %7796 = vst [vmem:[#allocation48_spill] sm:$0xff] %v6406_v48  ;;  %7797 = vst [vmem:[#allocation49_spill] sm:$0xff] %v6408_v40  ;;  %v1447_v56 = vpop.f32.mrb[9].mxu0  ;;  %v6417_v51 = vpop.f32.mrb[9].mxu1 }
 0x138   : > { %7798 = vst [vmem:[#allocation50_spill] sm:$0xff] %v6417_v51  ;;  %v5253_v63 = vpop.eup %5252  ;;  %v1448_v11 = vadd.f32 %v6340_v62, %v1447_v56  ;;  %3242 = vbcast.lane.b32.xlu1 %v6402_v57, 264  ;;  %3238 = vbcast.lane.b32.xlu0 %v6402_v57, 256  ;;  %v4791_v48 = vpop.f32.mrb[10].mxu0  ;;  %v4025_v13 = vadd.f32 %v3770_v47, %v3769_v30 }
 0x139   : > { %v6422_v40 = vpop.f32.mrb[10].mxu1  ;;  %v1450_v25 = vpop.f32.mrb[11].mxu0  ;;  %v1459_v46 = vadd.f32 %v4791_v48, %v6340_v62  ;;  %4897 = vmatmul.mubr.bf16.gmra.mrb[116].mxu0 %v5221_v39  ;;  %5025 = vmatmul.mubr.bf16.gmra.mrb[116].mxu1 %v5241_v45  ;;  %v3772_v22 = vmul.f32 %v5253_v63, %v6076_v12  ;;  %v5243_v63 = vld [vmem:[%s5970_s20 + $0x3e8] sm:$0xff]  }
 0x13a   : > { %7799 = vst [vmem:[#allocation51_spill] sm:$0xff] %v6422_v40  ;;  %v6425_v54 = vpop.f32.mrb[11].mxu1  ;;  %5262 = vtanh.f32 %v1448_v11  ;;  %v1451_v51 = vadd.f32 %v6340_v62, %v1450_v25  ;;  %v6429_v10 = vpop.permute.xlu1 %3006  ;;  %v4026_v40 = vadd.f32 %v4025_v13, %v3771_v8  ;;  %4900 = vmatprep.mubr.bf16.mxu0 %v5224_v55  ;;  %5028 = vmatprep.mubr.bf16.mxu1 %v5242_v37 }
 0x13b   : > { %7800 = vst [vmem:[#allocation52_spill] sm:$0xff] %v6429_v10  ;;  %v6431_v56 = vpop.permute.xlu0 %3002  ;;  %5264 = vtanh.f32 %v1456_v32  ;;  %v5255_v7 = vpop.eup %5254 }
 0x13c   : > { %7801 = vst [vmem:[#allocation53_spill] sm:$0xff] %v6431_v56  ;;  %5266 = vtanh.f32 %v1451_v51  ;;  %3250 = vbcast.lane.b32.xlu1 %v6402_v57, 280  ;;  %3246 = vbcast.lane.b32.xlu0 %v6402_v57, 272  ;;  %v5257_v47 = vpop.eup %5256  ;;  %v3773_v24 = vmul.f32 %v5255_v7, %v6084_v17  ;;  %v4027_v45 = vadd.f32 %v4026_v40, %v3772_v22  ;;  %v4794_v48 = vpop.f32.mrb[12].mxu0  ;;  %v5225_v51 = vld [vmem:[%s5970_s20 + $0x1e8] sm:$0xff]   ;;  %v5228_v17 = vld [vmem:[%s5970_s20 + $0x1f0] sm:$0xff]  }
 0x13d   : > { %v6437_v12 = vpop.f32.mrb[12].mxu1  ;;  %v5259_v32 = vpop.eup %5258  ;;  %5268 = vtanh.f32 %v1459_v46  ;;  %v1472_v11 = vadd.f32 %v4794_v48, %v6340_v62  ;;  %v5244_v22 = vld [vmem:[%s5970_s20 + $0x3f0] sm:$0xff]  }
 0x13e   : > { %v6439_v55 = vpop.permute.xlu1 %3014  ;;  %v4028_v39 = vadd.f32 %v4027_v45, %v3773_v24  ;;  %v3774_v30 = vmul.f32 %v5259_v32, %v6082_v16  ;;  %v1463_v8 = vpop.f32.mrb[13].mxu0  ;;  %v3775_v24 = vmul.f32 %v5257_v47, %v6093_v21 }
 0x13f   : > { %7802 = vst [vmem:[#allocation54_spill] sm:$0xff] %v6439_v55  ;;  %v6441_v37 = vpop.permute.xlu0 %3010  ;;  %v6448_v13 = vpop.f32.mrb[13].mxu1  ;;  %v1464_v25 = vadd.f32 %v6340_v62, %v1463_v8 }
 0x140   : > { %7803 = vst [vmem:[#allocation55_spill] sm:$0xff] %v6441_v37  ;;  %v5261_v40 = vpop.eup %5260  ;;  %3258 = vbcast.lane.b32.xlu1 %v6402_v57, 296  ;;  %3254 = vbcast.lane.b32.xlu0 %v6402_v57, 288  ;;  %v4795_v46 = vpop.f32.mrb[14].mxu0  ;;  %v4029_v16 = vadd.f32 %v4028_v39, %v3774_v30 }
 0x141   : > { %v6454_v7 = vpop.f32.mrb[14].mxu1  ;;  %v1466_v45 = vpop.f32.mrb[15].mxu0  ;;  %5270 = vtanh.f32 %v1464_v25  ;;  %v1475_v32 = vadd.f32 %v4795_v46, %v6340_v62  ;;  %4901 = vmatmul.mubr.bf16.gmra.mrb[120].mxu0 %v5225_v51  ;;  %5029 = vmatmul.mubr.bf16.gmra.mrb[120].mxu1 %v5243_v63  ;;  %v3776_v10 = vmul.f32 %v5261_v40, %v6091_v19  ;;  %v5245_v40 = vld [vmem:[%s5970_s20 + $0x3f8] sm:$0xff]  }
 0x142   : > { %v6457_v48 = vpop.f32.mrb[15].mxu1  ;;  %v1467_v55 = vadd.f32 %v6340_v62, %v1466_v45  ;;  %v6461_v37 = vpop.permute.xlu1 %3022  ;;  %v4030_v56 = vadd.f32 %v4029_v16, %v3775_v24  ;;  %5272 = vtanh.f32 %v1472_v11  ;;  %4904 = vmatprep.mubr.bf16.mxu0 %v5228_v17  ;;  %5032 = vmatprep.mubr.bf16.mxu1 %v5244_v22  ;;  %v5229_v22 = vld [vmem:[%s5970_s20 + $0x1f8] sm:$0xff]  }
 0x143   : > { %v6463_v8 = vpop.permute.xlu0 %3018 }
 0x144   : > { %v5263_v21 = vpop.eup %5262  ;;  %5274 = vtanh.f32 %v1467_v55  ;;  %3266 = vbcast.lane.b32.xlu1 %v6402_v57, 312  ;;  %3262 = vbcast.lane.b32.xlu0 %v6402_v57, 304  ;;  %v4031_v30 = vadd.f32 %v4030_v56, %v3776_v10  ;;  %v4798_v51 = vpop.f32.mrb[16].mxu0 }
 0x145   : > { %v5265_v47 = vpop.eup %5264  ;;  %v3777_v39 = vmul.f32 %v5263_v21, %v6103_v5  ;;  %v6469_v63 = vpop.f32.mrb[16].mxu1  ;;  %5276 = vtanh.f32 %v1475_v32  ;;  %v1488_v46 = vadd.f32 %v4798_v51, %v6340_v62 }
 0x146   : > { %v5267_v19 = vpop.eup %5266  ;;  %v6471_v11 = vpop.permute.xlu1 %3030  ;;  %v3779_v32 = vmul.f32 %v5265_v47, %v6109_v28 }
 0x147   : > { %7804 = vst [vmem:[#allocation56_spill] sm:$0xff] %v6471_v11  ;;  %v6473_v17 = vpop.permute.xlu0 %3026  ;;  %v4032_v55 = vadd.f32 %v4031_v30, %v3777_v39  ;;  %v3778_v25 = vmul.f32 %v5267_v19, %v6101_v26  ;;  %v1479_v24 = vpop.f32.mrb[17].mxu0 }
 0x148   : > { %7805 = vst [vmem:[#allocation57_spill] sm:$0xff] %v6473_v17  ;;  %v6479_v16 = vpop.f32.mrb[17].mxu1  ;;  %v5269_v5 = vpop.eup %5268  ;;  %v1480_v10 = vadd.f32 %v6340_v62, %v1479_v24  ;;  %3274 = vbcast.lane.b32.xlu1 %v6402_v57, 328  ;;  %3270 = vbcast.lane.b32.xlu0 %v6402_v57, 320 }
 0x149   : > { %v4799_v56 = vpop.f32.mrb[18].mxu0  ;;  %v6484_v45 = vpop.f32.mrb[18].mxu1  ;;  %v4033_v21 = vadd.f32 %v4032_v55, %v3778_v25  ;;  %4905 = vmatmul.mubr.bf16.gmra.mrb[124].mxu0 %v5229_v22  ;;  %5033 = vmatmul.mubr.bf16.gmra.mrb[124].mxu1 %v5245_v40  ;;  %v3780_v11 = vmul.f32 %v5269_v5, %v6107_v27 }
 0x14a   : > { %v1482_v39 = vpop.f32.mrb[19].mxu0  ;;  %v6487_v26 = vpop.f32.mrb[19].mxu1  ;;  %5278 = vtanh.f32 %v1480_v10  ;;  %v1491_v30 = vadd.f32 %v4799_v56, %v6340_v62 }
 0x14b   : > { %v1483_v51 = vadd.f32 %v6340_v62, %v1482_v39  ;;  %v6491_v19 = vpop.permute.xlu1 %3041  ;;  %v6493_v24 = vpop.permute.xlu0 %3037  ;;  %v4034_v17 = vadd.f32 %v4033_v21, %v3779_v32  ;;  %5280 = vtanh.f32 %v1488_v46 }
 0x14c   : > { %7806 = vst [vmem:[#allocation58_spill] sm:$0xff] %v6491_v19  ;;  %7807 = vst [vmem:[#allocation59_spill] sm:$0xff] %v6493_v24  ;;  %v5271_v28 = vpop.eup %5270  ;;  %3282 = vbcast.lane.b32.xlu1 %v6402_v57, 344  ;;  %3278 = vbcast.lane.b32.xlu0 %v6402_v57, 336  ;;  %v4802_v10 = vpop.f32.mrb[20].mxu0 }
 0x14d   : > { %5282 = vtanh.f32 %v1483_v51  ;;  %v5273_v47 = vpop.eup %5272  ;;  %v3781_v55 = vmul.f32 %v5271_v28, %v6119_v34  ;;  %v4035_v25 = vadd.f32 %v4034_v17, %v3780_v11  ;;  %v6499_v56 = vpop.f32.mrb[20].mxu1  ;;  %v1504_v5 = vadd.f32 %v4802_v10, %v6340_v62 }
 0x14e   : > { %v5275_v39 = vpop.eup %5274  ;;  %5284 = vtanh.f32 %v1491_v30  ;;  %v1495_v32 = vpop.f32.mrb[21].mxu0  ;;  %v3783_v30 = vmul.f32 %v5273_v47, %v6125_v36  ;;  %v7812_v36 = vsub.s32 4, %v5983_v4 }
 0x14f   : > { %v6501_v22 = vpop.permute.xlu1 %3049  ;;  %v6503_v27 = vpop.permute.xlu0 %3045  ;;  %v4036_v40 = vadd.f32 %v4035_v25, %v3781_v55  ;;  %v3782_v46 = vmul.f32 %v5275_v39, %v6117_v33  ;;  %v1496_v34 = vadd.f32 %v6340_v62, %v1495_v32 }
 0x150   : > { %7808 = vst [vmem:[#allocation60_spill] sm:$0xff] %v6501_v22  ;;  %7809 = vst [vmem:[#allocation61_spill] sm:$0xff] %v6503_v27  ;;  %v6507_v21 = vpop.f32.mrb[21].mxu1  ;;  %v5277_v51 = vpop.eup %5276  ;;  %3290 = vbcast.lane.b32.xlu1 %v6402_v57, 360  ;;  %3286 = vbcast.lane.b32.xlu0 %v6402_v57, 352  ;;  %v6529_v47 = vrot.slane %v6298_v29, %v7812_v36 }
 0x151   : > { %v4803_v11 = vpop.f32.mrb[22].mxu0  ;;  %v6512_v17 = vpop.f32.mrb[22].mxu1  ;;  %v4037_v28 = vadd.f32 %v4036_v40, %v3782_v46  ;;  %5286 = vtanh.f32 %v1496_v34  ;;  %v3784_v22 = vmul.f32 %v5277_v51, %v6123_v35 }
 0x152   : > { %v1498_v55 = vpop.f32.mrb[23].mxu0  ;;  %v6515_v33 = vpop.f32.mrb[23].mxu1  ;;  %v1507_v25 = vadd.f32 %v4803_v11, %v6340_v62  ;;  %5288 = vtanh.f32 %v1504_v5 }
 0x153   : > { %v1499_v10 = vadd.f32 %v6340_v62, %v1498_v55  ;;  %v6519_v39 = vpop.permute.xlu1 %3057  ;;  %v6521_v32 = vpop.permute.xlu0 %3053  ;;  %v4038_v27 = vadd.f32 %v4037_v28, %v3783_v30 }
 0x154   : > { %7810 = vst [vmem:[#allocation62_spill] sm:$0xff] %v6519_v39  ;;  %7811 = vst [vmem:[#allocation63_spill] sm:$0xff] %v6521_v32  ;;  %v5279_v19 = vpop.eup %5278  ;;  %3298 = vbcast.lane.b32.xlu1 %v6402_v57, 376  ;;  %3294 = vbcast.lane.b32.xlu0 %v6402_v57, 368  ;;  %v4806_v11 = vpop.f32.mrb[24].mxu0 }
 0x155   : > { %5290 = vtanh.f32 %v1499_v10  ;;  %v5281_v40 = vpop.eup %5280  ;;  %v3785_v46 = vmul.f32 %v5279_v19, %v6135_v42  ;;  %v4039_v34 = vadd.f32 %v4038_v27, %v3784_v22  ;;  %v6532_v55 = vpop.f32.mrb[24].mxu1  ;;  %v1520_v28 = vadd.f32 %v4806_v11, %v6340_v62 }
 0x156   : > { %5292 = vtanh.f32 %v1507_v25  ;;  %v1511_v29 = vpop.f32.mrb[25].mxu0  ;;  %v6540_v10 = vpop.f32.mrb[25].mxu1  ;;  %v3787_v27 = vmul.f32 %v5281_v40, %v6141_v44 }
 0x157   : > { %v5283_v35 = vpop.eup %5282  ;;  %v6534_v5 = vpop.permute.xlu1 %3065  ;;  %v4040_v30 = vadd.f32 %v4039_v34, %v3785_v46  ;;  %v1512_v42 = vadd.f32 %v6340_v62, %v1511_v29 }
 0x158   : > { %7813 = vst [vmem:[#allocation64_spill] sm:$0xff] %v6534_v5  ;;  %v6536_v51 = vpop.permute.xlu0 %3061  ;;  %v3786_v57 = vmul.f32 %v5283_v35, %v6133_v41  ;;  %v5285_v36 = vpop.eup %5284  ;;  %3309 = vbcast.lane.b32.xlu1 %v6529_v47, 264  ;;  %3305 = vbcast.lane.b32.xlu0 %v6529_v47, 256 }
 0x159   : > { %7814 = vst [vmem:[#allocation65_spill] sm:$0xff] %v6536_v51  ;;  %v4807_v19 = vpop.f32.mrb[26].mxu0  ;;  %v6545_v22 = vpop.f32.mrb[26].mxu1  ;;  %5294 = vtanh.f32 %v1512_v42  ;;  %v3788_v5 = vmul.f32 %v5285_v36, %v6139_v43 }
 0x15a   : > { %v4041_v25 = vadd.f32 %v4040_v30, %v3786_v57  ;;  %v1514_v46 = vpop.f32.mrb[27].mxu0  ;;  %v6548_v41 = vpop.f32.mrb[27].mxu1  ;;  %v1523_v34 = vadd.f32 %v4807_v19, %v6340_v62  ;;  %5296 = vtanh.f32 %v1520_v28 }
 0x15b   : > { %v1515_v11 = vadd.f32 %v6340_v62, %v1514_v46  ;;  %v6552_v35 = vpop.permute.xlu1 %3073  ;;  %v5287_v39 = vpop.eup %5286 }
 0x15c   : > { %7815 = vst [vmem:[#allocation66_spill] sm:$0xff] %v6552_v35  ;;  %v6554_v29 = vpop.permute.xlu0 %3069  ;;  %v4042_v51 = vadd.f32 %v4041_v25, %v3787_v27  ;;  %3317 = vbcast.lane.b32.xlu1 %v6529_v47, 280  ;;  %3313 = vbcast.lane.b32.xlu0 %v6529_v47, 272  ;;  %v5289_v44 = vpop.eup %5288  ;;  %v3789_v40 = vmul.f32 %v5287_v39, %v6151_v50 }
 0x15d   : > { %7816 = vst [vmem:[#allocation67_spill] sm:$0xff] %v6554_v29  ;;  %5298 = vtanh.f32 %v1515_v11  ;;  %v4810_v57 = vpop.f32.mrb[28].mxu0  ;;  %v6560_v42 = vpop.f32.mrb[28].mxu1 }
 0x15e   : > { %v4043_v30 = vadd.f32 %v4042_v51, %v3788_v5  ;;  %5300 = vtanh.f32 %v1523_v34  ;;  %v1536_v27 = vadd.f32 %v4810_v57, %v6340_v62  ;;  %v1527_v25 = vpop.f32.mrb[29].mxu0  ;;  %v6568_v11 = vpop.f32.mrb[29].mxu1  ;;  %v3791_v51 = vmul.f32 %v5289_v44, %v6162_v53 }
 0x15f   : > { %v5291_v19 = vpop.eup %5290  ;;  %v6562_v46 = vpop.permute.xlu1 %3081  ;;  %v1528_v50 = vadd.f32 %v6340_v62, %v1527_v25 }
 0x160   : > { %7817 = vst [vmem:[#allocation68_spill] sm:$0xff] %v6562_v46  ;;  %v6564_v43 = vpop.permute.xlu0 %3077  ;;  %v4044_v28 = vadd.f32 %v4043_v30, %v3789_v40  ;;  %v3790_v36 = vmul.f32 %v5291_v19, %v6149_v49  ;;  %v5293_v35 = vpop.eup %5292  ;;  %3325 = vbcast.lane.b32.xlu1 %v6529_v47, 296  ;;  %3321 = vbcast.lane.b32.xlu0 %v6529_v47, 288 }
 0x161   : > { %7818 = vst [vmem:[#allocation69_spill] sm:$0xff] %v6564_v43  ;;  %v4811_v39 = vpop.f32.mrb[30].mxu0  ;;  %v6573_v5 = vpop.f32.mrb[30].mxu1  ;;  %5302 = vtanh.f32 %v1528_v50  ;;  %v3792_v46 = vmul.f32 %v5293_v35, %v6160_v52 }
 0x162   : > { %v4045_v34 = vadd.f32 %v4044_v28, %v3790_v36  ;;  %v1530_v40 = vpop.f32.mrb[31].mxu0  ;;  %v6576_v49 = vpop.f32.mrb[31].mxu1  ;;  %v1539_v30 = vadd.f32 %v4811_v39, %v6340_v62  ;;  %5304 = vtanh.f32 %v1536_v27 }
 0x163   : > { %v1531_v57 = vadd.f32 %v6340_v62, %v1530_v40  ;;  %v6580_v19 = vpop.permute.xlu1 %3089  ;;  %v5295_v29 = vpop.eup %5294 }
 0x164   : > { %7819 = vst [vmem:[#allocation70_spill] sm:$0xff] %v6580_v19  ;;  %v6582_v25 = vpop.permute.xlu0 %3085  ;;  %v4046_v43 = vadd.f32 %v4045_v34, %v3791_v51  ;;  %3333 = vbcast.lane.b32.xlu1 %v6529_v47, 312  ;;  %3329 = vbcast.lane.b32.xlu0 %v6529_v47, 304  ;;  %v5297_v53 = vpop.eup %5296  ;;  %v3793_v44 = vmul.f32 %v5295_v29, %v6172_v20 }
 0x165   : > { %7820 = vst [vmem:[#allocation71_spill] sm:$0xff] %v6582_v25  ;;  %5306 = vtanh.f32 %v1531_v57  ;;  %v4814_v36 = vpop.f32.mrb[32].mxu0  ;;  %v6588_v50 = vpop.f32.mrb[32].mxu1 }
 0x166   : > { %v4047_v28 = vadd.f32 %v4046_v43, %v3792_v46  ;;  %5308 = vtanh.f32 %v1539_v30  ;;  %v1552_v51 = vadd.f32 %v4814_v36, %v6340_v62  ;;  %v1543_v34 = vpop.f32.mrb[33].mxu0  ;;  %v6596_v57 = vpop.f32.mrb[33].mxu1  ;;  %v3795_v43 = vmul.f32 %v5297_v53, %v6178_v60 }
 0x167   : > { %v5299_v39 = vpop.eup %5298  ;;  %v6590_v40 = vpop.permute.xlu1 %3097  ;;  %v1544_v20 = vadd.f32 %v6340_v62, %v1543_v34 }
 0x168   : > { %7821 = vst [vmem:[#allocation72_spill] sm:$0xff] %v6590_v40  ;;  %v6592_v52 = vpop.permute.xlu0 %3093  ;;  %v4048_v35 = vadd.f32 %v4047_v28, %v3793_v44  ;;  %v3794_v27 = vmul.f32 %v5299_v39, %v6170_v58  ;;  %v5301_v19 = vpop.eup %5300  ;;  %3341 = vbcast.lane.b32.xlu1 %v6529_v47, 328  ;;  %3337 = vbcast.lane.b32.xlu0 %v6529_v47, 320 }
 0x169   : > { %7822 = vst [vmem:[#allocation73_spill] sm:$0xff] %v6592_v52  ;;  %v4815_v29 = vpop.f32.mrb[34].mxu0  ;;  %v6601_v46 = vpop.f32.mrb[34].mxu1  ;;  %5310 = vtanh.f32 %v1544_v20  ;;  %v3796_v40 = vmul.f32 %v5301_v19, %v6176_v59 }
 0x16a   : > { %v4049_v30 = vadd.f32 %v4048_v35, %v3794_v27  ;;  %v1546_v44 = vpop.f32.mrb[35].mxu0  ;;  %v6604_v58 = vpop.f32.mrb[35].mxu1  ;;  %v1555_v28 = vadd.f32 %v4815_v29, %v6340_v62  ;;  %5312 = vtanh.f32 %v1552_v51 }
 0x16b   : > { %v1547_v36 = vadd.f32 %v6340_v62, %v1546_v44  ;;  %v6608_v39 = vpop.permute.xlu1 %3108  ;;  %v5303_v25 = vpop.eup %5302 }
 0x16c   : > { %7823 = vst [vmem:[#allocation74_spill] sm:$0xff] %v6608_v39  ;;  %v6610_v34 = vpop.permute.xlu0 %3104  ;;  %v4050_v52 = vadd.f32 %v4049_v30, %v3795_v43  ;;  %3349 = vbcast.lane.b32.xlu1 %v6529_v47, 344  ;;  %3345 = vbcast.lane.b32.xlu0 %v6529_v47, 336  ;;  %v5305_v60 = vpop.eup %5304  ;;  %v3797_v53 = vmul.f32 %v5303_v25, %v6188_v2 }
 0x16d   : > { %7824 = vst [vmem:[#allocation75_spill] sm:$0xff] %v6610_v34  ;;  %5314 = vtanh.f32 %v1547_v36  ;;  %v4818_v27 = vpop.f32.mrb[36].mxu0  ;;  %v6616_v20 = vpop.f32.mrb[36].mxu1 }
 0x16e   : > { %v4051_v35 = vadd.f32 %v4050_v52, %v3796_v40  ;;  %5316 = vtanh.f32 %v1555_v28  ;;  %v1568_v43 = vadd.f32 %v4818_v27, %v6340_v62  ;;  %v1559_v30 = vpop.f32.mrb[37].mxu0  ;;  %v6624_v36 = vpop.f32.mrb[37].mxu1  ;;  %v3799_v28 = vmul.f32 %v5305_v60, %v6194_v6 }
 0x16f   : > { %v5307_v29 = vpop.eup %5306  ;;  %v6618_v44 = vpop.permute.xlu1 %3116  ;;  %v1560_v2 = vadd.f32 %v6340_v62, %v1559_v30  ;;  %v1928_v6 = vadd.f32 %v6340_v62, %v6353_v31  ;;  %v1931_v31 = vadd.f32 %v6340_v62, %v6360_v61 }
 0x170   : > { %7825 = vst [vmem:[#allocation76_spill] sm:$0xff] %v6618_v44  ;;  %v6620_v59 = vpop.permute.xlu0 %3112  ;;  %v4052_v19 = vadd.f32 %v4051_v35, %v3797_v53  ;;  %v3798_v51 = vmul.f32 %v5307_v29, %v6186_v1  ;;  %v5309_v39 = vpop.eup %5308  ;;  %3357 = vbcast.lane.b32.xlu1 %v6529_v47, 360  ;;  %3353 = vbcast.lane.b32.xlu0 %v6529_v47, 352 }
 0x171   : > { %7826 = vst [vmem:[#allocation77_spill] sm:$0xff] %v6620_v59  ;;  %v4819_v25 = vpop.f32.mrb[38].mxu0  ;;  %v6630_v52 = vpop.f32.mrb[38].mxu1  ;;  %v1936_v35 = vadd.f32 %v6342_v0, %v6340_v62  ;;  %5318 = vtanh.f32 %v1560_v2  ;;  %v3800_v40 = vmul.f32 %v5309_v39, %v6192_v3  ;;  %v7829_v0 = vsub.s32 5, %v5983_v4 }
 0x172   : > { %v4053_v1 = vadd.f32 %v4052_v19, %v3798_v51  ;;  %v1562_v53 = vpop.f32.mrb[39].mxu0  ;;  %v6635_v27 = vpop.f32.mrb[39].mxu1  ;;  %v1571_v29 = vadd.f32 %v4819_v25, %v6340_v62  ;;  %5320 = vtanh.f32 %v1568_v43  ;;  %v1939_v51 = vadd.f32 %v6358_v9, %v6340_v62 }
 0x173   : > { %v1563_v30 = vadd.f32 %v6340_v62, %v1562_v53  ;;  %v6639_v44 = vpop.permute.xlu1 %3124  ;;  %v5311_v60 = vpop.eup %5310  ;;  %v6651_v19 = vrot.slane %v6226_v38, %v7829_v0 }
 0x174   : > { %7827 = vst [vmem:[#allocation78_spill] sm:$0xff] %v6639_v44  ;;  %v6641_v59 = vpop.permute.xlu0 %3120  ;;  %v4054_v34 = vadd.f32 %v4053_v1, %v3799_v28  ;;  %3365 = vbcast.lane.b32.xlu1 %v6529_v47, 376  ;;  %3361 = vbcast.lane.b32.xlu0 %v6529_v47, 368  ;;  %v5313_v3 = vpop.eup %5312  ;;  %v3801_v38 = vmul.f32 %v5311_v60, %v6204_v18 }
 0x175   : > { %7828 = vst [vmem:[#allocation79_spill] sm:$0xff] %v6641_v59  ;;  %5322 = vtanh.f32 %v1563_v30  ;;  %v4822_v43 = vpop.f32.mrb[40].mxu0  ;;  %v6659_v2 = vpop.f32.mrb[40].mxu1  ;;  %v3803_v18 = vmul.f32 %v5313_v3, %v6210_v23  ;;  %v7835_v3 = vld [vmem:[#allocation42_spill] sm:$0xff] }
 0x176   : > { %v6655_v39 = vadd.f32 %v4054_v34, %v3800_v40  ;;  %5324 = vtanh.f32 %v1936_v35  ;;  %v1584_v34 = vadd.f32 %v4822_v43, %v6340_v62  ;;  %v1575_v40 = vpop.f32.mrb[41].mxu0  ;;  %v6668_v1 = vpop.f32.mrb[41].mxu1 }
 0x177   : > { %v5315_v25 = vpop.eup %5314  ;;  %5326 = vtanh.f32 %v1571_v29  ;;  %v6661_v47 = vpop.permute.xlu1 %3132  ;;  %v1576_v61 = vadd.f32 %v6340_v62, %v1575_v40  ;;  %v7834_v40 = vld [vmem:[#allocation9_spill] sm:$0xff] }
 0x178   : > { %7830 = vst [vmem:[#allocation80_spill] sm:$0xff] %v6661_v47  ;;  %v6663_v28 = vpop.permute.xlu0 %3128  ;;  %v3802_v9 = vmul.f32 %v5315_v25, %v6202_v15  ;;  %5328 = vtanh.f32 %v1928_v6  ;;  %v5317_v53 = vpop.eup %5316  ;;  %3376 = vbcast.lane.b32.xlu1 %v6651_v19, 264  ;;  %3372 = vbcast.lane.b32.xlu0 %v6651_v19, 256  ;;  %v1952_v6 = vadd.f32 %v6370_v14, %v6340_v62  ;;  %v7836_v14 = vld [vmem:[#allocation43_spill] sm:$0xff] }
 0x179   : > { %7831 = vst [vmem:[#allocation81_spill] sm:$0xff] %v6663_v28  ;;  %v4823_v35 = vpop.f32.mrb[42].mxu0  ;;  %5330 = vtanh.f32 %v1939_v51  ;;  %v6673_v29 = vpop.f32.mrb[42].mxu1  ;;  %v3804_v47 = vmul.f32 %v5317_v53, %v7834_v40  ;;  %v7838_v53 = vld [vmem:[#allocation44_spill] sm:$0xff]  ;;  %v7842_v28 = vld [vmem:[#allocation10_spill] sm:$0xff] }
 0x17a   : > { %v4062_v15 = vadd.f32 %v3802_v9, %v3801_v38  ;;  %v1578_v30 = vpop.f32.mrb[43].mxu0  ;;  %5332 = vtanh.f32 %v1931_v31  ;;  %v6678_v60 = vpop.f32.mrb[43].mxu1  ;;  %v1587_v0 = vadd.f32 %v4823_v35, %v6340_v62  ;;  %v1944_v31 = vadd.f32 %v6340_v62, %v7835_v3  ;;  %v7837_v35 = vld [vmem:[#allocation11_spill] sm:$0xff] }
 0x17b   : > { %5334 = vtanh.f32 %v1576_v61  ;;  %v1579_v43 = vadd.f32 %v6340_v62, %v1578_v30  ;;  %v6682_v25 = vpop.permute.xlu1 %3140  ;;  %v5319_v38 = vpop.eup %5318  ;;  %v1955_v9 = vadd.f32 %v7836_v14, %v6340_v62 }
 0x17c   : > { %7832 = vst [vmem:[#allocation82_spill] sm:$0xff] %v6682_v25  ;;  %v6684_v51 = vpop.permute.xlu0 %3136  ;;  %v4063_v23 = vadd.f32 %v4062_v15, %v3803_v18  ;;  %5336 = vtanh.f32 %v1584_v34  ;;  %3384 = vbcast.lane.b32.xlu1 %v6651_v19, 280  ;;  %3380 = vbcast.lane.b32.xlu0 %v6651_v19, 272  ;;  %v5321_v61 = vpop.eup %5320  ;;  %v3805_v30 = vmul.f32 %v5319_v38, %v7837_v35 }
 0x17d   : > { %7833 = vst [vmem:[#allocation83_spill] sm:$0xff] %v6684_v51  ;;  %5338 = vtanh.f32 %v1579_v43  ;;  %v4826_v51 = vpop.f32.mrb[44].mxu0  ;;  %v1947_v34 = vadd.f32 %v6340_v62, %v7838_v53  ;;  %v6696_v18 = vpop.f32.mrb[44].mxu1 }
 0x17e   : > { %v4064_v25 = vadd.f32 %v4063_v23, %v3804_v47  ;;  %5340 = vtanh.f32 %v1952_v6  ;;  %7839 = vst [vmem:[#allocation9_spill] sm:$0xff] %v6696_v18  ;;  %v1600_v47 = vadd.f32 %v4826_v51, %v6340_v62  ;;  %v1591_v23 = vpop.f32.mrb[45].mxu0  ;;  %v6706_v6 = vpop.f32.mrb[45].mxu1 }
 0x17f   : > { %v5323_v15 = vpop.eup %5322  ;;  %5342 = vtanh.f32 %v1587_v0  ;;  %v6698_v43 = vpop.permute.xlu1 %3148  ;;  %7843 = vst [vmem:[#allocation11_spill] sm:$0xff] %v6706_v6  ;;  %v1592_v35 = vadd.f32 %v6340_v62, %v1591_v23 }
 0x180   : > { %7840 = vst [vmem:[#allocation42_spill] sm:$0xff] %v6698_v43  ;;  %v6700_v40 = vpop.permute.xlu0 %3144  ;;  %v6702_v3 = vpop.eup %5324  ;;  %v4065_v14 = vadd.f32 %v4064_v25, %v3805_v30  ;;  %v3806_v44 = vmul.f32 %v5323_v15, %v7842_v28  ;;  %5344 = vtanh.f32 %v1944_v31  ;;  %3392 = vbcast.lane.b32.xlu1 %v6651_v19, 296  ;;  %3388 = vbcast.lane.b32.xlu0 %v6651_v19, 288  ;;  %v7845_v28 = vld [vmem:[#allocation13_spill] sm:$0xff]  ;;  %v7846_v31 = vld [vmem:[#allocation47_spill] sm:$0xff] }
 0x181   : > { %7841 = vst [vmem:[#allocation43_spill] sm:$0xff] %v6700_v40  ;;  %v5327_v38 = vpop.eup %5326  ;;  %v4827_v0 = vpop.f32.mrb[46].mxu0  ;;  %5346 = vtanh.f32 %v1955_v9  ;;  %v3807_v30 = vmul.f32 %v5321_v61, %v7845_v28  ;;  %v1968_v43 = vadd.f32 %v7846_v31, %v6340_v62  ;;  %v7851_v28 = vld [vmem:[#allocation50_spill] sm:$0xff] }
 0x182   : > { %v6711_v53 = vpop.f32.mrb[46].mxu1  ;;  %v6713_v25 = vpop.eup %5328  ;;  %v4066_v51 = vadd.f32 %v4065_v14, %v3806_v44  ;;  %5348 = vtanh.f32 %v1947_v34  ;;  %v1603_v59 = vadd.f32 %v4827_v0, %v6340_v62  ;;  %v7850_v44 = vld [vmem:[#allocation12_spill] sm:$0xff]  ;;  %v1960_v31 = vadd.f32 %v6340_v62, %v7851_v28 }
 0x183   : > { %7844 = vst [vmem:[#allocation44_spill] sm:$0xff] %v6711_v53  ;;  %v1594_v15 = vpop.f32.mrb[47].mxu0  ;;  %v6718_v40 = vpop.f32.mrb[47].mxu1  ;;  %5350 = vtanh.f32 %v1592_v35  ;;  %v3808_v34 = vmul.f32 %v5327_v38, %v7850_v44  ;;  %v7852_v35 = vld [vmem:[#allocation51_spill] sm:$0xff] }
 0x184   : > { %7847 = vst [vmem:[#allocation10_spill] sm:$0xff] %v6718_v40  ;;  %v6720_v23 = vpop.eup %5330  ;;  %v1595_v9 = vadd.f32 %v6340_v62, %v1594_v15  ;;  %v6724_v32 = vpop.permute.xlu1 %3156  ;;  %v4067_v14 = vadd.f32 %v4066_v51, %v3807_v30  ;;  %5352 = vtanh.f32 %v1600_v47  ;;  %3400 = vbcast.lane.b32.xlu1 %v6651_v19, 312  ;;  %3396 = vbcast.lane.b32.xlu0 %v6651_v19, 304 }
 0x185   : > { %7848 = vst [vmem:[#allocation13_spill] sm:$0xff] %v6724_v32  ;;  %v6726_v53 = vpop.permute.xlu0 %3152  ;;  %v6728_v61 = vpop.eup %5332  ;;  %v1971_v0 = vadd.f32 %v7852_v35, %v6340_v62  ;;  %v7853_v32 = vld [vmem:[#allocation15_spill] sm:$0xff]  ;;  %v1963_v47 = vadd.f32 %v6340_v62, %v6425_v54  ;;  %v7857_v35 = vld [vmem:[#allocation14_spill] sm:$0xff] }
 0x186   : > { %7849 = vst [vmem:[#allocation47_spill] sm:$0xff] %v6726_v53  ;;  %v5335_v40 = vpop.eup %5334  ;;  %5354 = vtanh.f32 %v1595_v9  ;;  %v4068_v6 = vadd.f32 %v4067_v14, %v3808_v34  ;;  %v4830_v24 = vpop.f32.mrb[48].mxu0 }
 0x187   : > { %v5337_v15 = vpop.eup %5336  ;;  %v3809_v53 = vmul.f32 %v5335_v40, %v7853_v32  ;;  %5356 = vtanh.f32 %v1968_v43  ;;  %v6740_v38 = vpop.f32.mrb[48].mxu1  ;;  %v1616_v32 = vadd.f32 %v4830_v24, %v6340_v62 }
 0x188   : > { %7854 = vst [vmem:[#allocation12_spill] sm:$0xff] %v6740_v38  ;;  %v5339_v30 = vpop.eup %5338  ;;  %5358 = vtanh.f32 %v1603_v59  ;;  %v6742_v51 = vpop.permute.xlu1 %3164  ;;  %3408 = vbcast.lane.b32.xlu1 %v6651_v19, 328  ;;  %3404 = vbcast.lane.b32.xlu0 %v6651_v19, 320 }
 0x189   : > { %7855 = vst [vmem:[#allocation50_spill] sm:$0xff] %v6742_v51  ;;  %v6744_v9 = vpop.permute.xlu0 %3160  ;;  %v6746_v44 = vpop.eup %5340  ;;  %v4069_v28 = vadd.f32 %v4068_v6, %v3809_v53  ;;  %v3810_v18 = vmul.f32 %v5339_v30, %v7857_v35  ;;  %5360 = vtanh.f32 %v1960_v31  ;;  %v7860_v53 = vld [vmem:[#allocation17_spill] sm:$0xff]  ;;  %v1984_v31 = vadd.f32 %v6437_v12, %v6340_v62  ;;  %v6778_v12 = vld [vmem:[%s7749_s4] ss:$0 sm:$0xff] }
 0x18a   : > { %7856 = vst [vmem:[#allocation51_spill] sm:$0xff] %v6744_v9  ;;  %v1607_v40 = vpop.f32.mrb[49].mxu0  ;;  %v6750_v43 = vpop.f32.mrb[49].mxu1  ;;  %5362 = vtanh.f32 %v1971_v0  ;;  %v3811_v30 = vmul.f32 %v5337_v15, %v7860_v53  ;;  %v7865_v53 = vld [vmem:[#allocation19_spill] sm:$0xff] }
 0x18b   : > { %7858 = vst [vmem:[#allocation15_spill] sm:$0xff] %v6750_v43  ;;  %v5343_v54 = vpop.eup %5342  ;;  %v1608_v34 = vadd.f32 %v6340_v62, %v1607_v40  ;;  %v4831_v59 = vpop.f32.mrb[50].mxu0  ;;  %v4070_v24 = vadd.f32 %v4069_v28, %v3810_v18  ;;  %5364 = vtanh.f32 %v1963_v47  ;;  %v7864_v18 = vld [vmem:[#allocation16_spill] sm:$0xff] }
 0x18c   : > { %v6755_v14 = vpop.f32.mrb[50].mxu1  ;;  %v6757_v6 = vpop.eup %5344  ;;  %v1619_v9 = vadd.f32 %v4831_v59, %v6340_v62  ;;  %v3812_v47 = vmul.f32 %v5343_v54, %v7864_v18  ;;  %3416 = vbcast.lane.b32.xlu1 %v6651_v19, 344  ;;  %3412 = vbcast.lane.b32.xlu0 %v6651_v19, 336 }
 0x18d   : > { %7859 = vst [vmem:[#allocation14_spill] sm:$0xff] %v6755_v14  ;;  %v1610_v35 = vpop.f32.mrb[51].mxu0  ;;  %v6762_v51 = vpop.f32.mrb[51].mxu1  ;;  %5366 = vtanh.f32 %v1608_v34  ;;  %v4071_v28 = vadd.f32 %v4070_v24, %v3811_v30  ;;  %v1976_v34 = vadd.f32 %v6778_v12, %v6448_v13 }
 0x18e   : > { %7861 = vst [vmem:[#allocation17_spill] sm:$0xff] %v6762_v51  ;;  %v6764_v40 = vpop.eup %5346  ;;  %v1611_v0 = vadd.f32 %v6340_v62, %v1610_v35  ;;  %v6768_v14 = vpop.permute.xlu1 %3175  ;;  %5368 = vtanh.f32 %v1616_v32  ;;  %v1987_v62 = vadd.f32 %v6778_v12, %v6454_v7  ;;  %v1979_v35 = vadd.f32 %v6778_v12, %v6457_v48  ;;  %v7869_v51 = vld [vmem:[#allocation18_spill] sm:$0xff] }
 0x18f   : > { %7862 = vst [vmem:[#allocation84_spill] sm:$0xff] %v6768_v14  ;;  %v6770_v43 = vpop.permute.xlu0 %3171  ;;  %v6772_v15 = vpop.eup %5348  ;;  %v4072_v30 = vadd.f32 %v4071_v28, %v3812_v47 }
 0x190   : > { %7863 = vst [vmem:[#allocation85_spill] sm:$0xff] %v6770_v43  ;;  %v5351_v59 = vpop.eup %5350  ;;  %5370 = vtanh.f32 %v1611_v0  ;;  %v4834_v24 = vpop.f32.mrb[52].mxu0  ;;  %3424 = vbcast.lane.b32.xlu1 %v6651_v19, 360  ;;  %3420 = vbcast.lane.b32.xlu0 %v6651_v19, 352 }
 0x191   : > { %v5353_v54 = vpop.eup %5352  ;;  %v3813_v32 = vmul.f32 %v5351_v59, %v7865_v53  ;;  %5372 = vtanh.f32 %v1984_v31  ;;  %v6789_v18 = vpop.f32.mrb[52].mxu1  ;;  %v1632_v47 = vadd.f32 %v6778_v12, %v4834_v24 }
 0x192   : > { %7866 = vst [vmem:[#allocation16_spill] sm:$0xff] %v6789_v18  ;;  %v5355_v13 = vpop.eup %5354  ;;  %5374 = vtanh.f32 %v1619_v9  ;;  %v6791_v0 = vpop.permute.xlu1 %3183  ;;  %v7883_v18 = vld [vmem:[#allocation22_spill] sm:$0xff] }
 0x193   : > { %7867 = vst [vmem:[#allocation19_spill] sm:$0xff] %v6791_v0  ;;  %v6793_v14 = vpop.permute.xlu0 %3179  ;;  %v6795_v43 = vpop.eup %5356  ;;  %v4073_v7 = vadd.f32 %v4072_v30, %v3813_v32  ;;  %v3814_v38 = vmul.f32 %v5355_v13, %v7869_v51  ;;  %5376 = vtanh.f32 %v1976_v34  ;;  %v7872_v51 = vld [vmem:[#allocation21_spill] sm:$0xff]  ;;  %v2000_v34 = vadd.f32 %v6778_v12, %v6469_v63 }
 0x194   : > { %7868 = vst [vmem:[#allocation86_spill] sm:$0xff] %v6793_v14  ;;  %v1623_v28 = vpop.f32.mrb[53].mxu0  ;;  %v6799_v31 = vpop.f32.mrb[53].mxu1  ;;  %5378 = vtanh.f32 %v1987_v62  ;;  %v3815_v30 = vmul.f32 %v5353_v54, %v7872_v51  ;;  %v7876_v54 = vld [vmem:[#allocation20_spill] sm:$0xff]  ;;  %v1992_v63 = vadd.f32 %v6778_v12, %v6479_v16  ;;  %3432 = vbcast.lane.b32.xlu1 %v6651_v19, 376  ;;  %3428 = vbcast.lane.b32.xlu0 %v6651_v19, 368 }
 0x195   : > { %7870 = vst [vmem:[#allocation18_spill] sm:$0xff] %v6799_v31  ;;  %v5359_v48 = vpop.eup %5358  ;;  %v1624_v59 = vadd.f32 %v6778_v12, %v1623_v28  ;;  %v4835_v9 = vpop.f32.mrb[54].mxu0  ;;  %v4074_v24 = vadd.f32 %v4073_v7, %v3814_v38  ;;  %5380 = vtanh.f32 %v1979_v35 }
 0x196   : > { %v6804_v53 = vpop.f32.mrb[54].mxu1  ;;  %v6806_v32 = vpop.eup %5360  ;;  %v1635_v62 = vadd.f32 %v6778_v12, %v4835_v9  ;;  %v3816_v35 = vmul.f32 %v5359_v48, %v7876_v54  ;;  %v7878_v9 = vsub.s32 5, %v5983_v4  ;;  %v2003_v48 = vadd.f32 %v6778_v12, %v6484_v45 }
 0x197   : > { %7871 = vst [vmem:[#allocation87_spill] sm:$0xff] %v6804_v53  ;;  %v1626_v13 = vpop.f32.mrb[55].mxu0  ;;  %v6811_v0 = vpop.f32.mrb[55].mxu1  ;;  %5382 = vtanh.f32 %v1624_v59  ;;  %v4075_v7 = vadd.f32 %v4074_v24, %v3815_v30  ;;  %v6829_v59 = vld [vmem:[%s5975_s29 + $0x8] sm:$0xff] }
 0x198   : > { %7873 = vst [vmem:[#allocation21_spill] sm:$0xff] %v6811_v0  ;;  %v6813_v28 = vpop.eup %5362  ;;  %v1627_v14 = vadd.f32 %v6778_v12, %v1626_v13  ;;  %v6817_v53 = vpop.permute.xlu1 %3191  ;;  %5384 = vtanh.f32 %v1632_v47  ;;  %7877 = vst [vmem:[#allocation20_spill] sm:$0xff] %v6829_v59  ;;  %v6834_v13 = vrot.slane %v6829_v59, %v7878_v9  ;;  %v7879_v30 = vld [vmem:[#allocation23_spill] sm:$0xff] }
 0x199   : > { %7874 = vst [vmem:[#allocation88_spill] sm:$0xff] %v6817_v53  ;;  %v6819_v31 = vpop.permute.xlu0 %3187  ;;  %v6821_v38 = vpop.eup %5364  ;;  %v4076_v16 = vadd.f32 %v4075_v7, %v3816_v35 }
 0x19a   : > { %7875 = vst [vmem:[#allocation89_spill] sm:$0xff] %v6819_v31  ;;  %v5367_v51 = vpop.eup %5366  ;;  %5386 = vtanh.f32 %v1627_v14  ;;  %v4838_v54 = vpop.f32.mrb[56].mxu0  ;;  %v1995_v14 = vadd.f32 %v6778_v12, %v6487_v26  ;;  %3443 = vbcast.lane.b32.xlu1 %v6834_v13, 264  ;;  %3439 = vbcast.lane.b32.xlu0 %v6834_v13, 256 }
 0x19b   : > { %v5369_v47 = vpop.eup %5368  ;;  %v3817_v24 = vmul.f32 %v5367_v51, %v7879_v30  ;;  %5388 = vtanh.f32 %v2000_v34  ;;  %v6841_v19 = vpop.f32.mrb[56].mxu1  ;;  %v1648_v35 = vadd.f32 %v6778_v12, %v4838_v54 }
 0x19c   : > { %7880 = vst [vmem:[#allocation23_spill] sm:$0xff] %v6841_v19  ;;  %v5371_v53 = vpop.eup %5370  ;;  %5390 = vtanh.f32 %v1635_v62  ;;  %v6843_v31 = vpop.permute.xlu1 %3199 }
 0x19d   : > { %7881 = vst [vmem:[#allocation90_spill] sm:$0xff] %v6843_v31  ;;  %v6845_v9 = vpop.permute.xlu0 %3195  ;;  %v6847_v0 = vpop.eup %5372  ;;  %v4077_v45 = vadd.f32 %v4076_v16, %v3817_v24  ;;  %v3818_v59 = vmul.f32 %v5371_v53, %v7883_v18  ;;  %5392 = vtanh.f32 %v1992_v63  ;;  %v7886_v18 = vld [vmem:[#allocation25_spill] sm:$0xff]  ;;  %v2016_v63 = vadd.f32 %v6778_v12, %v6499_v56 }
 0x19e   : > { %7882 = vst [vmem:[#allocation91_spill] sm:$0xff] %v6845_v9  ;;  %v1639_v7 = vpop.f32.mrb[57].mxu0  ;;  %v6851_v34 = vpop.f32.mrb[57].mxu1  ;;  %5394 = vtanh.f32 %v2003_v48  ;;  %v3819_v53 = vmul.f32 %v5369_v47, %v7886_v18  ;;  %v2008_v56 = vadd.f32 %v6778_v12, %v6507_v21  ;;  %3451 = vbcast.lane.b32.xlu1 %v6834_v13, 280  ;;  %3447 = vbcast.lane.b32.xlu0 %v6834_v13, 272 }
 0x19f   : > { %7884 = vst [vmem:[#allocation22_spill] sm:$0xff] %v6851_v34  ;;  %v5375_v26 = vpop.eup %5374  ;;  %v1640_v51 = vadd.f32 %v6778_v12, %v1639_v7  ;;  %v4839_v62 = vpop.f32.mrb[58].mxu0  ;;  %v4078_v16 = vadd.f32 %v4077_v45, %v3818_v59  ;;  %5396 = vtanh.f32 %v1995_v14  ;;  %v7890_v59 = vld [vmem:[#allocation24_spill] sm:$0xff] }
 0x1a0   : > { %v6856_v30 = vpop.f32.mrb[58].mxu1  ;;  %v6858_v24 = vpop.eup %5376  ;;  %v1651_v9 = vadd.f32 %v6778_v12, %v4839_v62  ;;  %v3820_v14 = vmul.f32 %v5375_v26, %v7890_v59  ;;  %v7895_v59 = vld [vmem:[#allocation26_spill] sm:$0xff] }
 0x1a1   : > { %7885 = vst [vmem:[#allocation92_spill] sm:$0xff] %v6856_v30  ;;  %v1642_v54 = vpop.f32.mrb[59].mxu0  ;;  %v6863_v31 = vpop.f32.mrb[59].mxu1  ;;  %5398 = vtanh.f32 %v1640_v51  ;;  %v4079_v45 = vadd.f32 %v4078_v16, %v3819_v53  ;;  %v2019_v51 = vadd.f32 %v6778_v12, %v6512_v17 }
 0x1a2   : > { %7887 = vst [vmem:[#allocation25_spill] sm:$0xff] %v6863_v31  ;;  %v6865_v7 = vpop.eup %5378  ;;  %v1643_v48 = vadd.f32 %v6778_v12, %v1642_v54  ;;  %v6869_v30 = vpop.permute.xlu1 %3207  ;;  %5400 = vtanh.f32 %v1648_v35  ;;  %v7891_v54 = vld [vmem:[#allocation27_spill] sm:$0xff]  ;;  %v2011_v35 = vadd.f32 %v6778_v12, %v6515_v33  ;;  %3459 = vbcast.lane.b32.xlu1 %v6834_v13, 296  ;;  %3455 = vbcast.lane.b32.xlu0 %v6834_v13, 288 }
 0x1a3   : > { %7888 = vst [vmem:[#allocation93_spill] sm:$0xff] %v6869_v30  ;;  %v6871_v34 = vpop.permute.xlu0 %3203  ;;  %v6873_v47 = vpop.eup %5380 }
 0x1a4   : > { %7889 = vst [vmem:[#allocation94_spill] sm:$0xff] %v6871_v34  ;;  %v5383_v18 = vpop.eup %5382  ;;  %5402 = vtanh.f32 %v1643_v48  ;;  %v4080_v34 = vadd.f32 %v4079_v45, %v3820_v14  ;;  %v4842_v31 = vpop.f32.mrb[60].mxu0 }
 0x1a5   : > { %v5385_v62 = vpop.eup %5384  ;;  %v3821_v30 = vmul.f32 %v5383_v18, %v7891_v54  ;;  %5404 = vtanh.f32 %v2016_v63  ;;  %v6885_v26 = vpop.f32.mrb[60].mxu1  ;;  %v1664_v14 = vadd.f32 %v6778_v12, %v4842_v31 }
 0x1a6   : > { %7892 = vst [vmem:[#allocation24_spill] sm:$0xff] %v6885_v26  ;;  %v5387_v21 = vpop.eup %5386  ;;  %5406 = vtanh.f32 %v1651_v9  ;;  %v6887_v53 = vpop.permute.xlu1 %3215  ;;  %3467 = vbcast.lane.b32.xlu1 %v6834_v13, 312  ;;  %3463 = vbcast.lane.b32.xlu0 %v6834_v13, 304 }
 0x1a7   : > { %7893 = vst [vmem:[#allocation27_spill] sm:$0xff] %v6887_v53  ;;  %v6889_v16 = vpop.permute.xlu0 %3211  ;;  %v6891_v48 = vpop.eup %5388  ;;  %v4081_v17 = vadd.f32 %v4080_v34, %v3821_v30  ;;  %v3822_v19 = vmul.f32 %v5387_v21, %v7895_v59  ;;  %5408 = vtanh.f32 %v2008_v56  ;;  %v7898_v30 = vld [vmem:[#allocation29_spill] sm:$0xff]  ;;  %v2032_v56 = vadd.f32 %v6778_v12, %v6532_v55 }
 0x1a8   : > { %7894 = vst [vmem:[#allocation95_spill] sm:$0xff] %v6889_v16  ;;  %v1655_v45 = vpop.f32.mrb[61].mxu0  ;;  %v6895_v63 = vpop.f32.mrb[61].mxu1  ;;  %5410 = vtanh.f32 %v2019_v51  ;;  %v3823_v21 = vmul.f32 %v5385_v62, %v7898_v30  ;;  %v2024_v55 = vadd.f32 %v6778_v12, %v6540_v10 }
 0x1a9   : > { %7896 = vst [vmem:[#allocation26_spill] sm:$0xff] %v6895_v63  ;;  %v5391_v33 = vpop.eup %5390  ;;  %v1656_v18 = vadd.f32 %v6778_v12, %v1655_v45  ;;  %v4843_v9 = vpop.f32.mrb[62].mxu0  ;;  %v4082_v31 = vadd.f32 %v4081_v17, %v3822_v19  ;;  %5412 = vtanh.f32 %v2011_v35  ;;  %v7902_v19 = vld [vmem:[#allocation28_spill] sm:$0xff] }
 0x1aa   : > { %v6900_v54 = vpop.f32.mrb[62].mxu1  ;;  %v6902_v34 = vpop.eup %5392  ;;  %v1667_v16 = vadd.f32 %v6778_v12, %v4843_v9  ;;  %v3824_v35 = vmul.f32 %v5391_v33, %v7902_v19  ;;  %v7907_v19 = vld [vmem:[#allocation30_spill] sm:$0xff]  ;;  %3475 = vbcast.lane.b32.xlu1 %v6834_v13, 328  ;;  %3471 = vbcast.lane.b32.xlu0 %v6834_v13, 320 }
 0x1ab   : > { %7897 = vst [vmem:[#allocation96_spill] sm:$0xff] %v6900_v54  ;;  %v1658_v59 = vpop.f32.mrb[63].mxu0  ;;  %v6907_v53 = vpop.f32.mrb[63].mxu1  ;;  %5414 = vtanh.f32 %v1656_v18  ;;  %v4083_v17 = vadd.f32 %v4082_v31, %v3823_v21  ;;  %v2035_v18 = vadd.f32 %v6778_v12, %v6545_v22 }
 0x1ac   : > { %7899 = vst [vmem:[#allocation29_spill] sm:$0xff] %v6907_v53  ;;  %v6909_v45 = vpop.eup %5394  ;;  %v1659_v51 = vadd.f32 %v6778_v12, %v1658_v59  ;;  %v6913_v54 = vpop.permute.xlu1 %3223  ;;  %5416 = vtanh.f32 %v1664_v14  ;;  %v7903_v59 = vld [vmem:[#allocation31_spill] sm:$0xff]  ;;  %v2027_v14 = vadd.f32 %v6778_v12, %v6548_v41 }
 0x1ad   : > { %7900 = vst [vmem:[#allocation97_spill] sm:$0xff] %v6913_v54  ;;  %v6915_v63 = vpop.permute.xlu0 %3219  ;;  %v6917_v62 = vpop.eup %5396 }
 0x1ae   : > { %7901 = vst [vmem:[#allocation98_spill] sm:$0xff] %v6915_v63  ;;  %v5399_v30 = vpop.eup %5398  ;;  %5418 = vtanh.f32 %v1659_v51  ;;  %v4084_v63 = vadd.f32 %v4083_v17, %v3824_v35  ;;  %v4846_v53 = vpop.f32.mrb[64].mxu0  ;;  %3483 = vbcast.lane.b32.xlu1 %v6834_v13, 344  ;;  %3479 = vbcast.lane.b32.xlu0 %v6834_v13, 336 }
 0x1af   : > { %v5401_v9 = vpop.eup %5400  ;;  %v3825_v54 = vmul.f32 %v5399_v30, %v7903_v59  ;;  %5420 = vtanh.f32 %v2032_v56  ;;  %v6929_v33 = vpop.f32.mrb[64].mxu1  ;;  %v1680_v35 = vadd.f32 %v6778_v12, %v4846_v53 }
 0x1b0   : > { %7904 = vst [vmem:[#allocation28_spill] sm:$0xff] %v6929_v33  ;;  %v5403_v10 = vpop.eup %5402  ;;  %5422 = vtanh.f32 %v1667_v16  ;;  %v6931_v21 = vpop.permute.xlu1 %3231  ;;  %v7914_v33 = vld [vmem:[#allocation35_spill] sm:$0xff] }
 0x1b1   : > { %7905 = vst [vmem:[#allocation31_spill] sm:$0xff] %v6931_v21  ;;  %v6933_v31 = vpop.permute.xlu0 %3227  ;;  %v6935_v51 = vpop.eup %5404  ;;  %v4085_v22 = vadd.f32 %v4084_v63, %v3825_v54  ;;  %v3826_v26 = vmul.f32 %v5403_v10, %v7907_v19  ;;  %5424 = vtanh.f32 %v2024_v55  ;;  %v7910_v54 = vld [vmem:[#allocation33_spill] sm:$0xff]  ;;  %v2048_v55 = vadd.f32 %v6778_v12, %v6560_v42 }
 0x1b2   : > { %7906 = vst [vmem:[#allocation99_spill] sm:$0xff] %v6933_v31  ;;  %v1671_v17 = vpop.f32.mrb[65].mxu0  ;;  %v6939_v56 = vpop.f32.mrb[65].mxu1  ;;  %5426 = vtanh.f32 %v2035_v18  ;;  %v3827_v10 = vmul.f32 %v5401_v9, %v7910_v54  ;;  %3491 = vbcast.lane.b32.xlu1 %v6834_v13, 360  ;;  %3487 = vbcast.lane.b32.xlu0 %v6834_v13, 352 }
 0x1b3   : > { %7908 = vst [vmem:[#allocation30_spill] sm:$0xff] %v6939_v56  ;;  %v5407_v41 = vpop.eup %5406  ;;  %v1672_v30 = vadd.f32 %v6778_v12, %v1671_v17  ;;  %v4847_v16 = vpop.f32.mrb[66].mxu0  ;;  %v4086_v53 = vadd.f32 %v4085_v22, %v3826_v26  ;;  %5428 = vtanh.f32 %v2027_v14  ;;  %v7913_v26 = vld [vmem:[#allocation32_spill] sm:$0xff] }
 0x1b4   : > { %v6944_v59 = vpop.f32.mrb[66].mxu1  ;;  %v6946_v63 = vpop.eup %5408  ;;  %v1683_v31 = vadd.f32 %v6778_v12, %v4847_v16  ;;  %v3828_v14 = vmul.f32 %v5407_v41, %v7913_v26  ;;  %v2040_v16 = vadd.f32 %v6778_v12, %v6568_v11  ;;  %v7916_v26 = vsub.s32 6, %v5983_v4 }
 0x1b5   : > { %7909 = vst [vmem:[#allocation100_spill] sm:$0xff] %v6944_v59  ;;  %v1674_v19 = vpop.f32.mrb[67].mxu0  ;;  %v6951_v21 = vpop.f32.mrb[67].mxu1  ;;  %5430 = vtanh.f32 %v1672_v30  ;;  %v4087_v22 = vadd.f32 %v4086_v53, %v3827_v10 }
 0x1b6   : > { %7911 = vst [vmem:[#allocation33_spill] sm:$0xff] %v6951_v21  ;;  %v6953_v17 = vpop.eup %5410  ;;  %v1675_v18 = vadd.f32 %v6778_v12, %v1674_v19  ;;  %v3243_v59 = vpop.permute.xlu1 %3242  ;;  %5432 = vtanh.f32 %v1680_v35  ;;  %3499 = vbcast.lane.b32.xlu1 %v6834_v13, 376  ;;  %3495 = vbcast.lane.b32.xlu0 %v6834_v13, 368 }
 0x1b7   : > { %7912 = vst [vmem:[#allocation101_spill] sm:$0xff] %v6953_v17  ;;  %v3239_v56 = vpop.permute.xlu0 %3238  ;;  %v6958_v9 = vpop.eup %5412  ;;  %v3898_v42 = vmul.f32 %v6728_v61, %v3243_v59  ;;  %v4088_v41 = vadd.f32 %v4087_v22, %v3828_v14  ;;  %v2051_v61 = vadd.f32 %v6778_v12, %v6573_v5  ;;  %v7918_v14 = vld [vmem:[#allocation34_spill] sm:$0xff] }
 0x1b8   : > { %v5415_v54 = vpop.eup %5414  ;;  %5434 = vtanh.f32 %v1675_v18  ;;  %v3897_v30 = vmul.f32 %v6713_v25, %v3239_v56  ;;  %v4850_v10 = vpop.f32.mrb[68].mxu0  ;;  %v5762_v18 = vld [vmem:[%s5975_s29] sm:$0xff] }
 0x1b9   : > { %v5417_v19 = vpop.eup %5416  ;;  %v3829_v21 = vmul.f32 %v5415_v54, %v7914_v33  ;;  %5436 = vtanh.f32 %v2048_v55  ;;  %v6970_v35 = vpop.f32.mrb[68].mxu1  ;;  %v6975_v11 = vrot.slane %v5762_v18, %v7916_v26  ;;  %v1696_v5 = vadd.f32 %v6778_v12, %v4850_v10  ;;  %v7922_v10 = vld [vmem:[#allocation37_spill] sm:$0xff] }
 0x1ba   : > { %7915 = vst [vmem:[#allocation32_spill] sm:$0xff] %v6970_v35  ;;  %v5419_v25 = vpop.eup %5418  ;;  %5438 = vtanh.f32 %v1683_v31  ;;  %v4173_v56 = vadd.f32 %v3898_v42, %v3897_v30  ;;  %v3251_v59 = vpop.permute.xlu1 %3250 }
 0x1bb   : > { %v3247_v53 = vpop.permute.xlu0 %3246  ;;  %v6977_v17 = vpop.eup %5420  ;;  %v4089_v33 = vadd.f32 %v4088_v41, %v3829_v21  ;;  %v3830_v55 = vmul.f32 %v5419_v25, %v7918_v14  ;;  %v3900_v42 = vmul.f32 %v6720_v23, %v3251_v59  ;;  %5440 = vtanh.f32 %v2040_v16  ;;  %3510 = vbcast.lane.b32.xlu1 %v6975_v11, 264  ;;  %3506 = vbcast.lane.b32.xlu0 %v6975_v11, 256 }
 0x1bc   : > { %7917 = vst [vmem:[#allocation35_spill] sm:$0xff] %v6977_v17  ;;  %v3899_v22 = vmul.f32 %v6702_v3, %v3247_v53  ;;  %v1687_v54 = vpop.f32.mrb[69].mxu0  ;;  %v6982_v35 = vpop.f32.mrb[69].mxu1  ;;  %v2043_v21 = vadd.f32 %v6778_v12, %v6576_v49  ;;  %v3831_v25 = vmul.f32 %v5417_v19, %v7922_v10  ;;  %5442 = vtanh.f32 %v2051_v61  ;;  %v7923_v19 = vld [vmem:[#allocation36_spill] sm:$0xff] }
 0x1bd   : > { %7919 = vst [vmem:[#allocation34_spill] sm:$0xff] %v6982_v35  ;;  %v5423_v31 = vpop.eup %5422  ;;  %v1688_v30 = vadd.f32 %v6778_v12, %v1687_v54  ;;  %v4851_v26 = vpop.f32.mrb[70].mxu0  ;;  %v4090_v53 = vadd.f32 %v4089_v33, %v3830_v55  ;;  %v2064_v61 = vadd.f32 %v6778_v12, %v6588_v50 }
 0x1be   : > { %v6990_v3 = vpop.f32.mrb[70].mxu1  ;;  %v6992_v41 = vpop.eup %5424  ;;  %v4174_v14 = vadd.f32 %v4173_v56, %v3899_v22  ;;  %v1699_v16 = vadd.f32 %v6778_v12, %v4851_v26  ;;  %v3832_v33 = vmul.f32 %v5423_v31, %v7923_v19 }
 0x1bf   : > { %7920 = vst [vmem:[#allocation102_spill] sm:$0xff] %v6990_v3  ;;  %7921 = vst [vmem:[#allocation103_spill] sm:$0xff] %v6992_v41  ;;  %v1690_v23 = vpop.f32.mrb[71].mxu0  ;;  %v6995_v59 = vpop.f32.mrb[71].mxu1  ;;  %5444 = vtanh.f32 %v1688_v30  ;;  %v7753_v3 = vsub.s32 7, %v5983_v4  ;;  %v4091_v56 = vadd.f32 %v4090_v53, %v3831_v25  ;;  %3518 = vbcast.lane.b32.xlu1 %v6975_v11, 280 }
 0x1c0   : > { %v6997_v54 = vpop.eup %5426  ;;  %v1691_v35 = vadd.f32 %v6778_v12, %v1690_v23  ;;  %v3259_v49 = vpop.permute.xlu1 %3258  ;;  %5446 = vtanh.f32 %v1696_v5  ;;  %v4175_v26 = vadd.f32 %v4174_v14, %v3900_v42  ;;  %v2056_v5 = vadd.f32 %v6778_v12, %v6596_v57  ;;  %v7924_v42 = vld [vmem:[#allocation39_spill] sm:$0xff]  ;;  %v7925_v14 = vld [vmem:[#allocation38_spill] sm:$0xff]  ;;  %3514 = vbcast.lane.b32.xlu0 %v6975_v11, 272 }
 0x1c1   : > { %v3255_v17 = vpop.permute.xlu0 %3254  ;;  %v7002_v41 = vpop.eup %5428  ;;  %v3902_v22 = vmul.f32 %v6772_v15, %v3259_v49  ;;  %v7011_v23 = vadd.f32 %v4091_v56, %v3832_v33 }
 0x1c2   : > { %v5431_v55 = vpop.eup %5430  ;;  %5448 = vtanh.f32 %v1691_v35  ;;  %v3901_v30 = vmul.f32 %v6757_v6, %v3255_v17  ;;  %v4854_v31 = vpop.f32.mrb[72].mxu0  ;;  %v7019_v17 = vrot.slane %v5762_v18, %v7753_v3 }
 0x1c3   : > { %v5433_v10 = vpop.eup %5432  ;;  %5450 = vtanh.f32 %v2043_v21  ;;  %v7015_v50 = vpop.f32.mrb[72].mxu1  ;;  %v3833_v53 = vmul.f32 %v5431_v55, %v7924_v42  ;;  %v1712_v57 = vadd.f32 %v6778_v12, %v4854_v31  ;;  %v2067_v42 = vadd.f32 %v6778_v12, %v6601_v46 }
 0x1c4   : > { %v5435_v35 = vpop.eup %5434  ;;  %5452 = vtanh.f32 %v1699_v16  ;;  %v4176_v15 = vadd.f32 %v4175_v26, %v3901_v30  ;;  %v3267_v25 = vpop.permute.xlu1 %3266  ;;  %v2059_v46 = vadd.f32 %v6778_v12, %v6604_v58  ;;  %v2080_v58 = vadd.f32 %v6778_v12, %v6616_v20  ;;  %3644 = vbcast.lane.b32.xlu1 %v7019_v17, 264  ;;  %3640 = vbcast.lane.b32.xlu0 %v7019_v17, 256 }
 0x1c5   : > { %v3263_v6 = vpop.permute.xlu0 %3262  ;;  %v7021_v13 = vpop.eup %5436  ;;  %v3834_v21 = vmul.f32 %v5435_v35, %v7925_v14  ;;  %v3904_v56 = vmul.f32 %v6764_v40, %v3267_v25  ;;  %5454 = vtanh.f32 %v2064_v61 }
 0x1c6   : > { %v3903_v49 = vmul.f32 %v6746_v44, %v3263_v6  ;;  %v1703_v19 = vpop.f32.mrb[73].mxu0  ;;  %v7027_v33 = vpop.f32.mrb[73].mxu1  ;;  %v4177_v30 = vadd.f32 %v4176_v15, %v3902_v22  ;;  %v7926_v44 = vld [vmem:[#allocation41_spill] sm:$0xff]  ;;  %5456 = vtanh.f32 %v2056_v5 }
 0x1c7   : > { %v5439_v16 = vpop.eup %5438  ;;  %v1704_v18 = vadd.f32 %v6778_v12, %v1703_v19  ;;  %v4855_v55 = vpop.f32.mrb[74].mxu0  ;;  %v3835_v35 = vmul.f32 %v5433_v10, %v7926_v44  ;;  %v4099_v31 = vadd.f32 %v3834_v21, %v3833_v53  ;;  %v7927_v10 = vld [vmem:[#allocation40_spill] sm:$0xff]  ;;  %v7928_v44 = vld [vmem:[#allocation46_spill] sm:$0xff] }
 0x1c8   : > { %v7033_v26 = vpop.f32.mrb[74].mxu1  ;;  %v1706_v6 = vpop.f32.mrb[75].mxu0  ;;  %v4178_v15 = vadd.f32 %v4177_v30, %v3903_v49  ;;  %v1715_v25 = vadd.f32 %v6778_v12, %v4855_v55  ;;  %v3836_v53 = vmul.f32 %v5439_v16, %v7927_v10  ;;  %3652 = vbcast.lane.b32.xlu1 %v7019_v17, 280  ;;  %3648 = vbcast.lane.b32.xlu0 %v7019_v17, 272 }
 0x1c9   : > { %v7038_v40 = vpop.f32.mrb[75].mxu1  ;;  %v7040_v22 = vpop.eup %5440  ;;  %5458 = vtanh.f32 %v1704_v18  ;;  %v1707_v61 = vadd.f32 %v6778_v12, %v1706_v6  ;;  %v4100_v5 = vadd.f32 %v4099_v31, %v3835_v35 }
 0x1ca   : > { %v3275_v14 = vpop.permute.xlu1 %3274  ;;  %v3271_v19 = vpop.permute.xlu0 %3270  ;;  %5460 = vtanh.f32 %v1712_v57  ;;  %v4179_v18 = vadd.f32 %v4178_v15, %v3904_v56 }
 0x1cb   : > { %v7044_v3 = vpop.eup %5442  ;;  %5462 = vtanh.f32 %v1707_v61  ;;  %v3906_v49 = vmul.f32 %v6821_v38, %v3275_v14  ;;  %v3905_v30 = vmul.f32 %v6806_v32, %v3271_v19  ;;  %v4101_v16 = vadd.f32 %v4100_v5, %v3836_v53  ;;  %v4858_v35 = vpop.f32.mrb[76].mxu0  ;;  %v7929_v14 = vld [vmem:[#allocation45_spill] sm:$0xff] }
 0x1cc   : > { %v5445_v21 = vpop.eup %5444  ;;  %5464 = vtanh.f32 %v2067_v42  ;;  %v7056_v57 = vpop.f32.mrb[76].mxu1  ;;  %v1728_v53 = vadd.f32 %v6778_v12, %v4858_v35  ;;  %3656 = vbcast.lane.b32.xlu1 %v7019_v17, 288  ;;  %3522 = vbcast.lane.b32.xlu0 %v6975_v11, 288 }
 0x1cd   : > { %v5447_v55 = vpop.eup %5446  ;;  %v3837_v6 = vmul.f32 %v5445_v21, %v7928_v44  ;;  %5466 = vtanh.f32 %v1715_v25  ;;  %v4180_v38 = vadd.f32 %v4179_v18, %v3905_v30  ;;  %v1719_v42 = vpop.f32.mrb[77].mxu0 }
 0x1ce   : > { %v5449_v31 = vpop.eup %5448  ;;  %v3283_v32 = vpop.permute.xlu1 %3282  ;;  %v1720_v25 = vadd.f32 %v6778_v12, %v1719_v42  ;;  %5468 = vtanh.f32 %v2059_v46 }
 0x1cf   : > { %v3279_v56 = vpop.permute.xlu0 %3278  ;;  %v7058_v15 = vpop.eup %5450  ;;  %v4102_v61 = vadd.f32 %v4101_v16, %v3837_v6  ;;  %v3838_v19 = vmul.f32 %v5449_v31, %v7929_v14  ;;  %v3908_v10 = vmul.f32 %v6813_v28, %v3283_v32  ;;  %v4181_v44 = vadd.f32 %v4180_v38, %v3906_v49  ;;  %v7931_v28 = vld [vmem:[#allocation49_spill] sm:$0xff] }
 0x1d0   : > { %v7063_v5 = vpop.f32.mrb[77].mxu1  ;;  %v5453_v20 = vpop.eup %5452  ;;  %v3907_v21 = vmul.f32 %v6795_v43, %v3279_v56  ;;  %v3839_v6 = vmul.f32 %v5447_v55, %v7931_v28  ;;  %5470 = vtanh.f32 %v2080_v58  ;;  %v2072_v31 = vadd.f32 %v6778_v12, %v6624_v36  ;;  %v7932_v55 = vld [vmem:[#allocation48_spill] sm:$0xff]  ;;  %v7933_v28 = vld [vmem:[#allocation53_spill] sm:$0xff]  ;;  %3660 = vbcast.lane.b32.xlu1 %v7019_v17, 296  ;;  %3526 = vbcast.lane.b32.xlu0 %v6975_v11, 296 }
 0x1d1   : > { %v4859_v30 = vpop.f32.mrb[78].mxu0  ;;  %v7069_v18 = vpop.f32.mrb[78].mxu1  ;;  %v4103_v16 = vadd.f32 %v4102_v61, %v3838_v19  ;;  %5472 = vtanh.f32 %v1720_v25  ;;  %v3840_v61 = vmul.f32 %v5453_v20, %v7932_v55  ;;  %v2083_v36 = vadd.f32 %v6778_v12, %v6630_v52 }
 0x1d2   : > { %7930 = vst [vmem:[#allocation37_spill] sm:$0xff] %v7069_v18  ;;  %v1722_v35 = vpop.f32.mrb[79].mxu0  ;;  %v7074_v43 = vpop.f32.mrb[79].mxu1  ;;  %v4182_v38 = vadd.f32 %v4181_v44, %v3907_v21  ;;  %v1731_v32 = vadd.f32 %v6778_v12, %v4859_v30  ;;  %5474 = vtanh.f32 %v1728_v53  ;;  %v2075_v52 = vadd.f32 %v6778_v12, %v6635_v27 }
 0x1d3   : > { %v7076_v49 = vpop.eup %5454  ;;  %v1723_v46 = vadd.f32 %v6778_v12, %v1722_v35  ;;  %v3291_v56 = vpop.permute.xlu1 %3290  ;;  %v4104_v58 = vadd.f32 %v4103_v16, %v3839_v6 }
 0x1d4   : > { %v3287_v14 = vpop.permute.xlu0 %3286  ;;  %v7080_v42 = vpop.eup %5456  ;;  %v3910_v21 = vmul.f32 %v6873_v47, %v3291_v56  ;;  %v4183_v25 = vadd.f32 %v4182_v38, %v3908_v10  ;;  %v2096_v38 = vadd.f32 %v6778_v12, %v6659_v2  ;;  %3664 = vbcast.lane.b32.xlu1 %v7019_v17, 304  ;;  %3530 = vbcast.lane.b32.xlu0 %v6975_v11, 304 }
 0x1d5   : > { %v5459_v19 = vpop.eup %5458  ;;  %5476 = vtanh.f32 %v1723_v46  ;;  %v3909_v44 = vmul.f32 %v6858_v24, %v3287_v14  ;;  %v4105_v20 = vadd.f32 %v4104_v58, %v3840_v61  ;;  %v4862_v6 = vpop.f32.mrb[80].mxu0  ;;  %v7935_v14 = vld [vmem:[#allocation52_spill] sm:$0xff] }
 0x1d6   : > { %v5461_v30 = vpop.eup %5460  ;;  %v3841_v35 = vmul.f32 %v5459_v19, %v7933_v28  ;;  %5478 = vtanh.f32 %v2072_v31  ;;  %v7092_v53 = vpop.f32.mrb[80].mxu1  ;;  %v1744_v61 = vadd.f32 %v6778_v12, %v4862_v6 }
 0x1d7   : > { %7934 = vst [vmem:[#allocation36_spill] sm:$0xff] %v7092_v53  ;;  %v5463_v16 = vpop.eup %5462  ;;  %5480 = vtanh.f32 %v1731_v32  ;;  %v4184_v47 = vadd.f32 %v4183_v25, %v3909_v44  ;;  %v3299_v24 = vpop.permute.xlu1 %3298 }
 0x1d8   : > { %v3295_v10 = vpop.permute.xlu0 %3294  ;;  %v7096_v46 = vpop.eup %5464  ;;  %v4106_v56 = vadd.f32 %v4105_v20, %v3841_v35  ;;  %v3842_v55 = vmul.f32 %v5463_v16, %v7935_v14  ;;  %v3912_v32 = vmul.f32 %v6865_v7, %v3299_v24  ;;  %5482 = vtanh.f32 %v2083_v36  ;;  %v7938_v35 = vld [vmem:[#allocation55_spill] sm:$0xff]  ;;  %3668 = vbcast.lane.b32.xlu1 %v7019_v17, 312  ;;  %3534 = vbcast.lane.b32.xlu0 %v6975_v11, 312 }
 0x1d9   : > { %v3911_v31 = vmul.f32 %v6847_v0, %v3295_v10  ;;  %v1735_v27 = vpop.f32.mrb[81].mxu0  ;;  %v7101_v58 = vpop.f32.mrb[81].mxu1  ;;  %v4185_v44 = vadd.f32 %v4184_v47, %v3910_v21  ;;  %v4056_v0 = vrot.slane %v6655_v39, 4  ;;  %v3843_v20 = vmul.f32 %v5461_v30, %v7938_v35 }
 0x1da   : > { %7936 = vst [vmem:[#allocation39_spill] sm:$0xff] %v7101_v58  ;;  %v5467_v19 = vpop.eup %5466  ;;  %v1736_v25 = vadd.f32 %v6778_v12, %v1735_v27  ;;  %v4863_v2 = vpop.f32.mrb[82].mxu0  ;;  %v4107_v6 = vadd.f32 %v4106_v56, %v3842_v55  ;;  %5484 = vtanh.f32 %v2075_v52  ;;  %v2088_v52 = vadd.f32 %v6778_v12, %v6668_v1 }
 0x1db   : > { %v7107_v28 = vpop.f32.mrb[82].mxu1  ;;  %v1738_v16 = vpop.f32.mrb[83].mxu0  ;;  %v4186_v21 = vadd.f32 %v4185_v44, %v3911_v31  ;;  %v1747_v47 = vadd.f32 %v6778_v12, %v4863_v2  ;;  %v2099_v1 = vadd.f32 %v6778_v12, %v6673_v29 }
 0x1dc   : > { %7937 = vst [vmem:[#allocation38_spill] sm:$0xff] %v7107_v28  ;;  %v7111_v10 = vpop.f32.mrb[83].mxu1  ;;  %v7113_v7 = vpop.eup %5468  ;;  %5486 = vtanh.f32 %v1736_v25  ;;  %v1739_v24 = vadd.f32 %v6778_v12, %v1738_v16  ;;  %v7940_v28 = vld [vmem:[#allocation54_spill] sm:$0xff]  ;;  %v4108_v30 = vadd.f32 %v4107_v6, %v3843_v20  ;;  %3672 = vbcast.lane.b32.xlu1 %v7019_v17, 320  ;;  %3538 = vbcast.lane.b32.xlu0 %v6975_v11, 320 }
 0x1dd   : > { %7939 = vst [vmem:[#allocation41_spill] sm:$0xff] %v7111_v10  ;;  %v3310_v36 = vpop.permute.xlu1 %3309  ;;  %v3306_v14 = vpop.permute.xlu0 %3305  ;;  %v3844_v53 = vmul.f32 %v5467_v19, %v7940_v28  ;;  %5488 = vtanh.f32 %v1744_v61  ;;  %v4187_v44 = vadd.f32 %v4186_v21, %v3912_v32 }
 0x1de   : > { %v7117_v27 = vpop.eup %5470  ;;  %5490 = vtanh.f32 %v1739_v24  ;;  %v3914_v55 = vmul.f32 %v6917_v62, %v3310_v36  ;;  %v3913_v31 = vmul.f32 %v6902_v34, %v3306_v14  ;;  %v4866_v28 = vpop.f32.mrb[84].mxu0  ;;  %v7132_v62 = vadd.f32 %v4056_v0, %v6655_v39 }
 0x1df   : > { %v5473_v56 = vpop.eup %5472  ;;  %v4109_v19 = vadd.f32 %v4108_v30, %v3844_v53  ;;  %5492 = vtanh.f32 %v2096_v38  ;;  %v7129_v61 = vpop.f32.mrb[84].mxu1  ;;  %v1760_v38 = vadd.f32 %v6778_v12, %v4866_v28 }
 0x1e0   : > { %v5475_v25 = vpop.eup %5474  ;;  %v3845_v2 = vmul.f32 %v5473_v56, %v6463_v8  ;;  %7941 = vst [vmem:[#allocation40_spill] sm:$0xff] %v7129_v61  ;;  %5494 = vtanh.f32 %v1747_v47  ;;  %v4188_v34 = vadd.f32 %v4187_v44, %v3913_v31  ;;  %v1751_v29 = vpop.f32.mrb[85].mxu0  ;;  %v2091_v31 = vadd.f32 %v6778_v12, %v6678_v60  ;;  %3676 = vbcast.lane.b32.xlu1 %v7019_v17, 328 }
 0x1e1   : > { %v5477_v35 = vpop.eup %5476  ;;  %v3318_v32 = vpop.permute.xlu1 %3317  ;;  %v1752_v47 = vadd.f32 %v6778_v12, %v1751_v29  ;;  %5496 = vtanh.f32 %v2088_v52  ;;  %3542 = vbcast.lane.b32.xlu0 %v6975_v11, 328 }
 0x1e2   : > { %v3314_v20 = vpop.permute.xlu0 %3313  ;;  %v7134_v6 = vpop.eup %5478  ;;  %v4110_v16 = vadd.f32 %v4109_v19, %v3845_v2  ;;  %v3846_v8 = vmul.f32 %v5477_v35, %v6461_v37  ;;  %v3916_v39 = vmul.f32 %v6909_v45, %v3318_v32  ;;  %v4189_v0 = vadd.f32 %v4188_v34, %v3914_v55  ;;  %v7947_v32 = vld [vmem:[#allocation9_spill] sm:$0xff] }
 0x1e3   : > { %v3915_v53 = vmul.f32 %v6891_v48, %v3314_v20  ;;  %v7139_v21 = vpop.f32.mrb[85].mxu1  ;;  %v5481_v24 = vpop.eup %5480  ;;  %v7944_v48 = vld [vmem:[#allocation57_spill] sm:$0xff]  ;;  %5498 = vtanh.f32 %v2099_v1  ;;  %v2112_v60 = vadd.f32 %v6778_v12, %v7947_v32 }
 0x1e4   : > { %7942 = vst [vmem:[#allocation46_spill] sm:$0xff] %v7139_v21  ;;  %v4867_v36 = vpop.f32.mrb[86].mxu0  ;;  %v7145_v37 = vpop.f32.mrb[86].mxu1  ;;  %v3847_v14 = vmul.f32 %v5475_v25, %v7944_v48  ;;  %v4111_v30 = vadd.f32 %v4110_v16, %v3846_v8  ;;  %5500 = vtanh.f32 %v1752_v47  ;;  %v7946_v25 = vld [vmem:[#allocation56_spill] sm:$0xff]  ;;  %3680 = vbcast.lane.b32.xlu1 %v7019_v17, 336 }
 0x1e5   : > { %7943 = vst [vmem:[#allocation45_spill] sm:$0xff] %v7145_v37  ;;  %v1754_v56 = vpop.f32.mrb[87].mxu0  ;;  %v7150_v45 = vpop.f32.mrb[87].mxu1  ;;  %v4190_v44 = vadd.f32 %v4189_v0, %v3915_v53  ;;  %v1763_v2 = vadd.f32 %v6778_v12, %v4867_v36  ;;  %v3848_v34 = vmul.f32 %v5481_v24, %v7946_v25  ;;  %5502 = vtanh.f32 %v1760_v38  ;;  %v7948_v0 = vld [vmem:[#allocation59_spill] sm:$0xff]  ;;  %v7950_v48 = vld [vmem:[#allocation20_spill] sm:$0xff]  ;;  %v7953_v25 = vld [vmem:[#allocation58_spill] sm:$0xff] }
 0x1e6   : > { %7945 = vst [vmem:[#allocation49_spill] sm:$0xff] %v7150_v45  ;;  %v7152_v55 = vpop.eup %5482  ;;  %v1755_v52 = vadd.f32 %v6778_v12, %v1754_v56  ;;  %v3326_v19 = vpop.permute.xlu1 %3325  ;;  %v4112_v1 = vadd.f32 %v4111_v30, %v3847_v14  ;;  %v7949_v38 = vsub.s32 7, %v5983_v4  ;;  %3546 = vbcast.lane.b32.xlu0 %v6975_v11, 336 }
 0x1e7   : > { %v3322_v28 = vpop.permute.xlu0 %3321  ;;  %v7156_v35 = vpop.eup %5484  ;;  %v3918_v16 = vmul.f32 %v6958_v9, %v3326_v19  ;;  %v4191_v53 = vadd.f32 %v4190_v44, %v3916_v39 }
 0x1e8   : > { %v5487_v20 = vpop.eup %5486  ;;  %5504 = vtanh.f32 %v1755_v52  ;;  %v3917_v8 = vmul.f32 %v6946_v63, %v3322_v28  ;;  %v4113_v24 = vadd.f32 %v4112_v1, %v3848_v34  ;;  %v4870_v36 = vpop.f32.mrb[88].mxu0  ;;  %v7169_v14 = vrot.slane %v7950_v48, %v7949_v38  ;;  %v7952_v52 = vld [vmem:[#allocation11_spill] sm:$0xff]  ;;  %3684 = vbcast.lane.b32.xlu1 %v7019_v17, 344 }
 0x1e9   : > { %v5489_v29 = vpop.eup %5488  ;;  %v3849_v47 = vmul.f32 %v5487_v20, %v7948_v0  ;;  %5506 = vtanh.f32 %v2091_v31  ;;  %v7171_v30 = vpop.f32.mrb[88].mxu1  ;;  %v4058_v63 = vrot.slane %v7132_v62, 2  ;;  %v2104_v19 = vadd.f32 %v6778_v12, %v7952_v52 }
 0x1ea   : > { %7951 = vst [vmem:[#allocation48_spill] sm:$0xff] %v7171_v30  ;;  %v5491_v9 = vpop.eup %5490  ;;  %5508 = vtanh.f32 %v1763_v2  ;;  %v4192_v39 = vadd.f32 %v4191_v53, %v3917_v8  ;;  %v3334_v56 = vpop.permute.xlu1 %3333  ;;  %v1776_v32 = vadd.f32 %v6778_v12, %v4870_v36  ;;  %v7955_v2 = vld [vmem:[#allocation101_spill] sm:$0xff]  ;;  %3550 = vbcast.lane.b32.xlu0 %v6975_v11, 344 }
 0x1eb   : > { %v3330_v44 = vpop.permute.xlu0 %3329  ;;  %v7176_v28 = vpop.eup %5492  ;;  %v4114_v31 = vadd.f32 %v4113_v24, %v3849_v47  ;;  %v3850_v34 = vmul.f32 %v5491_v9, %v7953_v25  ;;  %v3920_v8 = vmul.f32 %v7955_v2, %v3334_v56  ;;  %5510 = vtanh.f32 %v2112_v60  ;;  %v7957_v36 = vld [vmem:[#allocation61_spill] sm:$0xff]  ;;  %v7958_v25 = vld [vmem:[#allocation44_spill] sm:$0xff] }
 0x1ec   : > { %v3919_v1 = vmul.f32 %v6935_v51, %v3330_v44  ;;  %v1767_v20 = vpop.f32.mrb[89].mxu0  ;;  %v7181_v0 = vpop.f32.mrb[89].mxu1  ;;  %v4193_v53 = vadd.f32 %v4192_v39, %v3918_v16  ;;  %v4093_v51 = vrot.slane %v7011_v23, 4  ;;  %v3851_v9 = vmul.f32 %v5489_v29, %v7957_v36  ;;  %v7960_v29 = vld [vmem:[#allocation60_spill] sm:$0xff]  ;;  %v7205_v36 = vld [vmem:[%s7749_s4] ss:$0 sm:$0xff] }
 0x1ed   : > { %7954 = vst [vmem:[#allocation53_spill] sm:$0xff] %v7181_v0  ;;  %v5495_v38 = vpop.eup %5494  ;;  %v1768_v30 = vadd.f32 %v6778_v12, %v1767_v20  ;;  %v4871_v47 = vpop.f32.mrb[90].mxu0  ;;  %v4115_v44 = vadd.f32 %v4114_v31, %v3850_v34  ;;  %v2115_v56 = vadd.f32 %v6778_v12, %v7958_v25  ;;  %v7961_v25 = vld [vmem:[#allocation10_spill] sm:$0xff]  ;;  %3688 = vbcast.lane.b32.xlu1 %v7019_v17, 352 }
 0x1ee   : > { %v7187_v24 = vpop.f32.mrb[90].mxu1  ;;  %v1770_v52 = vpop.f32.mrb[91].mxu0  ;;  %v4194_v20 = vadd.f32 %v4193_v53, %v3919_v1  ;;  %v1779_v2 = vadd.f32 %v6778_v12, %v4871_v47  ;;  %v3852_v31 = vmul.f32 %v5495_v38, %v7960_v29  ;;  %v7962_v53 = vld [vmem:[#allocation103_spill] sm:$0xff]  ;;  %v4094_v38 = vadd.f32 %v4093_v51, %v7011_v23  ;;  %3554 = vbcast.lane.b32.xlu0 %v6975_v11, 352 }
 0x1ef   : > { %7956 = vst [vmem:[#allocation52_spill] sm:$0xff] %v7187_v24  ;;  %v7193_v16 = vpop.f32.mrb[91].mxu1  ;;  %v7195_v39 = vpop.eup %5496  ;;  %5512 = vtanh.f32 %v1768_v30  ;;  %v1771_v60 = vadd.f32 %v6778_v12, %v1770_v52  ;;  %v4116_v34 = vadd.f32 %v4115_v44, %v3851_v9  ;;  %v2107_v30 = vadd.f32 %v7205_v36, %v7961_v25  ;;  %v7963_v9 = vld [vmem:[#allocation63_spill] sm:$0xff] }
 0x1f0   : > { %7959 = vst [vmem:[#allocation55_spill] sm:$0xff] %v7193_v16  ;;  %v3342_v24 = vpop.permute.xlu1 %3341  ;;  %v3338_v0 = vpop.permute.xlu0 %3337  ;;  %5514 = vtanh.f32 %v1776_v32  ;;  %v4195_v52 = vadd.f32 %v4194_v20, %v3920_v8  ;;  %v7965_v20 = vsub.s32 6, %v5983_v4 }
 0x1f1   : > { %v7199_v37 = vpop.eup %5498  ;;  %5516 = vtanh.f32 %v1771_v60  ;;  %v3922_v12 = vmul.f32 %v7002_v41, %v3342_v24  ;;  %v3921_v47 = vmul.f32 %v7962_v53, %v3338_v0  ;;  %v4117_v29 = vadd.f32 %v4116_v34, %v3852_v31  ;;  %v4874_v16 = vpop.f32.mrb[92].mxu0  ;;  %v7966_v31 = vld [vmem:[#allocation62_spill] sm:$0xff]  ;;  %v7967_v34 = vld [vmem:[#allocation35_spill] sm:$0xff]  ;;  %3692 = vbcast.lane.b32.xlu1 %v7019_v17, 360 }
 0x1f2   : > { %v5501_v1 = vpop.eup %5500  ;;  %5518 = vtanh.f32 %v2104_v19  ;;  %v7215_v25 = vpop.f32.mrb[92].mxu1  ;;  %v7218_v41 = vadd.f32 %v4058_v63, %v7132_v62  ;;  %v7223_v53 = vrot.slane %v7950_v48, %v7965_v20  ;;  %3558 = vbcast.lane.b32.xlu0 %v6975_v11, 360 }
 0x1f3   : > { %v5503_v32 = vpop.eup %5502  ;;  %v3853_v44 = vmul.f32 %v5501_v1, %v7963_v9  ;;  %7964 = vst [vmem:[#allocation54_spill] sm:$0xff] %v7215_v25  ;;  %5520 = vtanh.f32 %v1779_v2  ;;  %v4196_v0 = vadd.f32 %v4195_v52, %v3921_v47  ;;  %v1792_v9 = vadd.f32 %v7205_v36, %v4874_v16  ;;  %v1783_v62 = vpop.f32.mrb[93].mxu0 }
 0x1f4   : > { %v5505_v60 = vpop.eup %5504  ;;  %v3350_v8 = vpop.permute.xlu1 %3349  ;;  %v1784_v4 = vadd.f32 %v7205_v36, %v1783_v62  ;;  %5522 = vtanh.f32 %v2115_v56  ;;  %v7972_v62 = vld [vmem:[#allocation64_spill] sm:$0xff] }
 0x1f5   : > { %v3346_v24 = vpop.permute.xlu0 %3345  ;;  %v7225_v23 = vpop.eup %5506  ;;  %v4118_v51 = vadd.f32 %v4117_v29, %v3853_v44  ;;  %v3854_v19 = vmul.f32 %v5505_v60, %v7966_v31  ;;  %v3924_v47 = vmul.f32 %v6997_v54, %v3350_v8  ;;  %v4197_v52 = vadd.f32 %v4196_v0, %v3922_v12  ;;  %v7970_v60 = vld [vmem:[#allocation65_spill] sm:$0xff]  ;;  %3696 = vbcast.lane.b32.xlu1 %v7019_v17, 368 }
 0x1f6   : > { %v3923_v1 = vmul.f32 %v7967_v34, %v3346_v24  ;;  %v7230_v63 = vpop.f32.mrb[93].mxu1  ;;  %v5509_v2 = vpop.eup %5508  ;;  %v4095_v29 = vrot.slane %v4094_v38, 2  ;;  %v3855_v16 = vmul.f32 %v5503_v32, %v7970_v60  ;;  %5524 = vtanh.f32 %v2107_v30  ;;  %v7973_v32 = vld [vmem:[#allocation12_spill] sm:$0xff]  ;;  %3562 = vbcast.lane.b32.xlu0 %v6975_v11, 368 }
 0x1f7   : > { %7968 = vst [vmem:[#allocation57_spill] sm:$0xff] %v7230_v63  ;;  %v4875_v48 = vpop.f32.mrb[94].mxu0  ;;  %v7236_v44 = vpop.f32.mrb[94].mxu1  ;;  %v4119_v24 = vadd.f32 %v4118_v51, %v3854_v19  ;;  %5526 = vtanh.f32 %v1784_v4  ;;  %v2128_v51 = vadd.f32 %v7205_v36, %v7973_v32  ;;  %v7979_v63 = vld [vmem:[#allocation68_spill] sm:$0xff] }
 0x1f8   : > { %7969 = vst [vmem:[#allocation56_spill] sm:$0xff] %v7236_v44  ;;  %v1786_v20 = vpop.f32.mrb[95].mxu0  ;;  %v7239_v31 = vpop.f32.mrb[95].mxu1  ;;  %v4198_v12 = vadd.f32 %v4197_v52, %v3923_v1  ;;  %v1795_v0 = vadd.f32 %v7205_v36, %v4875_v48  ;;  %v3856_v44 = vmul.f32 %v5509_v2, %v7972_v62  ;;  %5528 = vtanh.f32 %v1792_v9  ;;  %v7974_v2 = vld [vmem:[#allocation67_spill] sm:$0xff]  ;;  %v7976_v62 = vld [vmem:[#allocation66_spill] sm:$0xff] }
 0x1f9   : > { %7971 = vst [vmem:[#allocation9_spill] sm:$0xff] %v7239_v31  ;;  %v7241_v54 = vpop.eup %5510  ;;  %v1787_v8 = vadd.f32 %v7205_v36, %v1786_v20  ;;  %v3358_v34 = vpop.permute.xlu1 %3357  ;;  %v4120_v25 = vadd.f32 %v4119_v24, %v3855_v16  ;;  %v7252_v48 = vadd.f32 %v4095_v29, %v4094_v38  ;;  %v7975_v24 = vld [vmem:[#allocation15_spill] sm:$0xff]  ;;  %3700 = vbcast.lane.b32.xlu1 %v7019_v17, 376 }
 0x1fa   : > { %v3354_v56 = vpop.permute.xlu0 %3353  ;;  %v5513_v30 = vpop.eup %5512  ;;  %v3926_v19 = vmul.f32 %v7058_v15, %v3358_v34  ;;  %v4199_v52 = vadd.f32 %v4198_v12, %v3924_v47  ;;  %v2120_v20 = vadd.f32 %v7205_v36, %v7975_v24  ;;  %3566 = vbcast.lane.b32.xlu0 %v6975_v11, 376 }
 0x1fb   : > { %5530 = vtanh.f32 %v1787_v8  ;;  %v3925_v1 = vmul.f32 %v7040_v22, %v3354_v56  ;;  %v5515_v4 = vpop.eup %5514  ;;  %v3857_v60 = vmul.f32 %v5513_v30, %v7974_v2  ;;  %v4121_v9 = vadd.f32 %v4120_v25, %v3856_v44  ;;  %v4878_v16 = vpop.f32.mrb[96].mxu0 }
 0x1fc   : > { %v7257_v8 = vpop.f32.mrb[96].mxu1  ;;  %v5517_v15 = vpop.eup %5516  ;;  %5532 = vtanh.f32 %v1795_v0  ;;  %v1808_v56 = vadd.f32 %v7205_v36, %v4878_v16  ;;  %v7978_v16 = vld [vmem:[#allocation69_spill] sm:$0xff] }
 0x1fd   : > { %v4200_v47 = vadd.f32 %v4199_v52, %v3925_v1  ;;  %v3366_v12 = vpop.permute.xlu1 %3365  ;;  %v7261_v38 = vpop.eup %5518  ;;  %v4122_v29 = vadd.f32 %v4121_v9, %v3857_v60  ;;  %v3858_v25 = vmul.f32 %v5517_v15, %v7976_v62  ;;  %5534 = vtanh.f32 %v2128_v51  ;;  %v7977_v60 = vld [vmem:[#allocation14_spill] sm:$0xff]  ;;  %3707 = vbcast.lane.b32.xlu1 %v7169_v14, 256 }
 0x1fe   : > { %v3362_v34 = vpop.permute.xlu0 %3361  ;;  %v3928_v44 = vmul.f32 %v7044_v3, %v3366_v12  ;;  %v1799_v30 = vpop.f32.mrb[97].mxu0  ;;  %v2131_v9 = vadd.f32 %v7205_v36, %v7977_v60  ;;  %v3859_v15 = vmul.f32 %v5515_v4, %v7978_v16  ;;  %5536 = vtanh.f32 %v2120_v20  ;;  %v7981_v16 = vld [vmem:[#allocation71_spill] sm:$0xff]  ;;  %3573 = vbcast.lane.b32.xlu0 %v7223_v53, 256 }
 0x1ff   : > { %v3927_v32 = vmul.f32 %v7021_v13, %v3362_v34  ;;  %v7266_v2 = vpop.f32.mrb[97].mxu1  ;;  %v5521_v24 = vpop.eup %5520  ;;  %v4201_v0 = vadd.f32 %v4200_v47, %v3926_v19  ;;  %v1800_v1 = vadd.f32 %v7205_v36, %v1799_v30  ;;  %v4097_v13 = vrot.slane %v7252_v48, 1 }
 0x200   : > { %v4879_v52 = vpop.f32.mrb[98].mxu0  ;;  %v7273_v3 = vpop.f32.mrb[98].mxu1  ;;  %v4123_v12 = vadd.f32 %v4122_v29, %v3858_v25  ;;  %v3860_v61 = vmul.f32 %v5521_v24, %v7979_v63 }
 0x201   : > { %v1802_v34 = vpop.f32.mrb[99].mxu0  ;;  %v7277_v19 = vpop.f32.mrb[99].mxu1  ;;  %v4202_v62 = vadd.f32 %v4201_v0, %v3927_v32  ;;  %5538 = vtanh.f32 %v1800_v1  ;;  %v1811_v51 = vadd.f32 %v7205_v36, %v4879_v52  ;;  %v7980_v0 = vld [vmem:[#allocation17_spill] sm:$0xff]  ;;  %3711 = vbcast.lane.b32.xlu1 %v7169_v14, 264 }
 0x202   : > { %v7279_v47 = vpop.eup %5522  ;;  %v1803_v30 = vadd.f32 %v7205_v36, %v1802_v34  ;;  %v3377_v60 = vpop.permute.xlu1 %3376  ;;  %v4124_v4 = vadd.f32 %v4123_v12, %v3859_v15  ;;  %5540 = vtanh.f32 %v1808_v56  ;;  %v2123_v1 = vadd.f32 %v7205_v36, %v7980_v0  ;;  %v7983_v0 = vld [vmem:[#allocation70_spill] sm:$0xff]  ;;  %3577 = vbcast.lane.b32.xlu0 %v7223_v53, 264 }
 0x203   : > { %v3373_v22 = vpop.permute.xlu0 %3372  ;;  %v7283_v31 = vpop.eup %5524  ;;  %v3930_v20 = vmul.f32 %v7113_v7, %v3377_v60  ;;  %v7287_v25 = vadd.f32 %v4202_v62, %v3928_v44  ;;  %v7982_v7 = vld [vmem:[#allocation16_spill] sm:$0xff] }
 0x204   : > { %v5527_v29 = vpop.eup %5526  ;;  %5542 = vtanh.f32 %v1803_v30  ;;  %v3929_v32 = vmul.f32 %v7080_v42, %v3373_v22  ;;  %v4125_v24 = vadd.f32 %v4124_v4, %v3860_v61  ;;  %v4882_v56 = vpop.f32.mrb[100].mxu0  ;;  %v2144_v44 = vadd.f32 %v7205_v36, %v7982_v7 }
 0x205   : > { %v5529_v52 = vpop.eup %5528  ;;  %v3861_v63 = vmul.f32 %v5527_v29, %v7981_v16  ;;  %5544 = vtanh.f32 %v2131_v9  ;;  %v7297_v15 = vpop.f32.mrb[100].mxu1  ;;  %v4098_v42 = vadd.f32 %v4097_v13, %v7252_v48  ;;  %v1824_v30 = vadd.f32 %v7205_v36, %v4882_v56  ;;  %3715 = vbcast.lane.b32.xlu1 %v7169_v14, 272 }
 0x206   : > { %v5531_v12 = vpop.eup %5530  ;;  %5546 = vtanh.f32 %v1811_v51  ;;  %v4210_v22 = vadd.f32 %v3930_v20, %v3929_v32  ;;  %v3385_v34 = vpop.permute.xlu1 %3384  ;;  %v7984_v48 = vrot.slane %v7218_v41, 1  ;;  %v7985_v32 = vld [vmem:[#allocation18_spill] sm:$0xff]  ;;  %3581 = vbcast.lane.b32.xlu0 %v7223_v53, 272 }
 0x207   : > { %v3381_v62 = vpop.permute.xlu0 %3380  ;;  %v4126_v60 = vadd.f32 %v4125_v24, %v3861_v63  ;;  %v3862_v29 = vmul.f32 %v5531_v12, %v7983_v0  ;;  %v3932_v61 = vmul.f32 %v7096_v46, %v3385_v34  ;;  %v1815_v4 = vpop.f32.mrb[101].mxu0  ;;  %5548 = vtanh.f32 %v2123_v1  ;;  %v7986_v63 = vld [vmem:[#allocation73_spill] sm:$0xff] }
 0x208   : > { %v3931_v9 = vmul.f32 %v7076_v49, %v3381_v62  ;;  %v7304_v16 = vpop.f32.mrb[101].mxu1  ;;  %v5533_v7 = vpop.eup %5532  ;;  %v4061_v13 = vadd.f32 %v7984_v48, %v7218_v41  ;;  %v1816_v51 = vadd.f32 %v7205_v36, %v1815_v4  ;;  %v2136_v46 = vadd.f32 %v7205_v36, %v7985_v32 }
 0x209   : > { %v4883_v20 = vpop.f32.mrb[102].mxu0  ;;  %v7314_v49 = vpop.f32.mrb[102].mxu1  ;;  %v3863_v24 = vmul.f32 %v5529_v52, %v7986_v63  ;;  %v4127_v56 = vadd.f32 %v4126_v60, %v3862_v29  ;;  %5550 = vtanh.f32 %v2144_v44  ;;  %v7987_v52 = vld [vmem:[#allocation72_spill] sm:$0xff]  ;;  %3719 = vbcast.lane.b32.xlu1 %v7169_v14, 280 }
 0x20a   : > { %v4211_v12 = vadd.f32 %v4210_v22, %v3931_v9  ;;  %v1818_v34 = vpop.f32.mrb[103].mxu0  ;;  %v7317_v41 = vpop.f32.mrb[103].mxu1  ;;  %5552 = vtanh.f32 %v1816_v51  ;;  %v1827_v0 = vadd.f32 %v7205_v36, %v4883_v20  ;;  %v7324_v32 = vsel %vm4329_vm1, %v4098_v42, %v4061_v13  ;;  %v7988_v20 = vld [vmem:[#allocation87_spill] sm:$0xff]  ;;  %3585 = vbcast.lane.b32.xlu0 %v7223_v53, 280 }
 0x20b   : > { %v7319_v62 = vpop.eup %5534  ;;  %v1819_v1 = vadd.f32 %v7205_v36, %v1818_v34  ;;  %v3393_v4 = vpop.permute.xlu1 %3392  ;;  %v3864_v22 = vmul.f32 %v5533_v7, %v7987_v52  ;;  %v4128_v60 = vadd.f32 %v4127_v56, %v3863_v24  ;;  %5554 = vtanh.f32 %v1824_v30 }
 0x20c   : > { %v3389_v48 = vpop.permute.xlu0 %3388  ;;  %v7326_v45 = vpop.eup %5536  ;;  %v3934_v44 = vmul.f32 %v7156_v35, %v3393_v4  ;;  %v4212_v51 = vadd.f32 %v4211_v12, %v3932_v61  ;;  %v2147_v42 = vadd.f32 %v7205_v36, %v7988_v20  ;;  %v7989_v35 = vld [vmem:[#allocation75_spill] sm:$0xff] }
 0x20d   : > { %v5539_v29 = vpop.eup %5538  ;;  %5556 = vtanh.f32 %v1819_v1  ;;  %v3933_v9 = vmul.f32 %v7134_v6, %v3389_v48  ;;  %v4129_v63 = vadd.f32 %v4128_v60, %v3864_v22  ;;  %v4886_v34 = vpop.f32.mrb[104].mxu0  ;;  %v7990_v1 = vld [vmem:[#allocation74_spill] sm:$0xff]  ;;  %3723 = vbcast.lane.b32.xlu1 %v7169_v14, 288 }
 0x20e   : > { %v5541_v13 = vpop.eup %5540  ;;  %5558 = vtanh.f32 %v2136_v46  ;;  %v7335_v7 = vpop.f32.mrb[104].mxu1  ;;  %v3865_v24 = vmul.f32 %v5539_v29, %v7989_v35  ;;  %v1840_v17 = vadd.f32 %v7205_v36, %v4886_v34  ;;  %3589 = vbcast.lane.b32.xlu0 %v7223_v53, 288 }
 0x20f   : > { %v5543_v30 = vpop.eup %5542  ;;  %5560 = vtanh.f32 %v1827_v0  ;;  %v4213_v56 = vadd.f32 %v4212_v51, %v3933_v9  ;;  %v3401_v6 = vpop.permute.xlu1 %3400  ;;  %v4130_v11 = vrot.slane %v4129_v63, 4  ;;  %v7991_v51 = vld [vmem:[#allocation21_spill] sm:$0xff] }
 0x210   : > { %v3397_v61 = vpop.permute.xlu0 %3396  ;;  %v7339_v12 = vpop.eup %5544  ;;  %v3866_v4 = vmul.f32 %v5543_v30, %v7990_v1  ;;  %v3936_v48 = vmul.f32 %v7152_v55, %v3401_v6  ;;  %5562 = vtanh.f32 %v2147_v42  ;;  %v2139_v20 = vadd.f32 %v7205_v36, %v7991_v51 }
 0x211   : > { %v3935_v46 = vmul.f32 %v7117_v27, %v3397_v61  ;;  %v1831_v52 = vpop.f32.mrb[105].mxu0  ;;  %v7344_v22 = vpop.f32.mrb[105].mxu1  ;;  %v4214_v29 = vadd.f32 %v4213_v56, %v3934_v44  ;;  %v4131_v55 = vadd.f32 %v4130_v11, %v4129_v63  ;;  %v7992_v27 = vld [vmem:[#allocation77_spill] sm:$0xff]  ;;  %v7993_v61 = vld [vmem:[#allocation23_spill] sm:$0xff]  ;;  %3727 = vbcast.lane.b32.xlu1 %v7169_v14, 296 }
 0x212   : > { %v5547_v60 = vpop.eup %5546  ;;  %v1832_v0 = vadd.f32 %v7205_v36, %v1831_v52  ;;  %v4887_v9 = vpop.f32.mrb[106].mxu0  ;;  %v3867_v30 = vmul.f32 %v5541_v13, %v7992_v27  ;;  %v4136_v35 = vadd.f32 %v3866_v4, %v3865_v24  ;;  %v2160_v44 = vadd.f32 %v7205_v36, %v7993_v61  ;;  %v7994_v24 = vld [vmem:[#allocation76_spill] sm:$0xff]  ;;  %3593 = vbcast.lane.b32.xlu0 %v7223_v53, 296 }
 0x213   : > { %v7351_v34 = vpop.f32.mrb[106].mxu1  ;;  %v1834_v6 = vpop.f32.mrb[107].mxu0  ;;  %v4215_v52 = vadd.f32 %v4214_v29, %v3935_v46  ;;  %v1843_v42 = vadd.f32 %v7205_v36, %v4887_v9  ;;  %v4132_v13 = vrot.slane %v4131_v55, 2  ;;  %v3868_v4 = vmul.f32 %v5547_v60, %v7994_v24 }
 0x214   : > { %v7356_v56 = vpop.f32.mrb[107].mxu1  ;;  %v7358_v1 = vpop.eup %5548  ;;  %5564 = vtanh.f32 %v1832_v0  ;;  %v1835_v51 = vadd.f32 %v7205_v36, %v1834_v6  ;;  %v4137_v27 = vadd.f32 %v4136_v35, %v3867_v30  ;;  %v7995_v6 = vld [vmem:[#allocation79_spill] sm:$0xff] }
 0x215   : > { %v3409_v21 = vpop.permute.xlu1 %3408  ;;  %v3405_v63 = vpop.permute.xlu0 %3404  ;;  %5566 = vtanh.f32 %v1840_v17  ;;  %v4216_v29 = vadd.f32 %v4215_v52, %v3936_v48  ;;  %v4133_v9 = vadd.f32 %v4132_v13, %v4131_v55  ;;  %v7997_v13 = vld [vmem:[#allocation78_spill] sm:$0xff]  ;;  %3731 = vbcast.lane.b32.xlu1 %v7169_v14, 304 }
 0x216   : > { %v7362_v11 = vpop.eup %5550  ;;  %5568 = vtanh.f32 %v1835_v51  ;;  %v3938_v10 = vmul.f32 %v7225_v23, %v3409_v21  ;;  %v3937_v46 = vmul.f32 %v7195_v39, %v3405_v63  ;;  %v4138_v18 = vadd.f32 %v4137_v27, %v3868_v4  ;;  %v4890_v60 = vpop.f32.mrb[108].mxu0  ;;  %v7996_v21 = vld [vmem:[#allocation22_spill] sm:$0xff]  ;;  %3597 = vbcast.lane.b32.xlu0 %v7223_v53, 304 }
 0x217   : > { %v5553_v61 = vpop.eup %5552  ;;  %5570 = vtanh.f32 %v2139_v20  ;;  %v7370_v30 = vpop.f32.mrb[108].mxu1  ;;  %v2152_v39 = vadd.f32 %v7205_v36, %v7996_v21  ;;  %v1856_v52 = vadd.f32 %v7205_v36, %v4890_v60  ;;  %v4134_v55 = vrot.slane %v4133_v9, 1  ;;  %v7999_v60 = vld [vmem:[#allocation81_spill] sm:$0xff]  ;;  %v8000_v21 = vld [vmem:[#allocation92_spill] sm:$0xff] }
 0x218   : > { %v5555_v0 = vpop.eup %5554  ;;  %v3869_v58 = vmul.f32 %v5553_v61, %v7995_v6  ;;  %5572 = vtanh.f32 %v1843_v42  ;;  %v4217_v35 = vadd.f32 %v4216_v29, %v3937_v46  ;;  %v1847_v4 = vpop.f32.mrb[109].mxu0 }
 0x219   : > { %v5557_v17 = vpop.eup %5556  ;;  %v3417_v23 = vpop.permute.xlu1 %3416  ;;  %5574 = vtanh.f32 %v2160_v44  ;;  %v1848_v29 = vadd.f32 %v7205_v36, %v1847_v4  ;;  %3735 = vbcast.lane.b32.xlu1 %v7169_v14, 312 }
 0x21a   : > { %v3413_v48 = vpop.permute.xlu0 %3412  ;;  %v7375_v51 = vpop.eup %5558  ;;  %v4139_v63 = vadd.f32 %v4138_v18, %v3869_v58  ;;  %v3870_v24 = vmul.f32 %v5557_v17, %v7997_v13  ;;  %v3940_v20 = vmul.f32 %v7199_v37, %v3417_v23  ;;  %v4218_v46 = vadd.f32 %v4217_v35, %v3938_v10  ;;  %3601 = vbcast.lane.b32.xlu0 %v7223_v53, 312 }
 0x21b   : > { %v7379_v27 = vpop.f32.mrb[109].mxu1  ;;  %v5561_v42 = vpop.eup %5560  ;;  %v3939_v61 = vmul.f32 %v7176_v28, %v3413_v48  ;;  %v4135_v58 = vadd.f32 %v4134_v55, %v4133_v9  ;;  %v3871_v37 = vmul.f32 %v5555_v0, %v7999_v60  ;;  %v2163_v23 = vadd.f32 %v7205_v36, %v8000_v21  ;;  %v8001_v9 = vld [vmem:[#allocation80_spill] sm:$0xff] }
 0x21c   : > { %v4891_v6 = vpop.f32.mrb[110].mxu0  ;;  %v7385_v18 = vpop.f32.mrb[110].mxu1  ;;  %v4140_v17 = vadd.f32 %v4139_v63, %v3870_v24  ;;  %5576 = vtanh.f32 %v1848_v29  ;;  %v3872_v55 = vmul.f32 %v5561_v42, %v8001_v9  ;;  %v8002_v29 = vld [vmem:[#allocation83_spill] sm:$0xff] }
 0x21d   : > { %7998 = vst [vmem:[#allocation59_spill] sm:$0xff] %v7385_v18  ;;  %v1850_v44 = vpop.f32.mrb[111].mxu0  ;;  %v7390_v13 = vpop.f32.mrb[111].mxu1  ;;  %v4219_v28 = vadd.f32 %v4218_v46, %v3939_v61  ;;  %v1859_v35 = vadd.f32 %v7205_v36, %v4891_v6  ;;  %5578 = vtanh.f32 %v1856_v52  ;;  %v7403_v61 = vsel %vm4331_vm2, %v4135_v58, %v7324_v32  ;;  %v8003_v52 = vld [vmem:[#allocation25_spill] sm:$0xff]  ;;  %3739 = vbcast.lane.b32.xlu1 %v7169_v14, 320 }
 0x21e   : > { %v7392_v10 = vpop.eup %5562  ;;  %v1851_v48 = vadd.f32 %v7205_v36, %v1850_v44  ;;  %v3425_v4 = vpop.permute.xlu1 %3424  ;;  %v4141_v0 = vadd.f32 %v4140_v17, %v3871_v37  ;;  %3605 = vbcast.lane.b32.xlu0 %v7223_v53, 320 }
 0x21f   : > { %v3421_v18 = vpop.permute.xlu0 %3420  ;;  %v3942_v63 = vmul.f32 %v7283_v31, %v3425_v4  ;;  %v5565_v24 = vpop.eup %5564  ;;  %v4220_v21 = vadd.f32 %v4219_v28, %v3940_v20  ;;  %v2155_v31 = vadd.f32 %v7205_v36, %v8003_v52 }
 0x220   : > { %5580 = vtanh.f32 %v1851_v48  ;;  %v3941_v60 = vmul.f32 %v7261_v38, %v3421_v18  ;;  %v5567_v46 = vpop.eup %5566  ;;  %v3873_v42 = vmul.f32 %v5565_v24, %v8002_v29  ;;  %v4142_v6 = vadd.f32 %v4141_v0, %v3872_v55  ;;  %v4894_v37 = vpop.f32.mrb[112].mxu0  ;;  %v8004_v48 = vld [vmem:[#allocation82_spill] sm:$0xff] }
 0x221   : > { %5582 = vtanh.f32 %v2152_v39  ;;  %v7408_v17 = vpop.f32.mrb[112].mxu1  ;;  %v5569_v38 = vpop.eup %5568  ;;  %v1872_v28 = vadd.f32 %v7205_v36, %v4894_v37  ;;  %3743 = vbcast.lane.b32.xlu1 %v7169_v14, 328 }
 0x222   : > { %5584 = vtanh.f32 %v1859_v35  ;;  %v4221_v20 = vadd.f32 %v4220_v21, %v3941_v60  ;;  %v3433_v18 = vpop.permute.xlu1 %3432  ;;  %v7411_v32 = vpop.eup %5570  ;;  %v4143_v58 = vadd.f32 %v4142_v6, %v3873_v42  ;;  %v3874_v4 = vmul.f32 %v5569_v38, %v8004_v48  ;;  %v8005_v42 = vld [vmem:[#allocation43_spill] sm:$0xff]  ;;  %3609 = vbcast.lane.b32.xlu0 %v7223_v53, 328 }
 0x223   : > { %v3429_v44 = vpop.permute.xlu0 %3428  ;;  %v3944_v39 = vmul.f32 %v7279_v47, %v3433_v18  ;;  %v1863_v55 = vpop.f32.mrb[113].mxu0  ;;  %5586 = vtanh.f32 %v2163_v23  ;;  %v3875_v6 = vmul.f32 %v5567_v46, %v8005_v42  ;;  %v8008_v42 = vld [vmem:[#allocation26_spill] sm:$0xff] }
 0x224   : > { %v3943_v9 = vmul.f32 %v7241_v54, %v3429_v44  ;;  %v7416_v0 = vpop.f32.mrb[113].mxu1  ;;  %v5573_v24 = vpop.eup %5572  ;;  %v4222_v35 = vadd.f32 %v4221_v20, %v3942_v63  ;;  %v1864_v60 = vadd.f32 %v7205_v36, %v1863_v55  ;;  %v4144_v47 = vadd.f32 %v4143_v58, %v3874_v4  ;;  %v8006_v54 = vld [vmem:[#allocation24_spill] sm:$0xff]  ;;  %v8007_v55 = vld [vmem:[#allocation42_spill] sm:$0xff] }
 0x225   : > { %v4895_v21 = vpop.f32.mrb[114].mxu0  ;;  %v7421_v29 = vpop.f32.mrb[114].mxu1  ;;  %5588 = vtanh.f32 %v2155_v31  ;;  %v2176_v52 = vadd.f32 %v7205_v36, %v8006_v54  ;;  %v3876_v46 = vmul.f32 %v5573_v24, %v8007_v55  ;;  %v2168_v54 = vadd.f32 %v7205_v36, %v8008_v42  ;;  %3747 = vbcast.lane.b32.xlu1 %v7169_v14, 336 }
 0x226   : > { %v1866_v37 = vpop.f32.mrb[115].mxu0  ;;  %v7426_v38 = vpop.f32.mrb[115].mxu1  ;;  %v4223_v63 = vadd.f32 %v4222_v35, %v3943_v9  ;;  %5590 = vtanh.f32 %v1864_v60  ;;  %v1875_v20 = vadd.f32 %v7205_v36, %v4895_v21  ;;  %v4145_v58 = vadd.f32 %v4144_v47, %v3875_v6  ;;  %v8009_v21 = vld [vmem:[#allocation47_spill] sm:$0xff]  ;;  %3613 = vbcast.lane.b32.xlu0 %v7223_v53, 336 }
 0x227   : > { %v7428_v23 = vpop.eup %5574  ;;  %v1867_v18 = vadd.f32 %v7205_v36, %v1866_v37  ;;  %v3444_v44 = vpop.permute.xlu1 %3443  ;;  %5592 = vtanh.f32 %v1872_v28  ;;  %v8010_v28 = vld [vmem:[#allocation96_spill] sm:$0xff] }
 0x228   : > { %v3440_v48 = vpop.permute.xlu0 %3439  ;;  %v3946_v31 = vmul.f32 %v7358_v1, %v3444_v44  ;;  %v5577_v4 = vpop.eup %5576  ;;  %v4224_v35 = vadd.f32 %v4223_v63, %v3944_v39  ;;  %v4146_v6 = vadd.f32 %v4145_v58, %v3876_v46  ;;  %v2179_v1 = vadd.f32 %v7205_v36, %v8010_v28 }
 0x229   : > { %5594 = vtanh.f32 %v1867_v18  ;;  %v3945_v9 = vmul.f32 %v7326_v45, %v3440_v48  ;;  %v5579_v60 = vpop.eup %5578  ;;  %v3877_v24 = vmul.f32 %v5577_v4, %v8009_v21  ;;  %v4898_v47 = vpop.f32.mrb[116].mxu0  ;;  %3751 = vbcast.lane.b32.xlu1 %v7169_v14, 344 }
 0x22a   : > { %5596 = vtanh.f32 %v2176_v52  ;;  %v7442_v37 = vpop.f32.mrb[116].mxu1  ;;  %v5581_v44 = vpop.eup %5580  ;;  %v1888_v63 = vadd.f32 %v7205_v36, %v4898_v47  ;;  %v8012_v52 = vld [vmem:[#allocation13_spill] sm:$0xff]  ;;  %3617 = vbcast.lane.b32.xlu0 %v7223_v53, 344 }
 0x22b   : > { %8011 = vst [vmem:[#allocation20_spill] sm:$0xff] %v7442_v37  ;;  %5598 = vtanh.f32 %v1875_v20  ;;  %v4225_v18 = vadd.f32 %v4224_v35, %v3945_v9  ;;  %v3452_v45 = vpop.permute.xlu1 %3451  ;;  %v7445_v48 = vpop.eup %5582  ;;  %v4147_v55 = vadd.f32 %v4146_v6, %v3877_v24  ;;  %v3878_v42 = vmul.f32 %v5581_v44, %v8012_v52  ;;  %v8014_v6 = vld [vmem:[#allocation51_spill] sm:$0xff] }
 0x22c   : > { %v3448_v39 = vpop.permute.xlu0 %3447  ;;  %v3948_v46 = vmul.f32 %v7339_v12, %v3452_v45  ;;  %v1879_v4 = vpop.f32.mrb[117].mxu0  ;;  %5600 = vtanh.f32 %v2168_v54  ;;  %v3879_v47 = vmul.f32 %v5579_v60, %v8014_v6  ;;  %v8017_v60 = vld [vmem:[#allocation50_spill] sm:$0xff] }
 0x22d   : > { %v3947_v58 = vmul.f32 %v7319_v62, %v3448_v39  ;;  %v7450_v21 = vpop.f32.mrb[117].mxu1  ;;  %v5585_v28 = vpop.eup %5584  ;;  %v4226_v20 = vadd.f32 %v4225_v18, %v3946_v31  ;;  %v1880_v9 = vadd.f32 %v7205_v36, %v1879_v4  ;;  %5602 = vtanh.f32 %v2179_v1  ;;  %v8015_v62 = vld [vmem:[#allocation29_spill] sm:$0xff]  ;;  %3755 = vbcast.lane.b32.xlu1 %v7169_v14, 352 }
 0x22e   : > { %v4899_v35 = vpop.f32.mrb[118].mxu0  ;;  %v7455_v24 = vpop.f32.mrb[118].mxu1  ;;  %v4148_v12 = vadd.f32 %v4147_v55, %v3878_v42  ;;  %v2171_v44 = vadd.f32 %v7205_v36, %v8015_v62  ;;  %v3880_v1 = vmul.f32 %v5585_v28, %v8017_v60  ;;  %v8018_v62 = vld [vmem:[#allocation28_spill] sm:$0xff]  ;;  %3621 = vbcast.lane.b32.xlu0 %v7223_v53, 352 }
 0x22f   : > { %8013 = vst [vmem:[#allocation11_spill] sm:$0xff] %v7455_v24  ;;  %v1882_v45 = vpop.f32.mrb[119].mxu0  ;;  %v7460_v39 = vpop.f32.mrb[119].mxu1  ;;  %v4227_v54 = vadd.f32 %v4226_v20, %v3947_v58  ;;  %5604 = vtanh.f32 %v1880_v9  ;;  %v1891_v18 = vadd.f32 %v7205_v36, %v4899_v35  ;;  %v8019_v35 = vld [vmem:[#allocation30_spill] sm:$0xff] }
 0x230   : > { %8016 = vst [vmem:[#allocation58_spill] sm:$0xff] %v7460_v39  ;;  %v7462_v31 = vpop.eup %5586  ;;  %v1883_v52 = vadd.f32 %v7205_v36, %v1882_v45  ;;  %v3460_v4 = vpop.permute.xlu1 %3459  ;;  %v4149_v55 = vadd.f32 %v4148_v12, %v3879_v47  ;;  %5606 = vtanh.f32 %v1888_v63  ;;  %v2192_v39 = vadd.f32 %v7205_v36, %v8018_v62  ;;  %v8020_v63 = vld [vmem:[#allocation85_spill] sm:$0xff] }
 0x231   : > { %v3456_v24 = vpop.permute.xlu0 %3455  ;;  %v5589_v37 = vpop.eup %5588  ;;  %v3950_v42 = vmul.f32 %v7411_v32, %v3460_v4  ;;  %v4228_v20 = vadd.f32 %v4227_v54, %v3948_v46  ;;  %v2184_v28 = vadd.f32 %v7205_v36, %v8019_v35  ;;  %3759 = vbcast.lane.b32.xlu1 %v7169_v14, 360 }
 0x232   : > { %v5591_v6 = vpop.eup %5590  ;;  %5608 = vtanh.f32 %v1883_v52  ;;  %v3949_v58 = vmul.f32 %v7375_v51, %v3456_v24  ;;  %v4150_v32 = vadd.f32 %v4149_v55, %v3880_v1  ;;  %v4902_v12 = vpop.f32.mrb[120].mxu0  ;;  %3625 = vbcast.lane.b32.xlu0 %v7223_v53, 360 }
 0x233   : > { %v5593_v9 = vpop.eup %5592  ;;  %5610 = vtanh.f32 %v2171_v44  ;;  %v3881_v47 = vmul.f32 %v5591_v6, %v8020_v63  ;;  %v7476_v45 = vpop.f32.mrb[120].mxu1  ;;  %v1904_v24 = vadd.f32 %v7205_v36, %v4902_v12  ;;  %v8022_v44 = vld [vmem:[#allocation84_spill] sm:$0xff] }
 0x234   : > { %8021 = vst [vmem:[#allocation101_spill] sm:$0xff] %v7476_v45  ;;  %v5595_v4 = vpop.eup %5594  ;;  %5612 = vtanh.f32 %v1891_v18  ;;  %v4229_v52 = vadd.f32 %v4228_v20, %v3949_v58  ;;  %v3468_v51 = vpop.permute.xlu1 %3467  ;;  %v8027_v45 = vld [vmem:[#allocation19_spill] sm:$0xff] }
 0x235   : > { %v3464_v46 = vpop.permute.xlu0 %3463  ;;  %v7479_v54 = vpop.eup %5596  ;;  %v4151_v60 = vadd.f32 %v4150_v32, %v3881_v47  ;;  %v3882_v62 = vmul.f32 %v5595_v4, %v8022_v44  ;;  %v3952_v35 = vmul.f32 %v7392_v10, %v3468_v51  ;;  %5614 = vtanh.f32 %v2192_v39  ;;  %v8025_v32 = vld [vmem:[#allocation33_spill] sm:$0xff]  ;;  %3763 = vbcast.lane.b32.xlu1 %v7169_v14, 368 }
 0x236   : > { %v3951_v6 = vmul.f32 %v7362_v11, %v3464_v46  ;;  %v1895_v1 = vpop.f32.mrb[121].mxu0  ;;  %v7484_v55 = vpop.f32.mrb[121].mxu1  ;;  %v4230_v18 = vadd.f32 %v4229_v52, %v3950_v42  ;;  %5616 = vtanh.f32 %v2184_v28  ;;  %v2187_v10 = vadd.f32 %v7205_v36, %v8025_v32  ;;  %v8026_v11 = vld [vmem:[#allocation86_spill] sm:$0xff]  ;;  %3629 = vbcast.lane.b32.xlu0 %v7223_v53, 368 }
 0x237   : > { %8023 = vst [vmem:[#allocation61_spill] sm:$0xff] %v7484_v55  ;;  %v5599_v63 = vpop.eup %5598  ;;  %v1896_v58 = vadd.f32 %v7205_v36, %v1895_v1  ;;  %v4903_v20 = vpop.f32.mrb[122].mxu0  ;;  %v3883_v12 = vmul.f32 %v5593_v9, %v8026_v11  ;;  %v4152_v4 = vadd.f32 %v4151_v60, %v3882_v62  ;;  %v8028_v62 = vld [vmem:[#allocation100_spill] sm:$0xff] }
 0x238   : > { %v7489_v47 = vpop.f32.mrb[122].mxu1  ;;  %v1898_v51 = vpop.f32.mrb[123].mxu0  ;;  %v4231_v42 = vadd.f32 %v4230_v18, %v3951_v6  ;;  %v1907_v52 = vadd.f32 %v7205_v36, %v4903_v20  ;;  %v3884_v32 = vmul.f32 %v5599_v63, %v8027_v45  ;;  %v2195_v11 = vadd.f32 %v7205_v36, %v8028_v62  ;;  %v8029_v20 = vld [vmem:[#allocation89_spill] sm:$0xff] }
 0x239   : > { %8024 = vst [vmem:[#allocation44_spill] sm:$0xff] %v7489_v47  ;;  %v7494_v46 = vpop.f32.mrb[123].mxu1  ;;  %v7496_v39 = vpop.eup %5600  ;;  %5618 = vtanh.f32 %v1896_v58  ;;  %v1899_v44 = vadd.f32 %v7205_v36, %v1898_v51  ;;  %v4153_v55 = vadd.f32 %v4152_v4, %v3883_v12  ;;  %3767 = vbcast.lane.b32.xlu1 %v7169_v14, 376 }
 0x23a   : > { %v3476_v1 = vpop.permute.xlu1 %3475  ;;  %v3472_v47 = vpop.permute.xlu0 %3471  ;;  %5620 = vtanh.f32 %v1904_v24  ;;  %v4232_v18 = vadd.f32 %v4231_v42, %v3952_v35  ;;  %3633 = vbcast.lane.b32.xlu0 %v7223_v53, 376 }
 0x23b   : > { %v7500_v28 = vpop.eup %5602  ;;  %v3954_v9 = vmul.f32 %v5589_v37, %v3476_v1  ;;  %5622 = vtanh.f32 %v1899_v44  ;;  %v3953_v6 = vmul.f32 %v7445_v48, %v3472_v47  ;;  %v4154_v45 = vadd.f32 %v4153_v55, %v3884_v32  ;;  %v4906_v63 = vpop.f32.mrb[124].mxu0  ;;  %v8030_v1 = vld [vmem:[#allocation88_spill] sm:$0xff] }
 0x23c   : > { %v5605_v60 = vpop.eup %5604  ;;  %5624 = vtanh.f32 %v2187_v10  ;;  %v2312_v37 = vadd.f32 %v7205_v36, %v7266_v2  ;;  %v7511_v24 = vpop.f32.mrb[124].mxu1  ;;  %v1920_v47 = vadd.f32 %v7205_v36, %v4906_v63 }
 0x23d   : > { %v5607_v58 = vpop.eup %5606  ;;  %v3885_v51 = vmul.f32 %v5605_v60, %v8029_v20  ;;  %5626 = vtanh.f32 %v1907_v52  ;;  %v4233_v4 = vadd.f32 %v4232_v18, %v3953_v6  ;;  %v1911_v32 = vpop.f32.mrb[125].mxu0 }
 0x23e   : > { %v5609_v12 = vpop.eup %5608  ;;  %v3484_v48 = vpop.permute.xlu1 %3483  ;;  %5628 = vtanh.f32 %v2195_v11  ;;  %v1912_v52 = vadd.f32 %v7205_v36, %v1911_v32 }
 0x23f   : > { %v3480_v35 = vpop.permute.xlu0 %3479  ;;  %v5611_v42 = vpop.eup %5610  ;;  %v4155_v44 = vadd.f32 %v4154_v45, %v3885_v51  ;;  %v3886_v10 = vmul.f32 %v5609_v12, %v8030_v1  ;;  %v3956_v60 = vmul.f32 %v7462_v31, %v3484_v48  ;;  %v4234_v20 = vadd.f32 %v4233_v4, %v3954_v9  ;;  %v8032_v51 = vld [vmem:[#allocation91_spill] sm:$0xff] }
 0x240   : > { %v3955_v55 = vmul.f32 %v7428_v23, %v3480_v35  ;;  %v7517_v62 = vpop.f32.mrb[125].mxu1  ;;  %v5613_v2 = vpop.eup %5612  ;;  %v3887_v45 = vmul.f32 %v5607_v58, %v8032_v51  ;;  %5630 = vtanh.f32 %v2312_v37  ;;  %v2315_v1 = vadd.f32 %v7205_v36, %v7277_v19  ;;  %v8033_v58 = vld [vmem:[#allocation90_spill] sm:$0xff] }
 0x241   : > { %v4907_v6 = vpop.f32.mrb[126].mxu0  ;;  %v7522_v18 = vpop.f32.mrb[126].mxu1  ;;  %v4156_v31 = vadd.f32 %v4155_v44, %v3886_v10  ;;  %5632 = vtanh.f32 %v1912_v52  ;;  %v3888_v44 = vmul.f32 %v5613_v2, %v8033_v58  ;;  %v2320_v19 = vadd.f32 %v7205_v36, %v7257_v8  ;;  %v8036_v58 = vld [vmem:[#allocation34_spill] sm:$0xff] }
 0x242   : > { %8031 = vst [vmem:[#allocation60_spill] sm:$0xff] %v7522_v18  ;;  %v1923_v23 = vadd.f32 %v7205_v36, %v4907_v6  ;;  %v1914_v63 = vpop.f32.mrb[127].mxu0  ;;  %v7526_v12 = vpop.f32.mrb[127].mxu1  ;;  %v4235_v9 = vadd.f32 %v4234_v20, %v3955_v55  ;;  %5634 = vtanh.f32 %v1920_v47  ;;  %v8034_v20 = vld [vmem:[#allocation94_spill] sm:$0xff]  ;;  %v2200_v8 = vadd.f32 %v7205_v36, %v8036_v58 }
 0x243   : > { %v7528_v11 = vpop.eup %5614  ;;  %v1915_v4 = vadd.f32 %v7205_v36, %v1914_v63  ;;  %v3492_v48 = vpop.permute.xlu1 %3491  ;;  %v4157_v10 = vadd.f32 %v4156_v31, %v3887_v45 }
 0x244   : > { %v3488_v35 = vpop.permute.xlu0 %3487  ;;  %v5617_v32 = vpop.eup %5616  ;;  %v3958_v6 = vmul.f32 %v5611_v42, %v3492_v48  ;;  %v4236_v18 = vadd.f32 %v4235_v9, %v3956_v60  ;;  %v2323_v42 = vadd.f32 %v7205_v36, %v7273_v3  ;;  %v8035_v9 = vld [vmem:[#allocation93_spill] sm:$0xff]  ;;  %v8037_v3 = vld [vmem:[#allocation95_spill] sm:$0xff] }
 0x245   : > { %v5619_v37 = vpop.eup %5618  ;;  %5636 = vtanh.f32 %v1915_v4  ;;  %v3957_v51 = vmul.f32 %v7496_v39, %v3488_v35  ;;  %v4158_v63 = vadd.f32 %v4157_v10, %v3888_v44 }
 0x246   : > { %v5621_v55 = vpop.eup %5620  ;;  %v3889_v52 = vmul.f32 %v5619_v37, %v8034_v20  ;;  %5638 = vtanh.f32 %v1923_v23  ;;  %v8038_v20 = vld [vmem:[#allocation27_spill] sm:$0xff] }
 0x247   : > { %v5623_v2 = vpop.eup %5622  ;;  %v4237_v47 = vadd.f32 %v4236_v18, %v3957_v51  ;;  %5640 = vtanh.f32 %v2315_v1  ;;  %v3500_v39 = vpop.permute.xlu1 %3499  ;;  %v3891_v18 = vmul.f32 %v5621_v55, %v8037_v3 }
 0x248   : > { %v3496_v60 = vpop.permute.xlu0 %3495  ;;  %v5625_v45 = vpop.eup %5624  ;;  %v4159_v31 = vadd.f32 %v4158_v63, %v3889_v52  ;;  %v3890_v4 = vmul.f32 %v5623_v2, %v8035_v9  ;;  %v3960_v48 = vmul.f32 %v7500_v28, %v3500_v39  ;;  %5642 = vtanh.f32 %v2320_v19 }
 0x249   : > { %v3959_v35 = vmul.f32 %v7479_v54, %v3496_v60  ;;  %v5627_v23 = vpop.eup %5626  ;;  %v4238_v44 = vadd.f32 %v4237_v47, %v3958_v6  ;;  %5644 = vtanh.f32 %v2323_v42  ;;  %v7553_v54 = vld [vmem:[%s7749_s4] ss:$0 sm:$0xff]  ;;  %v4204_v60 = vrot.slane %v7287_v25, 4 }
 0x24a   : > { %v4160_v1 = vadd.f32 %v4159_v31, %v3890_v4  ;;  %v5629_v10 = vpop.eup %5628  ;;  %v2328_v36 = vadd.f32 %v7553_v54, %v7304_v16  ;;  %v3892_v52 = vmul.f32 %v5627_v23, %v8038_v20  ;;  %5646 = vtanh.f32 %v2200_v8  ;;  %v8039_v16 = vld [vmem:[#allocation98_spill] sm:$0xff]  ;;  %v8040_v8 = vld [vmem:[#allocation97_spill] sm:$0xff] }
 0x24b   : > { %v4239_v37 = vadd.f32 %v4238_v44, %v3959_v35  ;;  %v3511_v51 = vpop.permute.xlu1 %3510  ;;  %v5631_v6 = vpop.eup %5630  ;;  %v2203_v47 = vadd.f32 %v7553_v54, %v6995_v59  ;;  %v2331_v59 = vadd.f32 %v7553_v54, %v7317_v41  ;;  %v2216_v53 = vadd.f32 %v7553_v54, %v7027_v33 }
 0x24c   : > { %v3507_v28 = vpop.permute.xlu0 %3506  ;;  %v4161_v63 = vadd.f32 %v4160_v1, %v3891_v18  ;;  %v3962_v55 = vmul.f32 %v5625_v45, %v3511_v51  ;;  %v5633_v19 = vpop.eup %5632  ;;  %5648 = vtanh.f32 %v2328_v36  ;;  %v8042_v36 = vld [vmem:[#allocation99_spill] sm:$0xff] }
 0x24d   : > { %v3961_v2 = vmul.f32 %v5617_v32, %v3507_v28  ;;  %v4240_v42 = vadd.f32 %v4239_v37, %v3960_v48  ;;  %v5635_v39 = vpop.eup %5634  ;;  %v3893_v31 = vmul.f32 %v5633_v19, %v8039_v16  ;;  %v8041_v37 = vld [vmem:[#allocation32_spill] sm:$0xff]  ;;  %5650 = vtanh.f32 %v2203_v47 }
 0x24e   : > { %v4162_v9 = vadd.f32 %v4161_v63, %v3892_v52  ;;  %v2208_v51 = vadd.f32 %v7553_v54, %v8041_v37  ;;  %v4205_v28 = vadd.f32 %v4204_v60, %v7287_v25  ;;  %v3895_v41 = vmul.f32 %v5635_v39, %v8042_v36  ;;  %v8043_v63 = vld [vmem:[#allocation31_spill] sm:$0xff]  ;;  %v8044_v25 = vld [vmem:[#allocation102_spill] sm:$0xff] }
 0x24f   : > { %v4247_v4 = vadd.f32 %v3962_v55, %v3961_v2  ;;  %v5637_v35 = vpop.eup %5636  ;;  %v4241_v45 = vrot.slane %v4240_v42, 4  ;;  %v3519_v32 = vpop.permute.xlu1 %3518  ;;  %5652 = vtanh.f32 %v2331_v59 }
 0x250   : > { %v3515_v23 = vpop.permute.xlu0 %3514  ;;  %v5639_v48 = vpop.eup %5638  ;;  %v4163_v58 = vadd.f32 %v4162_v9, %v3893_v31  ;;  %v3894_v44 = vmul.f32 %v5637_v35, %v8040_v8  ;;  %v3964_v3 = vmul.f32 %v5629_v10, %v3519_v32  ;;  %5654 = vtanh.f32 %v2208_v51 }
 0x251   : > { %v3963_v18 = vmul.f32 %v7528_v11, %v3515_v23  ;;  %v5641_v1 = vpop.eup %5640  ;;  %v3896_v55 = vmul.f32 %v5639_v48, %v8043_v63  ;;  %v4242_v10 = vadd.f32 %v4241_v45, %v4240_v42  ;;  %v2336_v11 = vadd.f32 %v7553_v54, %v7297_v15 }
 0x252   : > { %v4164_v20 = vadd.f32 %v4163_v58, %v3894_v44  ;;  %v5643_v47 = vpop.eup %5642  ;;  %v2211_v42 = vadd.f32 %v7553_v54, %v8044_v25  ;;  %v2339_v23 = vadd.f32 %v7553_v54, %v7314_v49  ;;  %v2344_v49 = vadd.f32 %v7553_v54, %v7344_v22 }
 0x253   : > { %v4248_v52 = vadd.f32 %v4247_v4, %v3963_v18  ;;  %v3645_v2 = vpop.permute.xlu1 %3644  ;;  %v5645_v32 = vpop.eup %5644  ;;  %v4206_v4 = vrot.slane %v4205_v28, 2  ;;  %v4243_v45 = vrot.slane %v4242_v10, 2  ;;  %5656 = vtanh.f32 %v2336_v11 }
 0x254   : > { %v3641_v19 = vpop.permute.xlu0 %3640  ;;  %v4165_v16 = vadd.f32 %v4164_v20, %v3895_v41  ;;  %v3994_v31 = vmul.f32 %v5641_v1, %v3645_v2  ;;  %v5647_v15 = vpop.eup %5646  ;;  %5658 = vtanh.f32 %v2211_v42  ;;  %v2219_v11 = vadd.f32 %v7553_v54, %v7038_v40 }
 0x255   : > { %v3993_v9 = vmul.f32 %v5631_v6, %v3641_v19  ;;  %v4249_v35 = vadd.f32 %v4248_v52, %v3964_v3  ;;  %v4207_v1 = vadd.f32 %v4206_v4, %v4205_v28  ;;  %v4244_v37 = vadd.f32 %v4243_v45, %v4242_v10 }
 0x256   : > { %v4166_v39 = vadd.f32 %v4165_v16, %v3896_v55  ;;  %v5649_v8 = vpop.eup %5648  ;;  %5660 = vtanh.f32 %v2339_v23  ;;  %v2347_v16 = vadd.f32 %v7553_v54, %v7356_v56  ;;  %v2224_v40 = vadd.f32 %v7553_v54, %v7015_v50 }
 0x257   : > { %v4284_v60 = vadd.f32 %v3994_v31, %v3993_v9  ;;  %v3653_v6 = vpop.permute.xlu1 %3652  ;;  %v5651_v18 = vpop.eup %5650  ;;  %5662 = vtanh.f32 %v2216_v53  ;;  %v4208_v28 = vrot.slane %v4207_v1, 1  ;;  %v4245_v9 = vrot.slane %v4244_v37, 1 }
 0x258   : > { %v3649_v59 = vpop.permute.xlu0 %3648  ;;  %v4167_v48 = vrot.slane %v4166_v39, 4  ;;  %v3996_v58 = vmul.f32 %v5645_v32, %v3653_v6  ;;  %5664 = vtanh.f32 %v2344_v49  ;;  %v2352_v56 = vadd.f32 %v7553_v54, %v7335_v7 }
 0x259   : > { %v3995_v14 = vmul.f32 %v5643_v47, %v3649_v59  ;;  %v5653_v55 = vpop.eup %5652  ;;  %5666 = vtanh.f32 %v2219_v11  ;;  %v4246_v6 = vadd.f32 %v4245_v9, %v4244_v37  ;;  %v2232_v49 = vadd.f32 %v7553_v54, %v7063_v5  ;;  %v5766_v9 = vld [vmem:[%s5975_s29 + $0x8] sm:$0xff] }
 0x25a   : > { %v4168_v44 = vadd.f32 %v4167_v48, %v4166_v39  ;;  %v5655_v22 = vpop.eup %5654  ;;  %5668 = vtanh.f32 %v2347_v16  ;;  %v2363_v16 = vadd.f32 %v7553_v54, %v7390_v13 }
 0x25b   : > { %v4285_v3 = vadd.f32 %v4284_v60, %v3995_v14  ;;  %v3657_v51 = vpop.permute.xlu1 %3656  ;;  %5670 = vtanh.f32 %v2224_v40 }
 0x25c   : > { %v3523_v36 = vpop.permute.xlu0 %3522  ;;  %v4169_v41 = vrot.slane %v4168_v44, 2  ;;  %v3997_v20 = vmul.f32 %v5649_v8, %v3657_v51  ;;  %v2227_v8 = vadd.f32 %v7553_v54, %v7033_v26  ;;  %5672 = vtanh.f32 %v2352_v56 }
 0x25d   : > { %v4286_v52 = vadd.f32 %v4285_v3, %v3996_v58  ;;  %v3965_v63 = vmul.f32 %v5647_v15, %v3523_v36  ;;  %v5657_v42 = vpop.eup %5656  ;;  %v4209_v15 = vadd.f32 %v4208_v28, %v4207_v1  ;;  %v2355_v3 = vadd.f32 %v7553_v54, %v7351_v34 }
 0x25e   : > { %v4170_v33 = vadd.f32 %v4169_v41, %v4168_v44  ;;  %v5659_v23 = vpop.eup %5658  ;;  %5674 = vtanh.f32 %v2227_v8  ;;  %v2360_v34 = vadd.f32 %v7553_v54, %v7379_v27  ;;  %v5765_v27 = vld [vmem:[%s5975_s29] sm:$0xff] }
 0x25f   : > { %v4287_v2 = vadd.f32 %v4286_v52, %v3997_v20  ;;  %v4250_v19 = vadd.f32 %v4249_v35, %v3965_v63  ;;  %v3661_v10 = vpop.permute.xlu1 %3660  ;;  %5676 = vtanh.f32 %v2355_v3 }
 0x260   : > { %v3527_v47 = vpop.permute.xlu0 %3526  ;;  %v4171_v31 = vrot.slane %v4170_v33, 1  ;;  %v3998_v32 = vmul.f32 %v5653_v55, %v3661_v10  ;;  %v5661_v58 = vpop.eup %5660  ;;  %5678 = vtanh.f32 %v2232_v49 }
 0x261   : > { %v3966_v25 = vmul.f32 %v5651_v18, %v3527_v47  ;;  %5680 = vtanh.f32 %v2360_v34 }
 0x262   : > { %v4172_v35 = vadd.f32 %v4171_v31, %v4170_v33  ;;  %v4288_v39 = vadd.f32 %v4287_v2, %v3998_v32  ;;  %v2235_v2 = vadd.f32 %v7553_v54, %v7074_v43  ;;  %v4347_v32 = vadd.f32 %v5766_v9, %v5765_v27 }
 0x263   : > { %v4251_v60 = vadd.f32 %v4250_v19, %v3966_v25  ;;  %v3665_v4 = vpop.permute.xlu1 %3664 }
 0x264   : > { %v3531_v45 = vpop.permute.xlu0 %3530  ;;  %v4334_v59 = vsel %vm4333_vm3, %v4172_v35, %v7403_v61  ;;  %v3999_v48 = vmul.f32 %v5657_v42, %v3665_v4  ;;  %v5663_v61 = vpop.eup %5662  ;;  %v2240_v42 = vadd.f32 %v7553_v54, %v7056_v57  ;;  %5682 = vtanh.f32 %v2235_v2  ;;  %4348 = vadd.xlane.f32.xlu0 %v4347_v32 }
 0x265   : > { %v3967_v50 = vmul.f32 %v5655_v22, %v3531_v45  ;;  %v4336_v14 = vsel %vm4335_vm4, %v4209_v15, %v4334_v59  ;;  %v5665_v36 = vpop.eup %5664  ;;  %v2368_v35 = vadd.f32 %v7553_v54, %v7370_v30  ;;  %5684 = vtanh.f32 %v2363_v16  ;;  %v8045_v45 = vld [vmem:[#allocation37_spill] sm:$0xff]  ;;  %v8046_v59 = vld [vmem:[#allocation59_spill] sm:$0xff] }
 0x266   : > { %v7599_v53 = vsel %vm4337_vm5, %v4246_v6, %v4336_v14  ;;  %v4289_v44 = vadd.f32 %v4288_v39, %v3999_v48  ;;  %v5667_v20 = vpop.eup %5666  ;;  %5686 = vtanh.f32 %v2240_v42  ;;  %v2371_v48 = vadd.f32 %v7553_v54, %v8046_v59 }
 0x267   : > { %v4252_v7 = vadd.f32 %v4251_v60, %v3967_v50  ;;  %v3669_v18 = vpop.permute.xlu1 %3668  ;;  %v5669_v33 = vpop.eup %5668  ;;  %5688 = vtanh.f32 %v2368_v35  ;;  %v2392_v59 = vadd.f32 %v7553_v54, %v7450_v21  ;;  %v8053_v21 = vld [vmem:[#allocation49_spill] sm:$0xff] }
 0x268   : > { %v3535_v1 = vpop.permute.xlu0 %3534  ;;  %v4000_v37 = vmul.f32 %v5661_v58, %v3669_v18  ;;  %v5671_v28 = vpop.eup %5670 }
 0x269   : > { %v3968_v51 = vmul.f32 %v5659_v23, %v3535_v1  ;;  %v5673_v25 = vpop.eup %5672  ;;  %v2243_v23 = vadd.f32 %v7553_v54, %v8045_v45 }
 0x26a   : > { %v4290_v41 = vadd.f32 %v4289_v44, %v4000_v37  ;;  %v5675_v15 = vpop.eup %5674 }
 0x26b   : > { %v4253_v26 = vadd.f32 %v4252_v7, %v3968_v51  ;;  %v3673_v52 = vpop.permute.xlu1 %3672  ;;  %v5677_v4 = vpop.eup %5676  ;;  %5690 = vtanh.f32 %v2243_v23  ;;  %v8047_v7 = vld [vmem:[#allocation39_spill] sm:$0xff]  ;;  %v2376_v51 = vadd.f32 %v7553_v54, %v7416_v0 }
 0x26c   : > { %v3539_v63 = vpop.permute.xlu0 %3538  ;;  %v4001_v55 = vmul.f32 %v5665_v36, %v3673_v52  ;;  %v5679_v58 = vpop.eup %5678  ;;  %v2248_v3 = vadd.f32 %v7553_v54, %v8047_v7  ;;  %5692 = vtanh.f32 %v2371_v48 }
 0x26d   : > { %v3969_v11 = vmul.f32 %v5663_v61, %v3539_v63  ;;  %v5681_v44 = vpop.eup %5680 }
 0x26e   : > { %v4291_v19 = vadd.f32 %v4290_v41, %v4001_v55  ;;  %v5683_v36 = vpop.eup %5682  ;;  %5694 = vtanh.f32 %v2248_v3 }
 0x26f   : > { %v4254_v5 = vadd.f32 %v4253_v26, %v3969_v11  ;;  %v3677_v10 = vpop.permute.xlu1 %3676  ;;  %v5685_v26 = vpop.eup %5684  ;;  %5696 = vtanh.f32 %v2376_v51 }
 0x270   : > { %v3543_v47 = vpop.permute.xlu0 %3542  ;;  %v4002_v22 = vmul.f32 %v5669_v33, %v3677_v10  ;;  %v2379_v33 = vadd.f32 %v7553_v54, %v7426_v38  ;;  %v5687_v2 = vpop.eup %5686 }
 0x271   : > { %v3970_v31 = vmul.f32 %v5667_v20, %v3543_v47  ;;  %v8048_v20 = vld [vmem:[#allocation41_spill] sm:$0xff]  ;;  %v5689_v0 = vpop.eup %5688  ;;  %v2384_v47 = vadd.f32 %v7553_v54, %v7408_v17 }
 0x272   : > { %v4292_v43 = vadd.f32 %v4291_v19, %v4002_v22  ;;  %v2251_v52 = vadd.f32 %v7553_v54, %v8048_v20  ;;  %v8054_v20 = vld [vmem:[#allocation20_spill] sm:$0xff] }
 0x273   : > { %v4255_v40 = vadd.f32 %v4254_v5, %v3970_v31  ;;  %v3681_v39 = vpop.permute.xlu1 %3680 }
 0x274   : > { %v3547_v60 = vpop.permute.xlu0 %3546  ;;  %v4003_v13 = vmul.f32 %v5673_v25, %v3681_v39  ;;  %5698 = vtanh.f32 %v2251_v52  ;;  %v8049_v25 = vld [vmem:[#allocation36_spill] sm:$0xff]  ;;  %v2400_v52 = vadd.f32 %v7553_v54, %v8054_v20 }
 0x275   : > { %v3971_v56 = vmul.f32 %v5671_v28, %v3547_v60  ;;  %5700 = vtanh.f32 %v2379_v33  ;;  %v5691_v31 = vpop.eup %5690  ;;  %v2256_v38 = vadd.f32 %v7553_v54, %v8049_v25  ;;  %v8063_v20 = vld [vmem:[#allocation44_spill] sm:$0xff] }
 0x276   : > { %v4293_v6 = vadd.f32 %v4292_v43, %v4003_v13  ;;  %v5693_v32 = vpop.eup %5692  ;;  %5702 = vtanh.f32 %v2384_v47 }
 0x277   : > { %v4256_v57 = vadd.f32 %v4255_v40, %v3971_v56  ;;  %v3685_v50 = vpop.permute.xlu1 %3684  ;;  %v2387_v40 = vadd.f32 %v7553_v54, %v7421_v29  ;;  %5704 = vtanh.f32 %v2256_v38  ;;  %v8050_v56 = vld [vmem:[#allocation38_spill] sm:$0xff] }
 0x278   : > { %v3551_v30 = vpop.permute.xlu0 %3550  ;;  %v4004_v14 = vmul.f32 %v5677_v4, %v3685_v50  ;;  %v5695_v60 = vpop.eup %5694  ;;  %v2259_v4 = vadd.f32 %v7553_v54, %v8050_v56  ;;  %v8059_v56 = vld [vmem:[#allocation53_spill] sm:$0xff] }
 0x279   : > { %v3972_v8 = vmul.f32 %v5675_v15, %v3551_v30  ;;  %v5697_v13 = vpop.eup %5696  ;;  %5706 = vtanh.f32 %v2387_v40 }
 0x27a   : > { %v4294_v18 = vadd.f32 %v4293_v6, %v4004_v14  ;;  %5708 = vtanh.f32 %v2259_v4  ;;  %v2280_v4 = vadd.f32 %v7553_v54, %v8059_v56 }
 0x27b   : > { %v4257_v1 = vadd.f32 %v4256_v57, %v3972_v8  ;;  %v3689_v61 = vpop.permute.xlu1 %3688  ;;  %5710 = vtanh.f32 %v2392_v59 }
 0x27c   : > { %v3555_v37 = vpop.permute.xlu0 %3554  ;;  %v4005_v49 = vmul.f32 %v5681_v44, %v3689_v61 }
 0x27d   : > { %v3973_v41 = vmul.f32 %v5679_v58, %v3555_v37  ;;  %v8051_v58 = vld [vmem:[#allocation46_spill] sm:$0xff] }
 0x27e   : > { %v4295_v63 = vadd.f32 %v4294_v18, %v4005_v49  ;;  %v5699_v48 = vpop.eup %5698  ;;  %v2264_v14 = vadd.f32 %v7553_v54, %v8051_v58  ;;  %v8052_v18 = vld [vmem:[#allocation58_spill] sm:$0xff]  ;;  %v8060_v58 = vld [vmem:[#allocation55_spill] sm:$0xff] }
 0x27f   : > { %v4258_v34 = vadd.f32 %v4257_v1, %v3973_v41  ;;  %v3693_v55 = vpop.permute.xlu1 %3692  ;;  %v5701_v30 = vpop.eup %5700  ;;  %v2395_v1 = vadd.f32 %v7553_v54, %v8052_v18 }
 0x280   : > { %v3559_v11 = vpop.permute.xlu0 %3558  ;;  %v4006_v19 = vmul.f32 %v5685_v26, %v3693_v55  ;;  %v5703_v51 = vpop.eup %5702  ;;  %5712 = vtanh.f32 %v2264_v14  ;;  %v2283_v14 = vadd.f32 %v7553_v54, %v8060_v58 }
 0x281   : > { %v3974_v5 = vmul.f32 %v5683_v36, %v3559_v11  ;;  %v2267_v36 = vadd.f32 %v7553_v54, %v8053_v21  ;;  %v5705_v26 = vpop.eup %5704  ;;  %5714 = vtanh.f32 %v2395_v1 }
 0x282   : > { %v4296_v28 = vadd.f32 %v4295_v63, %v4006_v19 }
 0x283   : > { %v4259_v10 = vadd.f32 %v4258_v34, %v3974_v5  ;;  %v3697_v16 = vpop.permute.xlu1 %3696  ;;  %v5707_v33 = vpop.eup %5706  ;;  %5716 = vtanh.f32 %v2267_v36 }
 0x284   : > { %v3563_v22 = vpop.permute.xlu0 %3562  ;;  %v4007_v27 = vmul.f32 %v5689_v0, %v3697_v16  ;;  %5718 = vtanh.f32 %v2400_v52  ;;  %v2419_v52 = vadd.f32 %v7553_v54, %v8063_v20 }
 0x285   : > { %v3975_v9 = vmul.f32 %v5687_v2, %v3563_v22  ;;  %v8055_v2 = vld [vmem:[#allocation40_spill] sm:$0xff] }
 0x286   : > { %v4297_v42 = vadd.f32 %v4296_v28, %v4007_v27  ;;  %v2272_v19 = vadd.f32 %v7553_v54, %v8055_v2  ;;  %v5709_v28 = vpop.eup %5708  ;;  %v8064_v2 = vld [vmem:[#allocation52_spill] sm:$0xff] }
 0x287   : > { %v4260_v43 = vadd.f32 %v4259_v10, %v3975_v9  ;;  %v3701_v35 = vpop.permute.xlu1 %3700  ;;  %v8056_v10 = vld [vmem:[#allocation11_spill] sm:$0xff]  ;;  %v5711_v9 = vpop.eup %5710 }
 0x288   : > { %v3567_v39 = vpop.permute.xlu0 %3566  ;;  %v4008_v17 = vmul.f32 %v5693_v32, %v3701_v35  ;;  %v2403_v47 = vadd.f32 %v7553_v54, %v8056_v10  ;;  %5720 = vtanh.f32 %v2272_v19  ;;  %v8057_v32 = vld [vmem:[#allocation45_spill] sm:$0xff]  ;;  %v2291_v19 = vadd.f32 %v7553_v54, %v8064_v2 }
 0x289   : > { %v3976_v15 = vmul.f32 %v5691_v31, %v3567_v39  ;;  %v2275_v25 = vadd.f32 %v7553_v54, %v8057_v32  ;;  %v8058_v39 = vld [vmem:[#allocation61_spill] sm:$0xff] }
 0x28a   : > { %v4298_v45 = vadd.f32 %v4297_v42, %v4008_v17  ;;  %5722 = vtanh.f32 %v2403_v47 }
 0x28b   : > { %v4261_v23 = vadd.f32 %v4260_v43, %v3976_v15  ;;  %v3708_v6 = vpop.permute.xlu1 %3707  ;;  %v5713_v43 = vpop.eup %5712  ;;  %5724 = vtanh.f32 %v2275_v25 }
 0x28c   : > { %v3574_v57 = vpop.permute.xlu0 %3573  ;;  %v4009_v29 = vmul.f32 %v5697_v13, %v3708_v6  ;;  %v5715_v13 = vpop.eup %5714 }
 0x28d   : > { %v3977_v50 = vmul.f32 %v5695_v60, %v3574_v57  ;;  %v2408_v60 = vadd.f32 %v7553_v54, %v8058_v39  ;;  %v5717_v6 = vpop.eup %5716 }
 0x28e   : > { %v4299_v8 = vadd.f32 %v4298_v45, %v4009_v29 }
 0x28f   : > { %v4262_v44 = vadd.f32 %v4261_v23, %v3977_v50  ;;  %v3712_v7 = vpop.permute.xlu1 %3711  ;;  %5726 = vtanh.f32 %v2408_v60 }
 0x290   : > { %v3578_v3 = vpop.permute.xlu0 %3577  ;;  %v4010_v61 = vmul.f32 %v5701_v30, %v3712_v7  ;;  %v5719_v30 = vpop.eup %5718  ;;  %5728 = vtanh.f32 %v2280_v4 }
 0x291   : > { %v3978_v37 = vmul.f32 %v5699_v48, %v3578_v3  ;;  %v2411_v48 = vadd.f32 %v7553_v54, %v7494_v46  ;;  %v8061_v3 = vld [vmem:[#allocation101_spill] sm:$0xff]  ;;  %v8062_v46 = vld [vmem:[#allocation48_spill] sm:$0xff] }
 0x292   : > { %v4300_v49 = vadd.f32 %v4299_v8, %v4010_v61  ;;  %v5721_v7 = vpop.eup %5720  ;;  %v2416_v18 = vadd.f32 %v7553_v54, %v8061_v3  ;;  %v2288_v36 = vadd.f32 %v7553_v54, %v8062_v46 }
 0x293   : > { %v4263_v41 = vadd.f32 %v4262_v44, %v3978_v37  ;;  %v3716_v63 = vpop.permute.xlu1 %3715  ;;  %5730 = vtanh.f32 %v2411_v48 }
 0x294   : > { %v3582_v34 = vpop.permute.xlu0 %3581  ;;  %v4011_v55 = vmul.f32 %v5703_v51, %v3716_v63  ;;  %v5723_v21 = vpop.eup %5722  ;;  %5732 = vtanh.f32 %v2283_v14  ;;  %v8068_v14 = vld [vmem:[#allocation60_spill] sm:$0xff] }
 0x295   : > { %v3979_v11 = vmul.f32 %v5705_v26, %v3582_v34  ;;  %v5725_v26 = vpop.eup %5724  ;;  %5734 = vtanh.f32 %v2416_v18 }
 0x296   : > { %v4301_v5 = vadd.f32 %v4300_v49, %v4011_v55  ;;  %5736 = vtanh.f32 %v2288_v36 }
 0x297   : > { %v4264_v0 = vadd.f32 %v4263_v41, %v3979_v11  ;;  %v3720_v16 = vpop.permute.xlu1 %3719  ;;  %5738 = vtanh.f32 %v2419_v52 }
 0x298   : > { %v3586_v22 = vpop.permute.xlu0 %3585  ;;  %v4012_v31 = vmul.f32 %v5707_v33, %v3720_v16  ;;  %v2424_v16 = vadd.f32 %v7553_v54, %v7517_v62  ;;  %5740 = vtanh.f32 %v2291_v19  ;;  %v8066_v62 = vld [vmem:[#allocation9_spill] sm:$0xff] }
 0x299   : > { %v3980_v27 = vmul.f32 %v5709_v28, %v3586_v22  ;;  %v5727_v33 = vpop.eup %5726 }
 0x29a   : > { %v4302_v38 = vadd.f32 %v4301_v5, %v4012_v31  ;;  %v5729_v28 = vpop.eup %5728  ;;  %5742 = vtanh.f32 %v2424_v16 }
 0x29b   : > { %v4265_v42 = vadd.f32 %v4264_v0, %v3980_v27  ;;  %v3724_v40 = vpop.permute.xlu1 %3723 }
 0x29c   : > { %v3590_v35 = vpop.permute.xlu0 %3589  ;;  %v4013_v17 = vmul.f32 %v5711_v9, %v3724_v40  ;;  %v8065_v9 = vld [vmem:[#allocation57_spill] sm:$0xff] }
 0x29d   : > { %v3981_v15 = vmul.f32 %v5713_v43, %v3590_v35  ;;  %v5731_v27 = vpop.eup %5730  ;;  %v2296_v32 = vadd.f32 %v7553_v54, %v8065_v9  ;;  %v2427_v35 = vadd.f32 %v7553_v54, %v7526_v12  ;;  %v8067_v12 = vld [vmem:[#allocation54_spill] sm:$0xff] }
 0x29e   : > { %v4303_v45 = vadd.f32 %v4302_v38, %v4013_v17 }
 0x29f   : > { %v4266_v23 = vadd.f32 %v4265_v42, %v3981_v15  ;;  %v3728_v57 = vpop.permute.xlu1 %3727  ;;  %v5733_v42 = vpop.eup %5732  ;;  %5744 = vtanh.f32 %v2296_v32  ;;  %v2299_v15 = vadd.f32 %v7553_v54, %v8066_v62 }
 0x2a0   : > { %v3594_v59 = vpop.permute.xlu0 %3593  ;;  %v4014_v29 = vmul.f32 %v5715_v13, %v3728_v57  ;;  %v5735_v17 = vpop.eup %5734  ;;  %5746 = vtanh.f32 %v2427_v35 }
 0x2a1   : > { %v3982_v50 = vmul.f32 %v5717_v6, %v3594_v59  ;;  %v5737_v4 = vpop.eup %5736  ;;  %5748 = vtanh.f32 %v2299_v15 }
 0x2a2   : > { %v4304_v8 = vadd.f32 %v4303_v45, %v4014_v29  ;;  %v2432_v45 = vadd.f32 %v7553_v54, %v7511_v24  ;;  %v5739_v48 = vpop.eup %5738  ;;  %v2304_v29 = vadd.f32 %v7553_v54, %v8067_v12  ;;  %v4346_v12 = vld [vmem:[#allocation2] sm:$0xff] }
 0x2a3   : > { %v4267_v44 = vadd.f32 %v4266_v23, %v3982_v50  ;;  %v3732_v1 = vpop.permute.xlu1 %3731  ;;  %v5741_v58 = vpop.eup %5740 }
 0x2a4   : > { %v3598_v61 = vpop.permute.xlu0 %3597  ;;  %v4015_v37 = vmul.f32 %v5719_v30, %v3732_v1  ;;  %5750 = vtanh.f32 %v2432_v45  ;;  %v5743_v18 = vpop.eup %5742  ;;  %v8069_v1 = vld [vmem:[#allocation56_spill] sm:$0xff] }
 0x2a5   : > { %v3983_v51 = vmul.f32 %v5721_v7, %v3598_v61  ;;  %5752 = vtanh.f32 %v2304_v29  ;;  %v2307_v61 = vadd.f32 %v7553_v54, %v8069_v1 }
 0x2a6   : > { %v4305_v49 = vadd.f32 %v4304_v8, %v4015_v37  ;;  %v2435_v8 = vadd.f32 %v7553_v54, %v8068_v14 }
 0x2a7   : > { %v4268_v41 = vadd.f32 %v4267_v44, %v3983_v51  ;;  %v3736_v63 = vpop.permute.xlu1 %3735 }
 0x2a8   : > { %v3602_v34 = vpop.permute.xlu0 %3601  ;;  %v4016_v55 = vmul.f32 %v5723_v21, %v3736_v63  ;;  %5754 = vtanh.f32 %v2435_v8 }
 0x2a9   : > { %v3984_v11 = vmul.f32 %v5725_v26, %v3602_v34  ;;  %v5745_v21 = vpop.eup %5744  ;;  %5756 = vtanh.f32 %v2307_v61 }
 0x2aa   : > { %v4306_v5 = vadd.f32 %v4305_v49, %v4016_v55  ;;  %v5747_v26 = vpop.eup %5746 }
 0x2ab   : > { %v4269_v0 = vadd.f32 %v4268_v41, %v3984_v11  ;;  %v3740_v10 = vpop.permute.xlu1 %3739  ;;  %v5749_v63 = vpop.eup %5748 }
 0x2ac   : > { %v3606_v47 = vpop.permute.xlu0 %3605  ;;  %v4017_v22 = vmul.f32 %v5727_v33, %v3740_v10 }
 0x2ad   : > { %v3985_v31 = vmul.f32 %v5729_v28, %v3606_v47 }
 0x2ae   : > { %v4307_v25 = vadd.f32 %v4306_v5, %v4017_v22  ;;  %v5751_v2 = vpop.eup %5750 }
 0x2af   : > { %v4270_v38 = vadd.f32 %v4269_v0, %v3985_v31  ;;  %v3744_v43 = vpop.permute.xlu1 %3743  ;;  %v5753_v5 = vpop.eup %5752 }
 0x2b0   : > { %v3610_v40 = vpop.permute.xlu0 %3609  ;;  %v4018_v39 = vmul.f32 %v5731_v27, %v3744_v43 }
 0x2b1   : > { %v3986_v60 = vmul.f32 %v5733_v42, %v3610_v40 }
 0x2b2   : > { %v4308_v13 = vadd.f32 %v4307_v25, %v4018_v39  ;;  %v5755_v16 = vpop.eup %5754 }
 0x2b3   : > { %v4271_v56 = vadd.f32 %v4270_v38, %v3986_v60  ;;  %v3748_v23 = vpop.permute.xlu1 %3747  ;;  %v5757_v27 = vpop.eup %5756 }
 0x2b4   : > { %v3614_v6 = vpop.permute.xlu0 %3613  ;;  %v4019_v57 = vmul.f32 %v5735_v17, %v3748_v23 }
 0x2b5   : > { %v3987_v59 = vmul.f32 %v5737_v4, %v3614_v6  ;;  %v2696_v6 = vld [vmem:[%s5962_s14] sm:$0xff] }
 0x2b6   : > { %v4309_v50 = vadd.f32 %v4308_v13, %v4019_v57 }
 0x2b7   : > { %v4272_v30 = vadd.f32 %v4271_v56, %v3987_v59  ;;  %v3752_v44 = vpop.permute.xlu1 %3751 }
 0x2b8   : > { %v3618_v7 = vpop.permute.xlu0 %3617  ;;  %v4020_v24 = vmul.f32 %v5739_v48, %v3752_v44 }
 0x2b9   : > { %v3988_v3 = vmul.f32 %v5741_v58, %v3618_v7 }
 0x2ba   : > { %v4310_v37 = vadd.f32 %v4309_v50, %v4020_v24 }
 0x2bb   : > { %v4273_v51 = vadd.f32 %v4272_v30, %v3988_v3  ;;  %v3756_v46 = vpop.permute.xlu1 %3755 }
 0x2bc   : > { %v3622_v36 = vpop.permute.xlu0 %3621  ;;  %v4021_v49 = vmul.f32 %v5743_v18, %v3756_v46 }
 0x2bd   : > { %v3989_v41 = vmul.f32 %v5745_v21, %v3622_v36 }
 0x2be   : > { %v4311_v20 = vadd.f32 %v4310_v37, %v4021_v49 }
 0x2bf   : > { %v4274_v52 = vadd.f32 %v4273_v51, %v3989_v41  ;;  %v3760_v34 = vpop.permute.xlu1 %3759 }
 0x2c0   : > { %v3626_v55 = vpop.permute.xlu0 %3625  ;;  %v4022_v11 = vmul.f32 %v5747_v26, %v3760_v34 }
 0x2c1   : > { %v3990_v33 = vmul.f32 %v5749_v63, %v3626_v55 }
 0x2c2   : > { %v4312_v19 = vadd.f32 %v4311_v20, %v4022_v11 }
 0x2c3   : > { %v4275_v54 = vadd.f32 %v4274_v52, %v3990_v33  ;;  %v3764_v0 = vpop.permute.xlu1 %3763 }
 0x2c4   : > { %v3630_v28 = vpop.permute.xlu0 %3629  ;;  %v4023_v10 = vmul.f32 %v5751_v2, %v3764_v0 }
 0x2c5   : > { %v3991_v47 = vmul.f32 %v5753_v5, %v3630_v28 }
 0x2c6   : > { %v4313_v22 = vadd.f32 %v4312_v19, %v4023_v10 }
 0x2c7   : > { %v4276_v31 = vadd.f32 %v4275_v54, %v3991_v47  ;;  %v3768_v9 = vpop.permute.xlu1 %3767 }
 0x2c8   : > { %v3634_v32 = vpop.permute.xlu0 %3633  ;;  %v4024_v25 = vmul.f32 %v5755_v16, %v3768_v9 }
 0x2c9   : > { %v3992_v38 = vmul.f32 %v5757_v27, %v3634_v32 }
 0x2ca   : > { %v4314_v42 = vadd.f32 %v4313_v22, %v4024_v25 }
 0x2cb   : > { %v4277_v43 = vadd.f32 %v4276_v31, %v3992_v38 }
 0x2cc   : > { %v4315_v40 = vrot.slane %v4314_v42, 4 }
 0x2cd   : > { %v4278_v35 = vrot.slane %v4277_v43, 4 }
 0x2ce   : > { %v4316_v39 = vadd.f32 %v4315_v40, %v4314_v42 }
 0x2cf   : > { %v4279_v60 = vadd.f32 %v4278_v35, %v4277_v43 }
 0x2d0   : > { %v4317_v17 = vrot.slane %v4316_v39, 2 }
 0x2d1   : > { %v4280_v62 = vrot.slane %v4279_v60, 2 }
 0x2d2   : > { %v4318_v15 = vadd.f32 %v4317_v17, %v4316_v39 }
 0x2d3   : > { %v4281_v13 = vadd.f32 %v4280_v62, %v4279_v60 }
 0x2d4   : > { %v4319_v56 = vrot.slane %v4318_v15, 1 }
 0x2d5   : > { %v4282_v4 = vrot.slane %v4281_v13, 1 }
 0x2d6   : > { %v4320_v45 = vadd.f32 %v4319_v56, %v4318_v15 }
 0x2d7   : > { %v4283_v23 = vadd.f32 %v4282_v4, %v4281_v13 }
 0x2d9   : > { %v4340_v57 = vsel %vm4339_vm6, %v4283_v23, %v7599_v53 }
 0x2da   : > { %v4342_v59 = vsel %vm4341_vm7, %v4320_v45, %v4340_v57 }
 0x2db   : > { %v4344_v48 = vadd.f32 %v4342_v59, %v2696_v6 }
 0x2dd   : > { %4345 = vst [vmem:[%s5962_s14] sm:$0xff] %v4344_v48 }
 0x2f1   : > { %v4349_v29 = vpop.xlane.xlu0 %4348 }
 0x2f2   : > { %v4350_v50 = vadd.f32 %v4349_v29, %v4346_v12 }
 0x2f4   : > { %4352 = vst.msk [vmem:[#allocation2] sm:$0xff] %vm278_vm0, %v4350_v50 }
 0x2f5 PF: > { %v5866_v58 = vmov 0   ;;  %v4356_v8 = vld [vmem:[%s5962_s14] sm:$0xff]  ;;  %s4623_s29 = sshll.u32 %s5854_s25, 7  ;;  %s4381_s28 = sshll.u32 %s5962_s14, 4  ;;  %s7697_s28 = int_to_ptr.vmem [resolvable:$true] %s4381_s28 }
 0x2f6   : > { %5767 = vset.pattern.permute.xlu0 %v5866_v58  ;;  %s7695_s12 = scalar_lea.hbm %s7750_s5, %s4623_s29  ;;  %s4368_s13 = scalar_lea.sflag [#allocation6], %s247_s11 }
 0x2f7   : > { %s5782_s15 = scalar_lea.vmem %s7697_s28, 128  ;;  %s5867_s25 = smov [#allocation5]  }
 0x2f8   : > { %p5783_p5 = scmp.ne.s32.totalorder %s7697_s28, %s5782_s15  ;;  %s5786_s16 = sshll.u32 %s5867_s25, 4  ;;  %s5787_s16 = int_to_ptr.vmem [resolvable:$false] %s5786_s16 }
 0x2f9   : > { %s5788_s20 = scalar_lea.vmem %s5787_s16, 256  ;;  %p5789_p8 = scmp.lt.s32.totalorder %s7697_s28, %s5787_s16 }
 0x2fa   : > { %p5784_p6 = pnand %p5783_p5, %p5941_p9  ;;  %p5790_p10 = scmp.lt.s32.totalorder %s5788_s20, %s5782_s15 }
 0x2fb   : > { %v4357_v30 = vld [vmem:[#allocation2] sm:$0xff] }
 0x2fc   : > { %v4358_v14 = vmax.f32 %v4357_v30, 1e-09  ;;  %p5785_p7 = pneg %p5784_p6  ;;  %p5791_p11 = por %p5790_p10, %p5789_p8 }
 0x2fe   : > { %4361 = vperm.xlu0 %5767, %v4358_v14   ;;  %p5792_p12 = pnand %p5791_p11, %p5785_p7 }
 0x37d   : > { %v4362_v53 = vpop.permute.xlu0 %4361 }
 0x37e   : > { %5768 = vrcp.f32 %v4362_v53 }
 0x388   : > { %v5769_v44 = vpop.eup %5768 }
 0x389   : > { %v4365_v7 = vmul.f32 %v5769_v44, %v4356_v8 }
 0x38b   : > { %4366 = vst [vmem:[%s5962_s14] sm:$0xff] %v4365_v7 }
 0x38c   : > { %5795 = shalt.err (!%p5792_p12)
}
 0x38d   : > { %s5796_s11 = scalar_lea.hbm %s7695_s12, 128  ;;  %s5800_s18 = scalar_lea.hbm %s7750_s5, 256 }
 0x38e   : > { %p5797_p0 = scmp.ne.s32.totalorder %s7695_s12, %s5796_s11  ;;  %p5801_p3 = scmp.lt.u32.totalorder %s7695_s12, %s7750_s5 }
 0x38f   : > { %p5802_p4 = scmp.lt.u32.totalorder %s5800_s18, %s5796_s11  ;;  %p5804_p6 = scmp.lt.u32.totalorder %s5796_s11, %s7695_s12 }
 0x390   : > { %p5798_p1 = pnand %p5797_p0, %p5941_p9 }
 0x391   : > { %p5803_p5 = por %p5802_p4, %p5801_p3 }
 0x392   : > { %p5799_p2 = pneg %p5798_p1 }
 0x393   : > { %p5805_p7 = por %p5804_p6, %p5803_p5 }
 0x395   : > { %p5806_p8 = pnand %p5805_p7, %p5799_p2 }
 0x397   : > { %5809 = shalt.err (!%p5806_p8)
}
 0x398   : > { %5052 = dma.vmem_to_hbm [thread:$0]  (%p5941_p9), %s7697_s28, 128, %s7695_s12, %s4368_s13  }
 0x399 PF: > { %p5058_p10 = scmp.ge.s32.totalorder %s5862_s27, 2  ;;  %s4393_s22 = sand.u32 1, %s5842_s23  }
 0x39a   : > { %s4394_s29 = scalar_lea.sflag [#allocation6], %s4393_s22 }
 0x39b   : > { %p5055_p11 = pnand %p5058_p10, %p5948_p13 }
 0x39d   : > { %5837 = dma.done.wait (!%p5055_p11), %s4394_s29, 128  }
 0x39e   : > { %5839 = vsyncadd (!%p5055_p11), %s4394_s29, 4294967168  ;;  %s24_s27 = sadd.s32 1, %s5862_s27   ;;  %s8070_s23 = smov %s5846_s24 }
 0x39f   : > { %p21_p12 = scmp.ge.s32.totalorder %s24_s27, 4   ;;  %s8071_s24 = smov %s5850_s0 }
 0x3a0   : > { %s8072_s0 = smov %s5954_s10  ;;  %s8073_s25 = smov %s5858_s26 }
 0x3a1   : > { %s8074_s26 = smov %s8076_s30  ;;  %23 = sbr.rel (!%p21_p12) target bundleno = 19 (0x13), region = 86 }
 0x3a8   :  { %4399 = vsyncpa [#allocation6], 1 }
 0x3a9   :  { %4401 = vsyncpa [#allocation6 + $0x1], 1 }

</bundles_post_ra>
